<compile_context>
chip_gen: v7x
topology: tpu7x:2x2x1
jax: 0.10.0
libtpu: 0.0.40
codegen_flags: <defaults>
</compile_context>

<pallas_src>
import jax
import jax.numpy as jnp
from jax.experimental import pallas as pl
from jax.experimental.pallas import tpu as pltpu

BN_EPS = 1e-5
LEAKY_SLOPE = 0.01  # nn.LeakyReLU() default negative_slope


def _bn_leakyrelu(y, gamma, beta, inv_n):
    """Train-mode BatchNorm (biased var, single-pass stats) + LeakyReLU(0.01).

    y: (rows, C) float32;  gamma/beta: (1, C) float32.
    """
    s = jnp.sum(y, axis=0, keepdims=True)
    s2 = jnp.sum(y * y, axis=0, keepdims=True)
    mean = s * inv_n
    var = jnp.maximum(s2 * inv_n - mean * mean, 0.0)
    yn = (y - mean) * jax.lax.rsqrt(var + BN_EPS) * gamma + beta
    return jnp.maximum(yn, LEAKY_SLOPE * yn)          # == LeakyReLU(0.01)


def down_conv_block_kernel(x_ref, w1_ref, g1_ref, be1_ref,
                           w2_ref, g2_ref, be2_ref,
                           o_ref, pad_ref, acc_ref):
    N, H, W, Cin = x_ref.shape
    Cout = o_ref.shape[0]                 # output stored as (Cout, N*H*W)
    Cpad = pad_ref.shape[-1]
    rows = N * H * W
    inv_n = 1.0 / float(rows)

    # --- zero ONLY the 1-px halo ring of the shared padded scratch (once) ---
    zrow = jnp.zeros((N, 1, W + 2, Cpad), pad_ref.dtype)
    zcol = jnp.zeros((N, H + 2, 1, Cpad), pad_ref.dtype)
    pad_ref[:, 0:1, :, :] = zrow
    pad_ref[:, H + 1:H + 2, :, :] = zrow
    pad_ref[:, :, 0:1, :] = zcol
    pad_ref[:, :, W + 1:W + 2, :] = zcol

    def conv3x3(w_ref, c):
        """3x3 'SAME' conv of pad_ref[..., :c]: 9 shifted bf16 MXU matmuls
        accumulated into the f32 VMEM scratch accumulator."""
        acc_ref[...] = jnp.zeros(acc_ref.shape, acc_ref.dtype)
        hp = pad_ref[...]                                  # bf16, halo == 0
        for k in range(9):
            dy, dx = k // 3, k % 3
            patch = hp[:, dy:dy + H, dx:dx + W, :c].reshape(rows, c)
            acc_ref[...] += jnp.dot(patch, w_ref[k],       # bf16 x bf16 -> f32
                                    preferred_element_type=jnp.float32)
        return acc_ref[...]

    # ---- conv1 -> BN1 -> LeakyReLU ----
    pad_ref[:, 1:H + 1, 1:W + 1, :Cin] = x_ref[...]
    h = _bn_leakyrelu(conv3x3(w1_ref, Cin), g1_ref[...], be1_ref[...], inv_n)

    # Dropout(p): identity here (p = 0 / eval mode).
    # TODO(synk): train-mode Dropout with p > 0 would need pltpu.prng_seed +
    #             pltpu.prng_random_bits and a 1/(1-p) rescale.

    # ---- conv2 -> BN2 -> LeakyReLU ----
    pad_ref[:, 1:H + 1, 1:W + 1, :Cout] = (
        h.reshape(N, H, W, Cout).astype(pad_ref.dtype))    # intermediate stored once, bf16
    h2 = _bn_leakyrelu(conv3x3(w2_ref, Cout), g2_ref[...], be2_ref[...], inv_n)

    # Lane-dense store: (rows, Cout) -> (Cout, rows).  rows = N*H*W is a
    # multiple of 128 here, so the final store is an unmasked full-lane vst
    # instead of Cout-wide masked partial stores.
    o_ref[...] = jnp.transpose(h2)


def down_block_pallas(x_nchw, params, dropout_p=0.0):
    """DownBlock forward: (N, Cin, H, W) NCHW -> (N, Cout, H//2, W//2) NCHW."""
    del dropout_p  # identity for this forward test (p=0 / eval); see kernel TODO
    w1, b1, g1, be1, w2, b2, g2, be2 = params
    del b1, b2     # bias before train-mode BN is exactly cancelled by the mean
    N, Cin, H2, W2 = x_nchw.shape
    H, W = H2 // 2, W2 // 2
    Cout = w1.shape[-1]
    Cpad = max(Cin, Cout)
    rows = N * H * W

    # MaxPool2d(2) fused with the (required) NCHW->NHWC layout pass + bf16 cast:
    # the full-res input is read from HBM exactly once and there is no jnp.pad copy.
    x = x_nchw.astype(jnp.float32).reshape(N, Cin, H, 2, W, 2)
    x = jnp.max(x, axis=(3, 5))                            # (N, Cin, H, W)
    x = jnp.transpose(x, (0, 2, 3, 1)).astype(jnp.bfloat16)  # (N, H, W, Cin)

    vmem = pl.BlockSpec(memory_space=pltpu.MemorySpace.VMEM)
    out = pl.pallas_call(
        down_conv_block_kernel,
        out_shape=jax.ShapeDtypeStruct((Cout, rows), jnp.float32),
        in_specs=[vmem] * 7,
        out_specs=vmem,
        scratch_shapes=[
            # shared zero-halo buffer (bf16): conv1 input and conv2 input reuse it
            pltpu.VMEM((N, H + 2, W + 2, Cpad), jnp.bfloat16),
            # f32 accumulator for the 9-tap MXU sums
            pltpu.VMEM((rows, Cout), jnp.float32),
        ],
        compiler_params=pltpu.CompilerParams(vmem_limit_bytes=32 * 1024 * 1024),
    )(x,
      w1.reshape(9, Cin, Cout).astype(jnp.bfloat16),
      g1.reshape(1, Cout).astype(jnp.float32),
      be1.reshape(1, Cout).astype(jnp.float32),
      w2.reshape(9, Cout, Cout).astype(jnp.bfloat16),
      g2.reshape(1, Cout).astype(jnp.float32),
      be2.reshape(1, Cout).astype(jnp.float32))
    # (Cout, N*H*W) -> (N, Cout, H, W) NCHW
    return jnp.transpose(out.reshape(Cout, N, H, W), (1, 0, 2, 3))


# ----------------------------- pure-JAX reference -----------------------------
def _maxpool2_nchw(x):
    N, C, H2, W2 = x.shape
    return x.reshape(N, C, H2 // 2, 2, W2 // 2, 2).max(axis=(3, 5))


def down_block_ref(x_nchw, params, matmul_dtype=jnp.float32):
    """Reference DownBlock forward (train-mode BN, dropout p=0).

    matmul_dtype=bfloat16 mimics the kernel's bf16-input / f32-accumulate MXU
    convolutions, giving a tight comparison point; float32 is the exact path.
    """
    w1, b1, g1, be1, w2, b2, g2, be2 = params
    x = _maxpool2_nchw(x_nchw.astype(jnp.float32))
    x = jnp.transpose(x, (0, 2, 3, 1))                     # NHWC

    def conv(h, w, b):
        y = jax.lax.conv_general_dilated(
            h.astype(matmul_dtype), w.astype(matmul_dtype),
            window_strides=(1, 1), padding='SAME',
            dimension_numbers=('NHWC', 'HWIO', 'NHWC'),
            preferred_element_type=jnp.float32)
        return y + b

    def bn_leaky(y, g, be):
        mean = jnp.mean(y, axis=(0, 1, 2), keepdims=True)
        var = jnp.mean((y - mean) ** 2, axis=(0, 1, 2), keepdims=True)
        y = (y - mean) * jax.lax.rsqrt(var + BN_EPS) * g + be
        return jnp.where(y > 0, y, LEAKY_SLOPE * y)

    h = bn_leaky(conv(x, w1, b1), g1, be1)                 # dropout(p=0) == identity
    h = bn_leaky(conv(h, w2, b2), g2, be2)
    return jnp.transpose(h, (0, 3, 1, 2))


def make_params(key, ch_in, ch_out):
    ks = jax.random.split(key, 8)
    w1 = 0.1 * jax.random.normal(ks[0], (3, 3, ch_in, ch_out), jnp.float32)   # HWIO
    b1 = 0.1 * jax.random.normal(ks[1], (ch_out,), jnp.float32)
    g1 = 1.0 + 0.1 * jax.random.normal(ks[2], (ch_out,), jnp.float32)
    be1 = 0.1 * jax.random.normal(ks[3], (ch_out,), jnp.float32)
    w2 = 0.1 * jax.random.normal(ks[4], (3, 3, ch_out, ch_out), jnp.float32)
    b2 = 0.1 * jax.random.normal(ks[5], (ch_out,), jnp.float32)
    g2 = 1.0 + 0.1 * jax.random.normal(ks[6], (ch_out,), jnp.float32)
    be2 = 0.1 * jax.random.normal(ks[7], (ch_out,), jnp.float32)
    return (w1, b1, g1, be1, w2, b2, g2, be2)


if __name__ == "__main__":
    key = jax.random.PRNGKey(0)
    k_x, k_p = jax.random.split(key)

    N, CH_IN, CH_OUT, H, W = 2, 4, 8, 16, 16               # pooled conv runs on 8x8
    x = jax.random.normal(k_x, (N, CH_IN, H, W), jnp.float32)   # NCHW like PyTorch
    params = make_params(k_p, CH_IN, CH_OUT)

    out = jax.block_until_ready(down_block_pallas(x, params, dropout_p=0.0))
    assert out.shape == (N, CH_OUT, H // 2, W // 2), out.shape

    # Tight check vs. a reference using the same bf16-input / f32-accumulate
    # matmul precision as the kernel's MXU path.
    ref_bf16 = down_block_ref(x, params, matmul_dtype=jnp.bfloat16)
    assert jnp.allclose(out, ref_bf16, rtol=2e-3, atol=2e-3), \
        float(jnp.max(jnp.abs(out - ref_bf16)))

    # Looser sanity check vs. the exact f32 reference (bf16 MXU inputs widen
    # the error slightly).
    ref_f32 = down_block_ref(x, params, matmul_dtype=jnp.float32)
    assert jnp.allclose(out, ref_f32, rtol=5e-2, atol=5e-2), \
        float(jnp.max(jnp.abs(out - ref_f32)))

    print("KERNEL_OK")
</pallas_src>

<mosaic_0001>
module attributes {stable_mosaic.version = 11 : i64} {
  func.func @down_conv_block_kernel(%arg0: memref<2x8x8x4xbf16, #tpu.memory_space<vmem>>, %arg1: memref<9x4x8xbf16, #tpu.memory_space<vmem>>, %arg2: memref<1x8xf32, #tpu.memory_space<vmem>>, %arg3: memref<1x8xf32, #tpu.memory_space<vmem>>, %arg4: memref<9x8x8xbf16, #tpu.memory_space<vmem>>, %arg5: memref<1x8xf32, #tpu.memory_space<vmem>>, %arg6: memref<1x8xf32, #tpu.memory_space<vmem>>, %arg7: memref<8x128xf32, #tpu.memory_space<vmem>>, %arg8: memref<2x10x10x8xbf16, #tpu.memory_space<vmem>>, %arg9: memref<128x8xf32, #tpu.memory_space<vmem>>) attributes {dimension_semantics = [], scalar_prefetch = 0 : i64, scratch_operands = 2 : i64, tpu.core_type = #tpu.core_type<tc>} {
    %cst = arith.constant 0.000000e+00 : bf16
    %0 = vector.broadcast %cst : bf16 to vector<2x1x10x8xbf16>
    %cst_0 = arith.constant 0.000000e+00 : bf16
    %1 = vector.broadcast %cst_0 : bf16 to vector<2x10x1x8xbf16>
    %c0 = arith.constant 0 : index
    %c0_1 = arith.constant 0 : index
    %c0_2 = arith.constant 0 : index
    %c0_3 = arith.constant 0 : index
    %2 = vector.load %arg8[%c0, %c0_1, %c0_2, %c0_3] : memref<2x10x10x8xbf16, #tpu.memory_space<vmem>>, vector<2x1x10x8xbf16>
    tpu.vector_store %arg8[%c0, %c0_1, %c0_2, %c0_3], %0 {strides = array<i32>} : memref<2x10x10x8xbf16, #tpu.memory_space<vmem>>, vector<2x1x10x8xbf16>,
    %c0_4 = arith.constant 0 : index
    %c9 = arith.constant 9 : index
    %c0_5 = arith.constant 0 : index
    %c0_6 = arith.constant 0 : index
    %3 = vector.load %arg8[%c0_4, %c9, %c0_5, %c0_6] : memref<2x10x10x8xbf16, #tpu.memory_space<vmem>>, vector<2x1x10x8xbf16>
    tpu.vector_store %arg8[%c0_4, %c9, %c0_5, %c0_6], %0 {strides = array<i32>} : memref<2x10x10x8xbf16, #tpu.memory_space<vmem>>, vector<2x1x10x8xbf16>,
    %c0_7 = arith.constant 0 : index
    %c0_8 = arith.constant 0 : index
    %c0_9 = arith.constant 0 : index
    %c0_10 = arith.constant 0 : index
    %4 = vector.load %arg8[%c0_7, %c0_8, %c0_9, %c0_10] : memref<2x10x10x8xbf16, #tpu.memory_space<vmem>>, vector<2x10x1x8xbf16>
    tpu.vector_store %arg8[%c0_7, %c0_8, %c0_9, %c0_10], %1 {strides = array<i32>} : memref<2x10x10x8xbf16, #tpu.memory_space<vmem>>, vector<2x10x1x8xbf16>,
    %c0_11 = arith.constant 0 : index
    %c0_12 = arith.constant 0 : index
    %c9_13 = arith.constant 9 : index
    %c0_14 = arith.constant 0 : index
    %5 = vector.load %arg8[%c0_11, %c0_12, %c9_13, %c0_14] : memref<2x10x10x8xbf16, #tpu.memory_space<vmem>>, vector<2x10x1x8xbf16>
    tpu.vector_store %arg8[%c0_11, %c0_12, %c9_13, %c0_14], %1 {strides = array<i32>} : memref<2x10x10x8xbf16, #tpu.memory_space<vmem>>, vector<2x10x1x8xbf16>,
    %c0_15 = arith.constant 0 : index
    %c0_16 = arith.constant 0 : index
    %c0_17 = arith.constant 0 : index
    %c0_18 = arith.constant 0 : index
    %6 = vector.load %arg0[%c0_15, %c0_16, %c0_17, %c0_18] : memref<2x8x8x4xbf16, #tpu.memory_space<vmem>>, vector<2x8x8x4xbf16>
    %c0_19 = arith.constant 0 : index
    %c1 = arith.constant 1 : index
    %c1_20 = arith.constant 1 : index
    %c0_21 = arith.constant 0 : index
    %7 = vector.load %arg8[%c0_19, %c1, %c1_20, %c0_21] : memref<2x10x10x8xbf16, #tpu.memory_space<vmem>>, vector<2x8x8x4xbf16>
    tpu.vector_store %arg8[%c0_19, %c1, %c1_20, %c0_21], %6 {strides = array<i32>} : memref<2x10x10x8xbf16, #tpu.memory_space<vmem>>, vector<2x8x8x4xbf16>,
    %cst_22 = arith.constant 0.000000e+00 : f32
    %8 = vector.broadcast %cst_22 : f32 to vector<128x8xf32>
    %c0_23 = arith.constant 0 : index
    %c0_24 = arith.constant 0 : index
    %9 = vector.load %arg9[%c0_23, %c0_24] : memref<128x8xf32, #tpu.memory_space<vmem>>, vector<128x8xf32>
    tpu.vector_store %arg9[%c0_23, %c0_24], %8 {strides = array<i32>} : memref<128x8xf32, #tpu.memory_space<vmem>>, vector<128x8xf32>,
    %c0_25 = arith.constant 0 : index
    %c0_26 = arith.constant 0 : index
    %c0_27 = arith.constant 0 : index
    %c0_28 = arith.constant 0 : index
    %10 = vector.load %arg8[%c0_25, %c0_26, %c0_27, %c0_28] : memref<2x10x10x8xbf16, #tpu.memory_space<vmem>>, vector<2x10x10x8xbf16>
    %11 = vector.extract_strided_slice %10 {offsets = [0, 0, 0, 0], sizes = [2, 8, 8, 4], strides = [1, 1, 1, 1]} : vector<2x10x10x8xbf16> to vector<2x8x8x4xbf16>
    %12 = vector.shape_cast %11 : vector<2x8x8x4xbf16> to vector<128x4xbf16>
    %c0_29 = arith.constant 0 : index
    %c0_30 = arith.constant 0 : index
    %13 = vector.load %arg9[%c0_29, %c0_30] : memref<128x8xf32, #tpu.memory_space<vmem>>, vector<128x8xf32>
    %c0_31 = arith.constant 0 : index
    %c0_32 = arith.constant 0 : index
    %c0_33 = arith.constant 0 : index
    %14 = vector.load %arg1[%c0_31, %c0_32, %c0_33] : memref<9x4x8xbf16, #tpu.memory_space<vmem>>, vector<1x4x8xbf16>
    %15 = vector.shape_cast %14 : vector<1x4x8xbf16> to vector<4x8xbf16>
    %cst_34 = arith.constant dense<0.000000e+00> : vector<128x8xf32>
    %16 = tpu.matmul %12, %15, %cst_34 {dimension_numbers = #tpu.dot_dimension_numbers<[1], [0], [0], [1], [0, 0, 1, 1], [], []>} : vector<128x4xbf16>, vector<4x8xbf16>, vector<128x8xf32> -> vector<128x8xf32>
    %17 = arith.addf %13, %16 : vector<128x8xf32>
    %c0_35 = arith.constant 0 : index
    %c0_36 = arith.constant 0 : index
    %18 = vector.load %arg9[%c0_35, %c0_36] : memref<128x8xf32, #tpu.memory_space<vmem>>, vector<128x8xf32>
    tpu.vector_store %arg9[%c0_35, %c0_36], %17 {strides = array<i32>} : memref<128x8xf32, #tpu.memory_space<vmem>>, vector<128x8xf32>,
    %19 = vector.extract_strided_slice %10 {offsets = [0, 0, 1, 0], sizes = [2, 8, 8, 4], strides = [1, 1, 1, 1]} : vector<2x10x10x8xbf16> to vector<2x8x8x4xbf16>
    %20 = vector.shape_cast %19 : vector<2x8x8x4xbf16> to vector<128x4xbf16>
    %c0_37 = arith.constant 0 : index
    %c0_38 = arith.constant 0 : index
    %21 = vector.load %arg9[%c0_37, %c0_38] : memref<128x8xf32, #tpu.memory_space<vmem>>, vector<128x8xf32>
    %c1_39 = arith.constant 1 : index
    %c0_40 = arith.constant 0 : index
    %c0_41 = arith.constant 0 : index
    %22 = vector.load %arg1[%c1_39, %c0_40, %c0_41] : memref<9x4x8xbf16, #tpu.memory_space<vmem>>, vector<1x4x8xbf16>
    %23 = vector.shape_cast %22 : vector<1x4x8xbf16> to vector<4x8xbf16>
    %cst_42 = arith.constant dense<0.000000e+00> : vector<128x8xf32>
    %24 = tpu.matmul %20, %23, %cst_42 {dimension_numbers = #tpu.dot_dimension_numbers<[1], [0], [0], [1], [0, 0, 1, 1], [], []>} : vector<128x4xbf16>, vector<4x8xbf16>, vector<128x8xf32> -> vector<128x8xf32>
    %25 = arith.addf %21, %24 : vector<128x8xf32>
    %c0_43 = arith.constant 0 : index
    %c0_44 = arith.constant 0 : index
    %26 = vector.load %arg9[%c0_43, %c0_44] : memref<128x8xf32, #tpu.memory_space<vmem>>, vector<128x8xf32>
    tpu.vector_store %arg9[%c0_43, %c0_44], %25 {strides = array<i32>} : memref<128x8xf32, #tpu.memory_space<vmem>>, vector<128x8xf32>,
    %27 = vector.extract_strided_slice %10 {offsets = [0, 0, 2, 0], sizes = [2, 8, 8, 4], strides = [1, 1, 1, 1]} : vector<2x10x10x8xbf16> to vector<2x8x8x4xbf16>
    %28 = vector.shape_cast %27 : vector<2x8x8x4xbf16> to vector<128x4xbf16>
    %c0_45 = arith.constant 0 : index
    %c0_46 = arith.constant 0 : index
    %29 = vector.load %arg9[%c0_45, %c0_46] : memref<128x8xf32, #tpu.memory_space<vmem>>, vector<128x8xf32>
    %c2 = arith.constant 2 : index
    %c0_47 = arith.constant 0 : index
    %c0_48 = arith.constant 0 : index
    %30 = vector.load %arg1[%c2, %c0_47, %c0_48] : memref<9x4x8xbf16, #tpu.memory_space<vmem>>, vector<1x4x8xbf16>
    %31 = vector.shape_cast %30 : vector<1x4x8xbf16> to vector<4x8xbf16>
    %cst_49 = arith.constant dense<0.000000e+00> : vector<128x8xf32>
    %32 = tpu.matmul %28, %31, %cst_49 {dimension_numbers = #tpu.dot_dimension_numbers<[1], [0], [0], [1], [0, 0, 1, 1], [], []>} : vector<128x4xbf16>, vector<4x8xbf16>, vector<128x8xf32> -> vector<128x8xf32>
    %33 = arith.addf %29, %32 : vector<128x8xf32>
    %c0_50 = arith.constant 0 : index
    %c0_51 = arith.constant 0 : index
    %34 = vector.load %arg9[%c0_50, %c0_51] : memref<128x8xf32, #tpu.memory_space<vmem>>, vector<128x8xf32>
    tpu.vector_store %arg9[%c0_50, %c0_51], %33 {strides = array<i32>} : memref<128x8xf32, #tpu.memory_space<vmem>>, vector<128x8xf32>,
    %35 = vector.extract_strided_slice %10 {offsets = [0, 1, 0, 0], sizes = [2, 8, 8, 4], strides = [1, 1, 1, 1]} : vector<2x10x10x8xbf16> to vector<2x8x8x4xbf16>
    %36 = vector.shape_cast %35 : vector<2x8x8x4xbf16> to vector<128x4xbf16>
    %c0_52 = arith.constant 0 : index
    %c0_53 = arith.constant 0 : index
    %37 = vector.load %arg9[%c0_52, %c0_53] : memref<128x8xf32, #tpu.memory_space<vmem>>, vector<128x8xf32>
    %c3 = arith.constant 3 : index
    %c0_54 = arith.constant 0 : index
    %c0_55 = arith.constant 0 : index
    %38 = vector.load %arg1[%c3, %c0_54, %c0_55] : memref<9x4x8xbf16, #tpu.memory_space<vmem>>, vector<1x4x8xbf16>
    %39 = vector.shape_cast %38 : vector<1x4x8xbf16> to vector<4x8xbf16>
    %cst_56 = arith.constant dense<0.000000e+00> : vector<128x8xf32>
    %40 = tpu.matmul %36, %39, %cst_56 {dimension_numbers = #tpu.dot_dimension_numbers<[1], [0], [0], [1], [0, 0, 1, 1], [], []>} : vector<128x4xbf16>, vector<4x8xbf16>, vector<128x8xf32> -> vector<128x8xf32>
    %41 = arith.addf %37, %40 : vector<128x8xf32>
    %c0_57 = arith.constant 0 : index
    %c0_58 = arith.constant 0 : index
    %42 = vector.load %arg9[%c0_57, %c0_58] : memref<128x8xf32, #tpu.memory_space<vmem>>, vector<128x8xf32>
    tpu.vector_store %arg9[%c0_57, %c0_58], %41 {strides = array<i32>} : memref<128x8xf32, #tpu.memory_space<vmem>>, vector<128x8xf32>,
    %43 = vector.extract_strided_slice %10 {offsets = [0, 1, 1, 0], sizes = [2, 8, 8, 4], strides = [1, 1, 1, 1]} : vector<2x10x10x8xbf16> to vector<2x8x8x4xbf16>
    %44 = vector.shape_cast %43 : vector<2x8x8x4xbf16> to vector<128x4xbf16>
    %c0_59 = arith.constant 0 : index
    %c0_60 = arith.constant 0 : index
    %45 = vector.load %arg9[%c0_59, %c0_60] : memref<128x8xf32, #tpu.memory_space<vmem>>, vector<128x8xf32>
    %c4 = arith.constant 4 : index
    %c0_61 = arith.constant 0 : index
    %c0_62 = arith.constant 0 : index
    %46 = vector.load %arg1[%c4, %c0_61, %c0_62] : memref<9x4x8xbf16, #tpu.memory_space<vmem>>, vector<1x4x8xbf16>
    %47 = vector.shape_cast %46 : vector<1x4x8xbf16> to vector<4x8xbf16>
    %cst_63 = arith.constant dense<0.000000e+00> : vector<128x8xf32>
    %48 = tpu.matmul %44, %47, %cst_63 {dimension_numbers = #tpu.dot_dimension_numbers<[1], [0], [0], [1], [0, 0, 1, 1], [], []>} : vector<128x4xbf16>, vector<4x8xbf16>, vector<128x8xf32> -> vector<128x8xf32>
    %49 = arith.addf %45, %48 : vector<128x8xf32>
    %c0_64 = arith.constant 0 : index
    %c0_65 = arith.constant 0 : index
    %50 = vector.load %arg9[%c0_64, %c0_65] : memref<128x8xf32, #tpu.memory_space<vmem>>, vector<128x8xf32>
    tpu.vector_store %arg9[%c0_64, %c0_65], %49 {strides = array<i32>} : memref<128x8xf32, #tpu.memory_space<vmem>>, vector<128x8xf32>,
    %51 = vector.extract_strided_slice %10 {offsets = [0, 1, 2, 0], sizes = [2, 8, 8, 4], strides = [1, 1, 1, 1]} : vector<2x10x10x8xbf16> to vector<2x8x8x4xbf16>
    %52 = vector.shape_cast %51 : vector<2x8x8x4xbf16> to vector<128x4xbf16>
    %c0_66 = arith.constant 0 : index
    %c0_67 = arith.constant 0 : index
    %53 = vector.load %arg9[%c0_66, %c0_67] : memref<128x8xf32, #tpu.memory_space<vmem>>, vector<128x8xf32>
    %c5 = arith.constant 5 : index
    %c0_68 = arith.constant 0 : index
    %c0_69 = arith.constant 0 : index
    %54 = vector.load %arg1[%c5, %c0_68, %c0_69] : memref<9x4x8xbf16, #tpu.memory_space<vmem>>, vector<1x4x8xbf16>
    %55 = vector.shape_cast %54 : vector<1x4x8xbf16> to vector<4x8xbf16>
    %cst_70 = arith.constant dense<0.000000e+00> : vector<128x8xf32>
    %56 = tpu.matmul %52, %55, %cst_70 {dimension_numbers = #tpu.dot_dimension_numbers<[1], [0], [0], [1], [0, 0, 1, 1], [], []>} : vector<128x4xbf16>, vector<4x8xbf16>, vector<128x8xf32> -> vector<128x8xf32>
    %57 = arith.addf %53, %56 : vector<128x8xf32>
    %c0_71 = arith.constant 0 : index
    %c0_72 = arith.constant 0 : index
    %58 = vector.load %arg9[%c0_71, %c0_72] : memref<128x8xf32, #tpu.memory_space<vmem>>, vector<128x8xf32>
    tpu.vector_store %arg9[%c0_71, %c0_72], %57 {strides = array<i32>} : memref<128x8xf32, #tpu.memory_space<vmem>>, vector<128x8xf32>,
    %59 = vector.extract_strided_slice %10 {offsets = [0, 2, 0, 0], sizes = [2, 8, 8, 4], strides = [1, 1, 1, 1]} : vector<2x10x10x8xbf16> to vector<2x8x8x4xbf16>
    %60 = vector.shape_cast %59 : vector<2x8x8x4xbf16> to vector<128x4xbf16>
    %c0_73 = arith.constant 0 : index
    %c0_74 = arith.constant 0 : index
    %61 = vector.load %arg9[%c0_73, %c0_74] : memref<128x8xf32, #tpu.memory_space<vmem>>, vector<128x8xf32>
    %c6 = arith.constant 6 : index
    %c0_75 = arith.constant 0 : index
    %c0_76 = arith.constant 0 : index
    %62 = vector.load %arg1[%c6, %c0_75, %c0_76] : memref<9x4x8xbf16, #tpu.memory_space<vmem>>, vector<1x4x8xbf16>
    %63 = vector.shape_cast %62 : vector<1x4x8xbf16> to vector<4x8xbf16>
    %cst_77 = arith.constant dense<0.000000e+00> : vector<128x8xf32>
    %64 = tpu.matmul %60, %63, %cst_77 {dimension_numbers = #tpu.dot_dimension_numbers<[1], [0], [0], [1], [0, 0, 1, 1], [], []>} : vector<128x4xbf16>, vector<4x8xbf16>, vector<128x8xf32> -> vector<128x8xf32>
    %65 = arith.addf %61, %64 : vector<128x8xf32>
    %c0_78 = arith.constant 0 : index
    %c0_79 = arith.constant 0 : index
    %66 = vector.load %arg9[%c0_78, %c0_79] : memref<128x8xf32, #tpu.memory_space<vmem>>, vector<128x8xf32>
    tpu.vector_store %arg9[%c0_78, %c0_79], %65 {strides = array<i32>} : memref<128x8xf32, #tpu.memory_space<vmem>>, vector<128x8xf32>,
    %67 = vector.extract_strided_slice %10 {offsets = [0, 2, 1, 0], sizes = [2, 8, 8, 4], strides = [1, 1, 1, 1]} : vector<2x10x10x8xbf16> to vector<2x8x8x4xbf16>
    %68 = vector.shape_cast %67 : vector<2x8x8x4xbf16> to vector<128x4xbf16>
    %c0_80 = arith.constant 0 : index
    %c0_81 = arith.constant 0 : index
    %69 = vector.load %arg9[%c0_80, %c0_81] : memref<128x8xf32, #tpu.memory_space<vmem>>, vector<128x8xf32>
    %c7 = arith.constant 7 : index
    %c0_82 = arith.constant 0 : index
    %c0_83 = arith.constant 0 : index
    %70 = vector.load %arg1[%c7, %c0_82, %c0_83] : memref<9x4x8xbf16, #tpu.memory_space<vmem>>, vector<1x4x8xbf16>
    %71 = vector.shape_cast %70 : vector<1x4x8xbf16> to vector<4x8xbf16>
    %cst_84 = arith.constant dense<0.000000e+00> : vector<128x8xf32>
    %72 = tpu.matmul %68, %71, %cst_84 {dimension_numbers = #tpu.dot_dimension_numbers<[1], [0], [0], [1], [0, 0, 1, 1], [], []>} : vector<128x4xbf16>, vector<4x8xbf16>, vector<128x8xf32> -> vector<128x8xf32>
    %73 = arith.addf %69, %72 : vector<128x8xf32>
    %c0_85 = arith.constant 0 : index
    %c0_86 = arith.constant 0 : index
    %74 = vector.load %arg9[%c0_85, %c0_86] : memref<128x8xf32, #tpu.memory_space<vmem>>, vector<128x8xf32>
    tpu.vector_store %arg9[%c0_85, %c0_86], %73 {strides = array<i32>} : memref<128x8xf32, #tpu.memory_space<vmem>>, vector<128x8xf32>,
    %75 = vector.extract_strided_slice %10 {offsets = [0, 2, 2, 0], sizes = [2, 8, 8, 4], strides = [1, 1, 1, 1]} : vector<2x10x10x8xbf16> to vector<2x8x8x4xbf16>
    %76 = vector.shape_cast %75 : vector<2x8x8x4xbf16> to vector<128x4xbf16>
    %c0_87 = arith.constant 0 : index
    %c0_88 = arith.constant 0 : index
    %77 = vector.load %arg9[%c0_87, %c0_88] : memref<128x8xf32, #tpu.memory_space<vmem>>, vector<128x8xf32>
    %c8 = arith.constant 8 : index
    %c0_89 = arith.constant 0 : index
    %c0_90 = arith.constant 0 : index
    %78 = vector.load %arg1[%c8, %c0_89, %c0_90] : memref<9x4x8xbf16, #tpu.memory_space<vmem>>, vector<1x4x8xbf16>
    %79 = vector.shape_cast %78 : vector<1x4x8xbf16> to vector<4x8xbf16>
    %cst_91 = arith.constant dense<0.000000e+00> : vector<128x8xf32>
    %80 = tpu.matmul %76, %79, %cst_91 {dimension_numbers = #tpu.dot_dimension_numbers<[1], [0], [0], [1], [0, 0, 1, 1], [], []>} : vector<128x4xbf16>, vector<4x8xbf16>, vector<128x8xf32> -> vector<128x8xf32>
    %81 = arith.addf %77, %80 : vector<128x8xf32>
    %c0_92 = arith.constant 0 : index
    %c0_93 = arith.constant 0 : index
    %82 = vector.load %arg9[%c0_92, %c0_93] : memref<128x8xf32, #tpu.memory_space<vmem>>, vector<128x8xf32>
    tpu.vector_store %arg9[%c0_92, %c0_93], %81 {strides = array<i32>} : memref<128x8xf32, #tpu.memory_space<vmem>>, vector<128x8xf32>,
    %c0_94 = arith.constant 0 : index
    %c0_95 = arith.constant 0 : index
    %83 = vector.load %arg9[%c0_94, %c0_95] : memref<128x8xf32, #tpu.memory_space<vmem>>, vector<128x8xf32>
    %c0_96 = arith.constant 0 : index
    %c0_97 = arith.constant 0 : index
    %84 = vector.load %arg2[%c0_96, %c0_97] : memref<1x8xf32, #tpu.memory_space<vmem>>, vector<1x8xf32>
    %c0_98 = arith.constant 0 : index
    %c0_99 = arith.constant 0 : index
    %85 = vector.load %arg3[%c0_98, %c0_99] : memref<1x8xf32, #tpu.memory_space<vmem>>, vector<1x8xf32>
    %cst_100 = arith.constant dense<0.000000e+00> : vector<8xf32>
    %86 = vector.multi_reduction <add>, %83, %cst_100 [0] : vector<128x8xf32> to vector<8xf32>
    %87 = vector.shape_cast %86 : vector<8xf32> to vector<1x8xf32>
    %88 = arith.mulf %83, %83 : vector<128x8xf32>
    %cst_101 = arith.constant dense<0.000000e+00> : vector<8xf32>
    %89 = vector.multi_reduction <add>, %88, %cst_101 [0] : vector<128x8xf32> to vector<8xf32>
    %90 = vector.shape_cast %89 : vector<8xf32> to vector<1x8xf32>
    %cst_102 = arith.constant 7.812500e-03 : f32
    %91 = vector.broadcast %cst_102 : f32 to vector<1x8xf32>
    %92 = arith.mulf %87, %91 : vector<1x8xf32>
    %cst_103 = arith.constant 7.812500e-03 : f32
    %93 = vector.broadcast %cst_103 : f32 to vector<1x8xf32>
    %94 = arith.mulf %90, %93 : vector<1x8xf32>
    %95 = arith.mulf %92, %92 : vector<1x8xf32>
    %96 = arith.subf %94, %95 : vector<1x8xf32>
    %cst_104 = arith.constant 0.000000e+00 : f32
    %97 = vector.broadcast %cst_104 : f32 to vector<1x8xf32>
    %98 = arith.maximumf %96, %97 : vector<1x8xf32>
    %99 = vector.broadcast %92 : vector<1x8xf32> to vector<128x8xf32>
    %100 = arith.subf %83, %99 : vector<128x8xf32>
    %cst_105 = arith.constant 9.99999974E-6 : f32
    %101 = vector.broadcast %cst_105 : f32 to vector<1x8xf32>
    %102 = arith.addf %98, %101 : vector<1x8xf32>
    %103 = math.rsqrt %102 : vector<1x8xf32>
    %104 = vector.broadcast %103 : vector<1x8xf32> to vector<128x8xf32>
    %105 = arith.mulf %100, %104 : vector<128x8xf32>
    %106 = vector.broadcast %84 : vector<1x8xf32> to vector<128x8xf32>
    %107 = arith.mulf %105, %106 : vector<128x8xf32>
    %108 = vector.broadcast %85 : vector<1x8xf32> to vector<128x8xf32>
    %109 = arith.addf %107, %108 : vector<128x8xf32>
    %cst_106 = arith.constant 0.00999999977 : f32
    %110 = vector.broadcast %cst_106 : f32 to vector<128x8xf32>
    %111 = arith.mulf %110, %109 : vector<128x8xf32>
    %112 = arith.maximumf %109, %111 : vector<128x8xf32>
    %113 = vector.shape_cast %112 : vector<128x8xf32> to vector<2x8x8x8xf32>
    %114 = arith.truncf %113 : vector<2x8x8x8xf32> to vector<2x8x8x8xbf16>
    %c0_107 = arith.constant 0 : index
    %c1_108 = arith.constant 1 : index
    %c1_109 = arith.constant 1 : index
    %c0_110 = arith.constant 0 : index
    %115 = vector.load %arg8[%c0_107, %c1_108, %c1_109, %c0_110] : memref<2x10x10x8xbf16, #tpu.memory_space<vmem>>, vector<2x8x8x8xbf16>
    tpu.vector_store %arg8[%c0_107, %c1_108, %c1_109, %c0_110], %114 {strides = array<i32>} : memref<2x10x10x8xbf16, #tpu.memory_space<vmem>>, vector<2x8x8x8xbf16>,
    %cst_111 = arith.constant 0.000000e+00 : f32
    %116 = vector.broadcast %cst_111 : f32 to vector<128x8xf32>
    %c0_112 = arith.constant 0 : index
    %c0_113 = arith.constant 0 : index
    %117 = vector.load %arg9[%c0_112, %c0_113] : memref<128x8xf32, #tpu.memory_space<vmem>>, vector<128x8xf32>
    tpu.vector_store %arg9[%c0_112, %c0_113], %116 {strides = array<i32>} : memref<128x8xf32, #tpu.memory_space<vmem>>, vector<128x8xf32>,
    %c0_114 = arith.constant 0 : index
    %c0_115 = arith.constant 0 : index
    %c0_116 = arith.constant 0 : index
    %c0_117 = arith.constant 0 : index
    %118 = vector.load %arg8[%c0_114, %c0_115, %c0_116, %c0_117] : memref<2x10x10x8xbf16, #tpu.memory_space<vmem>>, vector<2x10x10x8xbf16>
    %119 = vector.extract_strided_slice %118 {offsets = [0, 0, 0, 0], sizes = [2, 8, 8, 8], strides = [1, 1, 1, 1]} : vector<2x10x10x8xbf16> to vector<2x8x8x8xbf16>
    %120 = vector.shape_cast %119 : vector<2x8x8x8xbf16> to vector<128x8xbf16>
    %c0_118 = arith.constant 0 : index
    %c0_119 = arith.constant 0 : index
    %121 = vector.load %arg9[%c0_118, %c0_119] : memref<128x8xf32, #tpu.memory_space<vmem>>, vector<128x8xf32>
    %c0_120 = arith.constant 0 : index
    %c0_121 = arith.constant 0 : index
    %c0_122 = arith.constant 0 : index
    %122 = vector.load %arg4[%c0_120, %c0_121, %c0_122] : memref<9x8x8xbf16, #tpu.memory_space<vmem>>, vector<1x8x8xbf16>
    %123 = vector.shape_cast %122 : vector<1x8x8xbf16> to vector<8x8xbf16>
    %cst_123 = arith.constant dense<0.000000e+00> : vector<128x8xf32>
    %124 = tpu.matmul %120, %123, %cst_123 {dimension_numbers = #tpu.dot_dimension_numbers<[1], [0], [0], [1], [0, 0, 1, 1], [], []>} : vector<128x8xbf16>, vector<8x8xbf16>, vector<128x8xf32> -> vector<128x8xf32>
    %125 = arith.addf %121, %124 : vector<128x8xf32>
    %c0_124 = arith.constant 0 : index
    %c0_125 = arith.constant 0 : index
    %126 = vector.load %arg9[%c0_124, %c0_125] : memref<128x8xf32, #tpu.memory_space<vmem>>, vector<128x8xf32>
    tpu.vector_store %arg9[%c0_124, %c0_125], %125 {strides = array<i32>} : memref<128x8xf32, #tpu.memory_space<vmem>>, vector<128x8xf32>,
    %127 = vector.extract_strided_slice %118 {offsets = [0, 0, 1, 0], sizes = [2, 8, 8, 8], strides = [1, 1, 1, 1]} : vector<2x10x10x8xbf16> to vector<2x8x8x8xbf16>
    %128 = vector.shape_cast %127 : vector<2x8x8x8xbf16> to vector<128x8xbf16>
    %c0_126 = arith.constant 0 : index
    %c0_127 = arith.constant 0 : index
    %129 = vector.load %arg9[%c0_126, %c0_127] : memref<128x8xf32, #tpu.memory_space<vmem>>, vector<128x8xf32>
    %c1_128 = arith.constant 1 : index
    %c0_129 = arith.constant 0 : index
    %c0_130 = arith.constant 0 : index
    %130 = vector.load %arg4[%c1_128, %c0_129, %c0_130] : memref<9x8x8xbf16, #tpu.memory_space<vmem>>, vector<1x8x8xbf16>
    %131 = vector.shape_cast %130 : vector<1x8x8xbf16> to vector<8x8xbf16>
    %cst_131 = arith.constant dense<0.000000e+00> : vector<128x8xf32>
    %132 = tpu.matmul %128, %131, %cst_131 {dimension_numbers = #tpu.dot_dimension_numbers<[1], [0], [0], [1], [0, 0, 1, 1], [], []>} : vector<128x8xbf16>, vector<8x8xbf16>, vector<128x8xf32> -> vector<128x8xf32>
    %133 = arith.addf %129, %132 : vector<128x8xf32>
    %c0_132 = arith.constant 0 : index
    %c0_133 = arith.constant 0 : index
    %134 = vector.load %arg9[%c0_132, %c0_133] : memref<128x8xf32, #tpu.memory_space<vmem>>, vector<128x8xf32>
    tpu.vector_store %arg9[%c0_132, %c0_133], %133 {strides = array<i32>} : memref<128x8xf32, #tpu.memory_space<vmem>>, vector<128x8xf32>,
    %135 = vector.extract_strided_slice %118 {offsets = [0, 0, 2, 0], sizes = [2, 8, 8, 8], strides = [1, 1, 1, 1]} : vector<2x10x10x8xbf16> to vector<2x8x8x8xbf16>
    %136 = vector.shape_cast %135 : vector<2x8x8x8xbf16> to vector<128x8xbf16>
    %c0_134 = arith.constant 0 : index
    %c0_135 = arith.constant 0 : index
    %137 = vector.load %arg9[%c0_134, %c0_135] : memref<128x8xf32, #tpu.memory_space<vmem>>, vector<128x8xf32>
    %c2_136 = arith.constant 2 : index
    %c0_137 = arith.constant 0 : index
    %c0_138 = arith.constant 0 : index
    %138 = vector.load %arg4[%c2_136, %c0_137, %c0_138] : memref<9x8x8xbf16, #tpu.memory_space<vmem>>, vector<1x8x8xbf16>
    %139 = vector.shape_cast %138 : vector<1x8x8xbf16> to vector<8x8xbf16>
    %cst_139 = arith.constant dense<0.000000e+00> : vector<128x8xf32>
    %140 = tpu.matmul %136, %139, %cst_139 {dimension_numbers = #tpu.dot_dimension_numbers<[1], [0], [0], [1], [0, 0, 1, 1], [], []>} : vector<128x8xbf16>, vector<8x8xbf16>, vector<128x8xf32> -> vector<128x8xf32>
    %141 = arith.addf %137, %140 : vector<128x8xf32>
    %c0_140 = arith.constant 0 : index
    %c0_141 = arith.constant 0 : index
    %142 = vector.load %arg9[%c0_140, %c0_141] : memref<128x8xf32, #tpu.memory_space<vmem>>, vector<128x8xf32>
    tpu.vector_store %arg9[%c0_140, %c0_141], %141 {strides = array<i32>} : memref<128x8xf32, #tpu.memory_space<vmem>>, vector<128x8xf32>,
    %143 = vector.extract_strided_slice %118 {offsets = [0, 1, 0, 0], sizes = [2, 8, 8, 8], strides = [1, 1, 1, 1]} : vector<2x10x10x8xbf16> to vector<2x8x8x8xbf16>
    %144 = vector.shape_cast %143 : vector<2x8x8x8xbf16> to vector<128x8xbf16>
    %c0_142 = arith.constant 0 : index
    %c0_143 = arith.constant 0 : index
    %145 = vector.load %arg9[%c0_142, %c0_143] : memref<128x8xf32, #tpu.memory_space<vmem>>, vector<128x8xf32>
    %c3_144 = arith.constant 3 : index
    %c0_145 = arith.constant 0 : index
    %c0_146 = arith.constant 0 : index
    %146 = vector.load %arg4[%c3_144, %c0_145, %c0_146] : memref<9x8x8xbf16, #tpu.memory_space<vmem>>, vector<1x8x8xbf16>
    %147 = vector.shape_cast %146 : vector<1x8x8xbf16> to vector<8x8xbf16>
    %cst_147 = arith.constant dense<0.000000e+00> : vector<128x8xf32>
    %148 = tpu.matmul %144, %147, %cst_147 {dimension_numbers = #tpu.dot_dimension_numbers<[1], [0], [0], [1], [0, 0, 1, 1], [], []>} : vector<128x8xbf16>, vector<8x8xbf16>, vector<128x8xf32> -> vector<128x8xf32>
    %149 = arith.addf %145, %148 : vector<128x8xf32>
    %c0_148 = arith.constant 0 : index
    %c0_149 = arith.constant 0 : index
    %150 = vector.load %arg9[%c0_148, %c0_149] : memref<128x8xf32, #tpu.memory_space<vmem>>, vector<128x8xf32>
    tpu.vector_store %arg9[%c0_148, %c0_149], %149 {strides = array<i32>} : memref<128x8xf32, #tpu.memory_space<vmem>>, vector<128x8xf32>,
    %151 = vector.extract_strided_slice %118 {offsets = [0, 1, 1, 0], sizes = [2, 8, 8, 8], strides = [1, 1, 1, 1]} : vector<2x10x10x8xbf16> to vector<2x8x8x8xbf16>
    %152 = vector.shape_cast %151 : vector<2x8x8x8xbf16> to vector<128x8xbf16>
    %c0_150 = arith.constant 0 : index
    %c0_151 = arith.constant 0 : index
    %153 = vector.load %arg9[%c0_150, %c0_151] : memref<128x8xf32, #tpu.memory_space<vmem>>, vector<128x8xf32>
    %c4_152 = arith.constant 4 : index
    %c0_153 = arith.constant 0 : index
    %c0_154 = arith.constant 0 : index
    %154 = vector.load %arg4[%c4_152, %c0_153, %c0_154] : memref<9x8x8xbf16, #tpu.memory_space<vmem>>, vector<1x8x8xbf16>
    %155 = vector.shape_cast %154 : vector<1x8x8xbf16> to vector<8x8xbf16>
    %cst_155 = arith.constant dense<0.000000e+00> : vector<128x8xf32>
    %156 = tpu.matmul %152, %155, %cst_155 {dimension_numbers = #tpu.dot_dimension_numbers<[1], [0], [0], [1], [0, 0, 1, 1], [], []>} : vector<128x8xbf16>, vector<8x8xbf16>, vector<128x8xf32> -> vector<128x8xf32>
    %157 = arith.addf %153, %156 : vector<128x8xf32>
    %c0_156 = arith.constant 0 : index
    %c0_157 = arith.constant 0 : index
    %158 = vector.load %arg9[%c0_156, %c0_157] : memref<128x8xf32, #tpu.memory_space<vmem>>, vector<128x8xf32>
    tpu.vector_store %arg9[%c0_156, %c0_157], %157 {strides = array<i32>} : memref<128x8xf32, #tpu.memory_space<vmem>>, vector<128x8xf32>,
    %159 = vector.extract_strided_slice %118 {offsets = [0, 1, 2, 0], sizes = [2, 8, 8, 8], strides = [1, 1, 1, 1]} : vector<2x10x10x8xbf16> to vector<2x8x8x8xbf16>
    %160 = vector.shape_cast %159 : vector<2x8x8x8xbf16> to vector<128x8xbf16>
    %c0_158 = arith.constant 0 : index
    %c0_159 = arith.constant 0 : index
    %161 = vector.load %arg9[%c0_158, %c0_159] : memref<128x8xf32, #tpu.memory_space<vmem>>, vector<128x8xf32>
    %c5_160 = arith.constant 5 : index
    %c0_161 = arith.constant 0 : index
    %c0_162 = arith.constant 0 : index
    %162 = vector.load %arg4[%c5_160, %c0_161, %c0_162] : memref<9x8x8xbf16, #tpu.memory_space<vmem>>, vector<1x8x8xbf16>
    %163 = vector.shape_cast %162 : vector<1x8x8xbf16> to vector<8x8xbf16>
    %cst_163 = arith.constant dense<0.000000e+00> : vector<128x8xf32>
    %164 = tpu.matmul %160, %163, %cst_163 {dimension_numbers = #tpu.dot_dimension_numbers<[1], [0], [0], [1], [0, 0, 1, 1], [], []>} : vector<128x8xbf16>, vector<8x8xbf16>, vector<128x8xf32> -> vector<128x8xf32>
    %165 = arith.addf %161, %164 : vector<128x8xf32>
    %c0_164 = arith.constant 0 : index
    %c0_165 = arith.constant 0 : index
    %166 = vector.load %arg9[%c0_164, %c0_165] : memref<128x8xf32, #tpu.memory_space<vmem>>, vector<128x8xf32>
    tpu.vector_store %arg9[%c0_164, %c0_165], %165 {strides = array<i32>} : memref<128x8xf32, #tpu.memory_space<vmem>>, vector<128x8xf32>,
    %167 = vector.extract_strided_slice %118 {offsets = [0, 2, 0, 0], sizes = [2, 8, 8, 8], strides = [1, 1, 1, 1]} : vector<2x10x10x8xbf16> to vector<2x8x8x8xbf16>
    %168 = vector.shape_cast %167 : vector<2x8x8x8xbf16> to vector<128x8xbf16>
    %c0_166 = arith.constant 0 : index
    %c0_167 = arith.constant 0 : index
    %169 = vector.load %arg9[%c0_166, %c0_167] : memref<128x8xf32, #tpu.memory_space<vmem>>, vector<128x8xf32>
    %c6_168 = arith.constant 6 : index
    %c0_169 = arith.constant 0 : index
    %c0_170 = arith.constant 0 : index
    %170 = vector.load %arg4[%c6_168, %c0_169, %c0_170] : memref<9x8x8xbf16, #tpu.memory_space<vmem>>, vector<1x8x8xbf16>
    %171 = vector.shape_cast %170 : vector<1x8x8xbf16> to vector<8x8xbf16>
    %cst_171 = arith.constant dense<0.000000e+00> : vector<128x8xf32>
    %172 = tpu.matmul %168, %171, %cst_171 {dimension_numbers = #tpu.dot_dimension_numbers<[1], [0], [0], [1], [0, 0, 1, 1], [], []>} : vector<128x8xbf16>, vector<8x8xbf16>, vector<128x8xf32> -> vector<128x8xf32>
    %173 = arith.addf %169, %172 : vector<128x8xf32>
    %c0_172 = arith.constant 0 : index
    %c0_173 = arith.constant 0 : index
    %174 = vector.load %arg9[%c0_172, %c0_173] : memref<128x8xf32, #tpu.memory_space<vmem>>, vector<128x8xf32>
    tpu.vector_store %arg9[%c0_172, %c0_173], %173 {strides = array<i32>} : memref<128x8xf32, #tpu.memory_space<vmem>>, vector<128x8xf32>,
    %175 = vector.extract_strided_slice %118 {offsets = [0, 2, 1, 0], sizes = [2, 8, 8, 8], strides = [1, 1, 1, 1]} : vector<2x10x10x8xbf16> to vector<2x8x8x8xbf16>
    %176 = vector.shape_cast %175 : vector<2x8x8x8xbf16> to vector<128x8xbf16>
    %c0_174 = arith.constant 0 : index
    %c0_175 = arith.constant 0 : index
    %177 = vector.load %arg9[%c0_174, %c0_175] : memref<128x8xf32, #tpu.memory_space<vmem>>, vector<128x8xf32>
    %c7_176 = arith.constant 7 : index
    %c0_177 = arith.constant 0 : index
    %c0_178 = arith.constant 0 : index
    %178 = vector.load %arg4[%c7_176, %c0_177, %c0_178] : memref<9x8x8xbf16, #tpu.memory_space<vmem>>, vector<1x8x8xbf16>
    %179 = vector.shape_cast %178 : vector<1x8x8xbf16> to vector<8x8xbf16>
    %cst_179 = arith.constant dense<0.000000e+00> : vector<128x8xf32>
    %180 = tpu.matmul %176, %179, %cst_179 {dimension_numbers = #tpu.dot_dimension_numbers<[1], [0], [0], [1], [0, 0, 1, 1], [], []>} : vector<128x8xbf16>, vector<8x8xbf16>, vector<128x8xf32> -> vector<128x8xf32>
    %181 = arith.addf %177, %180 : vector<128x8xf32>
    %c0_180 = arith.constant 0 : index
    %c0_181 = arith.constant 0 : index
    %182 = vector.load %arg9[%c0_180, %c0_181] : memref<128x8xf32, #tpu.memory_space<vmem>>, vector<128x8xf32>
    tpu.vector_store %arg9[%c0_180, %c0_181], %181 {strides = array<i32>} : memref<128x8xf32, #tpu.memory_space<vmem>>, vector<128x8xf32>,
    %183 = vector.extract_strided_slice %118 {offsets = [0, 2, 2, 0], sizes = [2, 8, 8, 8], strides = [1, 1, 1, 1]} : vector<2x10x10x8xbf16> to vector<2x8x8x8xbf16>
    %184 = vector.shape_cast %183 : vector<2x8x8x8xbf16> to vector<128x8xbf16>
    %c0_182 = arith.constant 0 : index
    %c0_183 = arith.constant 0 : index
    %185 = vector.load %arg9[%c0_182, %c0_183] : memref<128x8xf32, #tpu.memory_space<vmem>>, vector<128x8xf32>
    %c8_184 = arith.constant 8 : index
    %c0_185 = arith.constant 0 : index
    %c0_186 = arith.constant 0 : index
    %186 = vector.load %arg4[%c8_184, %c0_185, %c0_186] : memref<9x8x8xbf16, #tpu.memory_space<vmem>>, vector<1x8x8xbf16>
    %187 = vector.shape_cast %186 : vector<1x8x8xbf16> to vector<8x8xbf16>
    %cst_187 = arith.constant dense<0.000000e+00> : vector<128x8xf32>
    %188 = tpu.matmul %184, %187, %cst_187 {dimension_numbers = #tpu.dot_dimension_numbers<[1], [0], [0], [1], [0, 0, 1, 1], [], []>} : vector<128x8xbf16>, vector<8x8xbf16>, vector<128x8xf32> -> vector<128x8xf32>
    %189 = arith.addf %185, %188 : vector<128x8xf32>
    %c0_188 = arith.constant 0 : index
    %c0_189 = arith.constant 0 : index
    %190 = vector.load %arg9[%c0_188, %c0_189] : memref<128x8xf32, #tpu.memory_space<vmem>>, vector<128x8xf32>
    tpu.vector_store %arg9[%c0_188, %c0_189], %189 {strides = array<i32>} : memref<128x8xf32, #tpu.memory_space<vmem>>, vector<128x8xf32>,
    %c0_190 = arith.constant 0 : index
    %c0_191 = arith.constant 0 : index
    %191 = vector.load %arg9[%c0_190, %c0_191] : memref<128x8xf32, #tpu.memory_space<vmem>>, vector<128x8xf32>
    %c0_192 = arith.constant 0 : index
    %c0_193 = arith.constant 0 : index
    %192 = vector.load %arg5[%c0_192, %c0_193] : memref<1x8xf32, #tpu.memory_space<vmem>>, vector<1x8xf32>
    %c0_194 = arith.constant 0 : index
    %c0_195 = arith.constant 0 : index
    %193 = vector.load %arg6[%c0_194, %c0_195] : memref<1x8xf32, #tpu.memory_space<vmem>>, vector<1x8xf32>
    %cst_196 = arith.constant dense<0.000000e+00> : vector<8xf32>
    %194 = vector.multi_reduction <add>, %191, %cst_196 [0] : vector<128x8xf32> to vector<8xf32>
    %195 = vector.shape_cast %194 : vector<8xf32> to vector<1x8xf32>
    %196 = arith.mulf %191, %191 : vector<128x8xf32>
    %cst_197 = arith.constant dense<0.000000e+00> : vector<8xf32>
    %197 = vector.multi_reduction <add>, %196, %cst_197 [0] : vector<128x8xf32> to vector<8xf32>
    %198 = vector.shape_cast %197 : vector<8xf32> to vector<1x8xf32>
    %cst_198 = arith.constant 7.812500e-03 : f32
    %199 = vector.broadcast %cst_198 : f32 to vector<1x8xf32>
    %200 = arith.mulf %195, %199 : vector<1x8xf32>
    %cst_199 = arith.constant 7.812500e-03 : f32
    %201 = vector.broadcast %cst_199 : f32 to vector<1x8xf32>
    %202 = arith.mulf %198, %201 : vector<1x8xf32>
    %203 = arith.mulf %200, %200 : vector<1x8xf32>
    %204 = arith.subf %202, %203 : vector<1x8xf32>
    %cst_200 = arith.constant 0.000000e+00 : f32
    %205 = vector.broadcast %cst_200 : f32 to vector<1x8xf32>
    %206 = arith.maximumf %204, %205 : vector<1x8xf32>
    %207 = vector.broadcast %200 : vector<1x8xf32> to vector<128x8xf32>
    %208 = arith.subf %191, %207 : vector<128x8xf32>
    %cst_201 = arith.constant 9.99999974E-6 : f32
    %209 = vector.broadcast %cst_201 : f32 to vector<1x8xf32>
    %210 = arith.addf %206, %209 : vector<1x8xf32>
    %211 = math.rsqrt %210 : vector<1x8xf32>
    %212 = vector.broadcast %211 : vector<1x8xf32> to vector<128x8xf32>
    %213 = arith.mulf %208, %212 : vector<128x8xf32>
    %214 = vector.broadcast %192 : vector<1x8xf32> to vector<128x8xf32>
    %215 = arith.mulf %213, %214 : vector<128x8xf32>
    %216 = vector.broadcast %193 : vector<1x8xf32> to vector<128x8xf32>
    %217 = arith.addf %215, %216 : vector<128x8xf32>
    %cst_202 = arith.constant 0.00999999977 : f32
    %218 = vector.broadcast %cst_202 : f32 to vector<128x8xf32>
    %219 = arith.mulf %218, %217 : vector<128x8xf32>
    %220 = arith.maximumf %217, %219 : vector<128x8xf32>
    %221 = tpu.transpose %220, [1, 0] : vector<128x8xf32> -> vector<8x128xf32>
    %c0_203 = arith.constant 0 : index
    %c0_204 = arith.constant 0 : index
    %222 = vector.load %arg7[%c0_203, %c0_204] : memref<8x128xf32, #tpu.memory_space<vmem>>, vector<8x128xf32>
    tpu.vector_store %arg7[%c0_203, %c0_204], %221 {strides = array<i32>} : memref<8x128xf32, #tpu.memory_space<vmem>>, vector<8x128xf32>,
    return
  }
}

</mosaic_0001>

<bundles_post_ra>
// kernel: tpu_custom_call.1
= control target key start
LH: loop header
LB: loop body
LE: loop exit
PB: predicated region body
PF: predicated region fallthrough
CT: control target
= control target key end

     0   :  { %vm580_vm0 = vcmask 1041408   ;;  %vm28_vm1 = vcmask 60416   ;;  %vm30_vm2 = vcmask 57344   ;;  %v6323_v2 = vmov 0   ;;  %v45_v3 = vld [vmem:[#allocation2 + $0x8] sm:$0x1]  ;;  %s8844_s0 = inlined_call_operand.vmem [shape: bf16[2,8,8,4], index: 0, kind: input, shape index: {}]   ;;  %s8845_s1 = inlined_call_operand.vmem [shape: bf16[9,4,8], index: 1, kind: input, shape index: {}]   ;;  %s8846_s2 = inlined_call_operand.vmem [shape: f32[1,8], index: 2, kind: input, shape index: {}]   ;;  %s8847_s3 = inlined_call_operand.vmem [shape: f32[1,8], index: 3, kind: input, shape index: {}]   ;;  %s8848_s4 = inlined_call_operand.vmem [shape: bf16[9,8,8], index: 4, kind: input, shape index: {}]   ;;  %s8849_s5 = inlined_call_operand.vmem [shape: f32[1,8], index: 5, kind: input, shape index: {}]   ;;  %s8850_s6 = inlined_call_operand.vmem [shape: f32[1,8], index: 6, kind: input, shape index: {}]   ;;  %s8851_s7 = inlined_call_operand.hbm [shape: f32[8,128], index: 7, kind: output, shape index: {}]  }
   0x1   :  { %v514_v0 = vld [vmem:[%s8845_s1] sm:$0x3]  ;;  %29 = vst.msk [vmem:[#allocation2] sm:$0xf] %vm28_vm1, %v6323_v2  ;;  %vm40_vm3 = vsmask.f32 256 }
   0x2   :  { %6258 = vmatprep.subr.msk.bf16.mxu0 %vm580_vm0, %v514_v0  ;;  %v582_v1 = vsel %vm580_vm0, %v514_v0, 0  ;;  %31 = vst.msk [vmem:[#allocation2 + $0x4] sm:$0x1] %vm30_vm2, %v6323_v2  ;;  %33 = vst.msk [vmem:[#allocation2 + $0x54] sm:$0x1] %vm30_vm2, %v6323_v2  ;;  %vm341_vm6 = vcmask 27648  }
   0x3   :  { %32 = vst.msk [vmem:[#allocation2 + $0x50] sm:$0xf] %vm28_vm1, %v6323_v2  ;;  %35 = vst.msk [vmem:[#allocation2 + $0x48] sm:$0xf] %vm28_vm1, %v6323_v2  ;;  %5935 = vmatpush3.bf16.msra.mxu0 %v582_v1  ;;  %v164_v5 = vld [vmem:[%s8844_s0] sm:$0xf] }
   0x4   :  { %36 = vst.msk [vmem:[#allocation2 + $0x4c] sm:$0x1] %vm30_vm2, %v6323_v2  ;;  %38 = vst.msk [vmem:[#allocation2 + $0x9c] sm:$0x1] %vm30_vm2, %v6323_v2  ;;  %v181_v7 = vshrl.u32 %v164_v5, 16  ;;  %v184_v8 = vshll.u32 %v164_v5, 16 }
   0x5   :  { %37 = vst.msk [vmem:[#allocation2 + $0x98] sm:$0xf] %vm28_vm1, %v6323_v2  ;;  %vm6381_vm4 = vmand %vm30_vm2, %vm40_vm3  ;;  %v6393_v9 = vld [vmem:[%s8845_s1 + $0x4] sm:$0x3]  ;;  %vm102_vm5 = vsmask.f32 7938 }
   0x6   :  { %v46_v6 = vsel %vm6381_vm4, 0, %v45_v3  ;;  %6260 = vmatprep.subr.msk.bf16.mxu0 %vm580_vm0, %v6393_v9  ;;  %v48_v10 = vld [vmem:[#allocation2 + $0x10] sm:$0x1]  ;;  %v51_v11 = vld [vmem:[#allocation2 + $0x18] sm:$0x1]  ;;  %v6397_v12 = vrot.slane %v181_v7, 7  ;;  %vm6401_vm7 = vmand %vm28_vm1, %vm102_vm5 }
   0x7   :  { %47 = vst [vmem:[#allocation2 + $0x8] sm:$0x1] %v46_v6  ;;  %v8890_v13 = vmov 0  ;;  %v49_v14 = vsel %vm6381_vm4, 0, %v48_v10  ;;  %v52_v15 = vsel %vm6381_vm4, 0, %v51_v11  ;;  %vm6431_vm8 = vmand %vm341_vm6, %vm102_vm5  ;;  %vm555_vm10 = vcmask 31744  }
   0x8   :  { %v8891_v13 = vsel %vm6401_vm7, 4294967295, %v8890_v13  ;;  %v165_v16 = vld [vmem:[%s8844_s0 + $0x4] sm:$0xf]  ;;  %50 = vst [vmem:[#allocation2 + $0x10] sm:$0x1] %v49_v14  ;;  %v186_v21 = vor.u32 %v184_v8, %v6397_v12  ;;  %vm6449_vm9 = vmand %vm30_vm2, %vm102_vm5  ;;  %vm346_vm11 = vcmask 24576  }
   0x9   :  { %8892 = vst [vmem:[#allocation7_spill] sm:$0xff] %v8891_v13  ;;  %53 = vst [vmem:[#allocation2 + $0x18] sm:$0x1] %v52_v15  ;;  %v166_v17 = vld [vmem:[%s8844_s0 + $0x8] sm:$0xf]  ;;  %v189_v18 = vshrl.u32 %v165_v16, 16 }
   0xa   :  { %v192_v19 = vshll.u32 %v165_v16, 16  ;;  %v5444_v20 = vld [vmem:[%s8845_s1 + $0x2] sm:$0x3]  ;;  %v197_v22 = vshrl.u32 %v166_v17, 16  ;;  %v200_v23 = vshll.u32 %v166_v17, 16  ;;  %vm6516_vm12 = vmand %vm346_vm11, %vm40_vm3  ;;  %vm1154_vm1 = vcmask 1042432  }
   0xb   :  { %6259 = vmatprep.subr.msk.bf16.mxu1 %vm580_vm0, %v5444_v20  ;;  %v54_v24 = vld [vmem:[#allocation2 + $0x20] sm:$0x1]  ;;  %v57_v25 = vld [vmem:[#allocation2 + $0x28] sm:$0x1]  ;;  %v6420_v27 = vrot.slane %v189_v18, 7  ;;  %v1007_v30 = vsel %vm580_vm0, %v5444_v20, 0 }
   0xc   :  { %v42_v26 = vld [vmem:[#allocation2] sm:$0x1]  ;;  %v55_v28 = vsel %vm6381_vm4, 0, %v54_v24  ;;  %v58_v29 = vsel %vm6381_vm4, 0, %v57_v25  ;;  %v6435_v33 = vrot.slane %v197_v22, 7  ;;  %5953 = vmatpush3.bf16.msra.mxu1 %v1007_v30  ;;  %vm1155_vm2 = vcmask 1046532  }
   0xd   :  { %v43_v31 = vsel %vm6381_vm4, 0, %v42_v26  ;;  %56 = vst [vmem:[#allocation2 + $0x20] sm:$0x1] %v55_v28  ;;  %59 = vst [vmem:[#allocation2 + $0x28] sm:$0x1] %v58_v29  ;;  %v194_v36 = vor.u32 %v192_v19, %v6420_v27  ;;  %v1288_v26 = vsel %vm580_vm0, %v6393_v9, 0 }
   0xe   :  { %v167_v34 = vld [vmem:[%s8844_s0 + $0xc] sm:$0xf]  ;;  %v168_v35 = vld [vmem:[%s8844_s0 + $0x10] sm:$0xf]  ;;  %44 = vst [vmem:[#allocation2] sm:$0x1] %v43_v31  ;;  %v202_v42 = vor.u32 %v200_v23, %v6435_v33  ;;  %vm6814_vm3 = vmor %vm1154_vm1, %vm1155_vm2 }
   0xf   :  { %v205_v37 = vshrl.u32 %v167_v34, 16  ;;  %v208_v38 = vshll.u32 %v167_v34, 16  ;;  %v213_v39 = vshrl.u32 %v168_v35, 16  ;;  %v60_v40 = vld [vmem:[#allocation2 + $0x30] sm:$0x1]  ;;  %v216_v43 = vshll.u32 %v168_v35, 16 }
  0x10   :  { %v343_v41 = vld [vmem:[#allocation2 + $0x8] sm:$0xf]  ;;  %v61_v44 = vsel %vm6381_vm4, 0, %v60_v40  ;;  %v63_v45 = vld [vmem:[#allocation2 + $0x38] sm:$0x1]  ;;  %v187_v29 = vrot.slane %v6397_v12, 4 }
  0x11   :  { %v344_v47 = vsel %vm6431_vm8, %v186_v21, %v343_v41  ;;  %v6455_v48 = vrot.slane %v205_v37, 7  ;;  %v6457_v49 = vrot.slane %v213_v39, 7  ;;  %62 = vst [vmem:[#allocation2 + $0x30] sm:$0x1] %v61_v44  ;;  %v64_v50 = vsel %vm6381_vm4, 0, %v63_v45 }
  0x12   :  { %v169_v51 = vld [vmem:[%s8844_s0 + $0x14] sm:$0xf]  ;;  %345 = vst [vmem:[#allocation2 + $0x8] sm:$0xf] %v344_v47  ;;  %v351_v52 = vld [vmem:[#allocation2 + $0x10] sm:$0xf] }
  0x13   :  { %v357_v53 = vld [vmem:[#allocation2 + $0x18] sm:$0xf]  ;;  %65 = vst [vmem:[#allocation2 + $0x38] sm:$0x1] %v64_v50  ;;  %v352_v55 = vsel %vm6431_vm8, %v194_v36, %v351_v52  ;;  %v210_v57 = vor.u32 %v208_v38, %v6455_v48  ;;  %v218_v58 = vor.u32 %v216_v43, %v6457_v49  ;;  %v104_v59 = vld [vmem:[#allocation2 + $0x4] sm:$0x1] }
  0x14   :  { %v170_v54 = vld [vmem:[%s8844_s0 + $0x18] sm:$0xf]  ;;  %v358_v56 = vsel %vm6431_vm8, %v202_v42, %v357_v53  ;;  %v107_v60 = vld [vmem:[#allocation2 + $0xc] sm:$0x1]  ;;  %v110_v61 = vld [vmem:[#allocation2 + $0x14] sm:$0x1] }
  0x15   :  { %353 = vst [vmem:[#allocation2 + $0x10] sm:$0xf] %v352_v55  ;;  %359 = vst [vmem:[#allocation2 + $0x18] sm:$0xf] %v358_v56  ;;  %v221_v62 = vshrl.u32 %v169_v51, 16  ;;  %v224_v63 = vshll.u32 %v169_v51, 16 }
  0x16   :  { %v229_v0 = vshrl.u32 %v170_v54, 16  ;;  %v232_v1 = vshll.u32 %v170_v54, 16  ;;  %v113_v2 = vld [vmem:[#allocation2 + $0x1c] sm:$0x1]  ;;  %v363_v3 = vld [vmem:[#allocation2 + $0x20] sm:$0xf] }
  0x17   :  { %v369_v5 = vld [vmem:[#allocation2 + $0x28] sm:$0xf]  ;;  %v105_v6 = vsel %vm6449_vm9, 0, %v104_v59  ;;  %v108_v7 = vsel %vm6449_vm9, 0, %v107_v60  ;;  %v6477_v8 = vld [vmem:[#allocation2] sm:$0xf]  ;;  %v364_v10 = vsel %vm6431_vm8, %v210_v57, %v363_v3 }
  0x18   :  { %v370_v11 = vsel %vm6431_vm8, %v218_v58, %v369_v5  ;;  %v6483_v14 = vrot.slane %v221_v62, 7  ;;  %v6485_v15 = vrot.slane %v229_v0, 7  ;;  %106 = vst [vmem:[#allocation2 + $0x4] sm:$0x1] %v105_v6  ;;  %109 = vst [vmem:[#allocation2 + $0xc] sm:$0x1] %v108_v7 }
  0x19   :  { %v116_v16 = vld [vmem:[#allocation2 + $0x24] sm:$0x1]  ;;  %v717_v17 = vshrl.u32 %v6477_v8, 16  ;;  %v720_v18 = vshll.u32 %v6477_v8, 16  ;;  %365 = vst [vmem:[#allocation2 + $0x20] sm:$0xf] %v364_v10 }
  0x1a   :  { %371 = vst [vmem:[#allocation2 + $0x28] sm:$0xf] %v370_v11  ;;  %v111_v19 = vsel %vm6449_vm9, 0, %v110_v61  ;;  %v226_v20 = vor.u32 %v224_v63, %v6483_v14  ;;  %v234_v21 = vor.u32 %v232_v1, %v6485_v15  ;;  %v375_v22 = vld [vmem:[#allocation2 + $0x30] sm:$0xf]  ;;  %v114_v23 = vsel %vm6449_vm9, 0, %v113_v2 }
  0x1b   :  { %112 = vst [vmem:[#allocation2 + $0x14] sm:$0x1] %v111_v19  ;;  %v117_v24 = vsel %vm6449_vm9, 0, %v116_v16  ;;  %v6497_v25 = vld [vmem:[#allocation2 + $0x8] sm:$0xf]  ;;  %v195_v35 = vrot.slane %v6420_v27, 4 }
  0x1c   :  { %v381_v28 = vld [vmem:[#allocation2 + $0x38] sm:$0xf]  ;;  %115 = vst [vmem:[#allocation2 + $0x1c] sm:$0x1] %v114_v23  ;;  %118 = vst [vmem:[#allocation2 + $0x24] sm:$0x1] %v117_v24  ;;  %v5428_v30 = vcombine.low %v6477_v8, %v6497_v25  ;;  %v376_v31 = vsel %vm6431_vm8, %v226_v20, %v375_v22 }
  0x1d   :  { %v382_v34 = vsel %vm6431_vm8, %v234_v21, %v381_v28  ;;  %v6509_v36 = vld [vmem:[#allocation2 + $0x10] sm:$0xf]  ;;  %v6511_v37 = vld [vmem:[#allocation2 + $0x18] sm:$0xf]  ;;  %377 = vst [vmem:[#allocation2 + $0x30] sm:$0xf] %v376_v31 }
  0x1e   :  { %383 = vst [vmem:[#allocation2 + $0x38] sm:$0xf] %v382_v34  ;;  %v203_v9 = vrot.slane %v6435_v33, 4  ;;  %v719_v38 = vrot.slane %v717_v17, 4  ;;  %5936 = vmatprep.mubr.msk.bf16.mxu0 %vm555_vm10, %v5428_v30  ;;  %v6523_v27 = vcombine.low %v6509_v36, %v6511_v37  ;;  %v211_v39 = vrot.slane %v6455_v48, 4 }
  0x1f   :  { %vm713_vm13 = vsmask.f32 3328  ;;  %v722_v40 = vrot.slane %v720_v18, 5  ;;  %v348_v41 = vld [vmem:[#allocation2 + $0xc] sm:$0x1]  ;;  %v731_v33 = vshrl.u32 %v6497_v25, 16 }
  0x20   :  { %8899 = vst [vmem:[#allocation8_spill] sm:$0xff] %v6523_v27  ;;  %v6526_v42 = vld [vmem:[#allocation2 + $0x4] sm:$0x1]  ;;  %v734_v43 = vshll.u32 %v6497_v25, 16  ;;  %5937 = vmatmul.mubr.msk.bf16.vlgmr.msra.gmra.mrb[0].mxu0 %vm555_vm10, %v6523_v27  ;;  %v6532_v44 = vld [vmem:[#allocation2 + $0x20] sm:$0xf]  ;;  %v349_v47 = vsel %vm6516_vm12, %v187_v29, %v348_v41 }
  0x21   :  { %v6534_v45 = vld [vmem:[#allocation2 + $0x28] sm:$0xf]  ;;  %v723_v48 = vor.u32 %v722_v40, %v719_v38  ;;  %v745_v50 = vshrl.u32 %v6509_v36, 16  ;;  %5971 = vmatpush3.bf16.msra.mxu0 %v1288_v26  ;;  %350 = vst [vmem:[#allocation2 + $0xc] sm:$0x1] %v349_v47  ;;  %v733_v53 = vrot.slane %v731_v33, 4 }
  0x22   :  { %v6541_v51 = vcombine.low %v6532_v44, %v6534_v45  ;;  %v354_v52 = vld [vmem:[#allocation2 + $0x14] sm:$0x1]  ;;  %v736_v54 = vrot.slane %v734_v43, 5  ;;  %v748_v55 = vshll.u32 %v6509_v36, 16  ;;  %v726_v59 = vshll.u32 %v6526_v42, 16 }
  0x23   :  { %v355_v56 = vsel %vm6516_vm12, %v195_v35, %v354_v52  ;;  %v360_v57 = vld [vmem:[#allocation2 + $0x1c] sm:$0x1]  ;;  %v366_v58 = vld [vmem:[#allocation2 + $0x24] sm:$0x1]  ;;  %v72_v60 = vld [vmem:[#allocation2 + $0x50] sm:$0x1] }
  0x24   :  { %8900 = vst [vmem:[#allocation9_spill] sm:$0xff] %v6541_v51  ;;  %v75_v61 = vld [vmem:[#allocation2 + $0x58] sm:$0x1]  ;;  %5940 = vmatprep.mubr.msk.bf16.mxu0 %vm555_vm10, %v6541_v51  ;;  %356 = vst [vmem:[#allocation2 + $0x14] sm:$0x1] %v355_v56  ;;  %v361_v62 = vsel %vm6516_vm12, %v203_v9, %v360_v57  ;;  %v367_v63 = vsel %vm6516_vm12, %v211_v39, %v366_v58  ;;  %v747_v0 = vrot.slane %v745_v50, 4 }
  0x25   :  { %vm714_vm14 = vsmask.f32 7440  ;;  %v172_v1 = vld [vmem:[%s8844_s0 + $0x20] sm:$0xf]  ;;  %v6556_v2 = vld [vmem:[#allocation2 + $0x30] sm:$0xf]  ;;  %v737_v5 = vor.u32 %v736_v54, %v733_v53 }
  0x26   :  { %v6558_v3 = vld [vmem:[#allocation2 + $0x38] sm:$0xf]  ;;  %362 = vst [vmem:[#allocation2 + $0x1c] sm:$0x1] %v361_v62  ;;  %368 = vst [vmem:[#allocation2 + $0x24] sm:$0x1] %v367_v63 }
  0x27   :  { %v750_v6 = vrot.slane %v748_v55, 5  ;;  %v759_v7 = vshrl.u32 %v6511_v37, 16  ;;  %v6563_v10 = vcombine.low %v6556_v2, %v6558_v3  ;;  %v724_v11 = vrot.slane %v723_v48, 4  ;;  %v78_v18 = vld [vmem:[#allocation2 + $0x60] sm:$0x1]  ;;  %vm6581_vm15 = vmor %vm713_vm13, %vm714_vm14 }
  0x28   :  { %v762_v16 = vshll.u32 %v6511_v37, 16  ;;  %v773_v17 = vshrl.u32 %v6532_v44, 16  ;;  %v728_v19 = vrot.slane %v726_v59, 5  ;;  %v776_v22 = vshll.u32 %v6532_v44, 16  ;;  %v81_v23 = vld [vmem:[#allocation2 + $0x68] sm:$0x1] }
  0x29   :  { %8901 = vst [vmem:[#allocation10_spill] sm:$0xff] %v6563_v10  ;;  %v751_v20 = vor.u32 %v750_v6, %v747_v0  ;;  %v761_v21 = vrot.slane %v759_v7, 4  ;;  %v73_v28 = vsel %vm6381_vm4, 0, %v72_v60  ;;  %v76_v29 = vsel %vm6381_vm4, 0, %v75_v61  ;;  %v173_v30 = vld [vmem:[%s8844_s0 + $0x24] sm:$0xf]  ;;  %5941 = vmatmul.mubr.msk.bf16.gmra.mrb[4].mxu0 %vm555_vm10, %v6563_v10 }
  0x2a   :  { %v764_v24 = vrot.slane %v762_v16, 5  ;;  %v775_v26 = vrot.slane %v773_v17, 4  ;;  %v6577_v31 = vld [vmem:[#allocation2 + $0xc] sm:$0x1]  ;;  %v738_v35 = vrot.slane %v737_v5, 4  ;;  %v778_v38 = vrot.slane %v776_v22, 5 }
  0x2b   :  { %v752_v9 = vrot.slane %v751_v20, 4  ;;  %74 = vst [vmem:[#allocation2 + $0x50] sm:$0x1] %v73_v28  ;;  %77 = vst [vmem:[#allocation2 + $0x58] sm:$0x1] %v76_v29  ;;  %v245_v39 = vshrl.u32 %v172_v1, 16  ;;  %v729_v56 = vsel %vm6581_vm15, %v724_v11, %v728_v19 }
  0x2c   :  { %v740_v40 = vshll.u32 %v6577_v31, 16  ;;  %v765_v41 = vor.u32 %v764_v24, %v761_v21  ;;  %v248_v33 = vshll.u32 %v172_v1, 16  ;;  %v79_v43 = vsel %vm6381_vm4, 0, %v78_v18  ;;  %v6588_v47 = vld [vmem:[#allocation2 + $0x14] sm:$0x1] }
  0x2d   :  { %v779_v48 = vor.u32 %v778_v38, %v775_v26  ;;  %v6590_v50 = vrot.slane %v245_v39, 7  ;;  %80 = vst [vmem:[#allocation2 + $0x60] sm:$0x1] %v79_v43  ;;  %v82_v52 = vsel %vm6381_vm4, 0, %v81_v23  ;;  %v253_v53 = vshrl.u32 %v173_v30, 16 }
  0x2e   :  { %v6594_v54 = vld [vmem:[#allocation2 + $0x1c] sm:$0x1]  ;;  %v6596_v55 = vld [vmem:[#allocation2 + $0x24] sm:$0x1]  ;;  %v742_v57 = vrot.slane %v740_v40, 5  ;;  %v754_v58 = vshll.u32 %v6588_v47, 16 }
  0x2f   :  { %83 = vst [vmem:[#allocation2 + $0x68] sm:$0x1] %v82_v52  ;;  %v766_v60 = vrot.slane %v765_v41, 4  ;;  %v768_v61 = vshll.u32 %v6594_v54, 16  ;;  %v5494_v63 = vld [vmem:[%s8845_s1 + $0x6] sm:$0x3]  ;;  %v250_v17 = vor.u32 %v248_v33, %v6590_v50 }
  0x30   :  { %v6609_v0 = vsel %vm6581_vm15, %v738_v35, %v742_v57  ;;  %v756_v1 = vrot.slane %v754_v58, 5  ;;  %v782_v5 = vshll.u32 %v6596_v55, 16  ;;  %6261 = vmatprep.subr.msk.bf16.mxu1 %vm580_vm0, %v5494_v63  ;;  %v6614_v11 = vrot.slane %v779_v48, 4  ;;  %v174_v18 = vld [vmem:[%s8844_s0 + $0x28] sm:$0xf] }
  0x31   :  { %v770_v7 = vrot.slane %v768_v61, 5  ;;  %v5445_v16 = vcombine.low %v729_v56, %v6609_v0  ;;  %v119_v19 = vld [vmem:[#allocation2 + $0x2c] sm:$0x1]  ;;  %v6627_v23 = vrot.slane %v253_v53, 7  ;;  %v256_v24 = vshll.u32 %v173_v30, 16 }
  0x32   :  { %v6623_v20 = vsel %vm6581_vm15, %v752_v9, %v756_v1  ;;  %v393_v21 = vld [vmem:[#allocation2 + $0x58] sm:$0xf]  ;;  %v6625_v22 = vld [vmem:[#allocation2 + $0x50] sm:$0xf]  ;;  %v122_v9 = vld [vmem:[#allocation2 + $0x34] sm:$0x1] }
  0x33   :  { %v6631_v26 = vsel %vm6581_vm15, %v766_v60, %v770_v7  ;;  %5954 = vmatprep.mubr.msk.bf16.mxu1 %vm555_vm10, %v5445_v16  ;;  %v394_v35 = vsel %vm6431_vm8, %v250_v17, %v393_v21  ;;  %v125_v38 = vld [vmem:[#allocation2 + $0x3c] sm:$0x1]  ;;  %v6639_v39 = vrot.slane %v782_v5, 5  ;;  %v829_v41 = vshrl.u32 %v6625_v22, 16  ;;  %v84_v61 = vld [vmem:[#allocation2 + $0x70] sm:$0x1] }
  0x34   :  { %v6643_v30 = vcombine.low %v6623_v20, %v6631_v26  ;;  %395 = vst [vmem:[#allocation2 + $0x58] sm:$0xf] %v394_v35  ;;  %v399_v33 = vld [vmem:[#allocation2 + $0x60] sm:$0xf]  ;;  %v258_v43 = vor.u32 %v256_v24, %v6627_v23  ;;  %v261_v48 = vshrl.u32 %v174_v18, 16  ;;  %v264_v52 = vshll.u32 %v174_v18, 16 }
  0x35   :  { %v120_v53 = vsel %vm6449_vm9, 0, %v119_v19  ;;  %v832_v56 = vshll.u32 %v6625_v22, 16  ;;  %v787_v57 = vshrl.u32 %v6534_v45, 16  ;;  %v790_v58 = vshll.u32 %v6534_v45, 16  ;;  %v87_v17 = vld [vmem:[#allocation2 + $0x78] sm:$0x1] }
  0x36   :  { %8904 = vst [vmem:[#allocation11_spill] sm:$0xff] %v6643_v30  ;;  %5955 = vmatmul.mubr.msk.bf16.vlgmr.msra.gmra.mrb[0].mxu1 %vm555_vm10, %v6643_v30  ;;  %121 = vst [vmem:[#allocation2 + $0x2c] sm:$0x1] %v120_v53  ;;  %v123_v60 = vsel %vm6449_vm9, 0, %v122_v9  ;;  %v6657_v1 = vrot.slane %v261_v48, 7  ;;  %v400_v5 = vsel %vm6431_vm8, %v258_v43, %v399_v33  ;;  %v219_v7 = vrot.slane %v6457_v49, 4 }
  0x37   :  { %124 = vst [vmem:[#allocation2 + $0x34] sm:$0x1] %v123_v60  ;;  %v126_v16 = vsel %vm6449_vm9, 0, %v125_v38  ;;  %v175_v18 = vld [vmem:[%s8844_s0 + $0x2c] sm:$0xf]  ;;  %v789_v21 = vrot.slane %v787_v57, 4 }
  0x38   :  { %401 = vst [vmem:[#allocation2 + $0x60] sm:$0xf] %v400_v5  ;;  %v405_v19 = vld [vmem:[#allocation2 + $0x68] sm:$0xf]  ;;  %v792_v24 = vrot.slane %v790_v58, 5  ;;  %v227_v35 = vrot.slane %v6483_v14, 4  ;;  %v266_v49 = vor.u32 %v264_v52, %v6657_v1 }
  0x39   :  { %127 = vst [vmem:[#allocation2 + $0x3c] sm:$0x1] %v126_v16  ;;  %v801_v9 = vshrl.u32 %v6556_v2, 16  ;;  %v804_v33 = vshll.u32 %v6556_v2, 16  ;;  %v815_v38 = vshrl.u32 %v6558_v3, 16  ;;  %v818_v43 = vshll.u32 %v6558_v3, 16 }
  0x3a   :  { %v176_v48 = vld [vmem:[%s8844_s0 + $0x30] sm:$0xf]  ;;  %v793_v53 = vor.u32 %v792_v24, %v789_v21  ;;  %v1474_v58 = vsel %vm580_vm0, %v5494_v63, 0  ;;  %v85_v14 = vsel %vm6381_vm4, 0, %v84_v61  ;;  %v90_v60 = vld [vmem:[#allocation2 + $0x80] sm:$0x1]  ;;  %v406_v52 = vsel %vm6431_vm8, %v266_v49, %v405_v19 }
  0x3b   :  { %v803_v57 = vrot.slane %v801_v9, 4  ;;  %v6679_v5 = vld [vmem:[#allocation2 + $0x58] sm:$0xf]  ;;  %v806_v16 = vrot.slane %v804_v33, 5  ;;  %v817_v29 = vrot.slane %v815_v38, 4  ;;  %v820_v40 = vrot.slane %v818_v43, 5  ;;  %5989 = vmatpush3.bf16.msra.mxu1 %v1474_v58 }
  0x3c   :  { %86 = vst [vmem:[#allocation2 + $0x70] sm:$0x1] %v85_v14  ;;  %v93_v28 = vld [vmem:[#allocation2 + $0x88] sm:$0x1]  ;;  %v5432_v21 = vcombine.low %v6625_v22, %v6679_v5  ;;  %407 = vst [vmem:[#allocation2 + $0x68] sm:$0xf] %v406_v52 }
  0x3d   :  { %v235_v63 = vrot.slane %v6485_v15, 4  ;;  %v88_v61 = vsel %vm6381_vm4, 0, %v87_v17  ;;  %v269_v24 = vshrl.u32 %v175_v18, 16  ;;  %v177_v19 = vld [vmem:[%s8844_s0 + $0x34] sm:$0xf]  ;;  %v807_v38 = vor.u32 %v806_v16, %v803_v57 }
  0x3e   :  { %v178_v9 = vld [vmem:[%s8844_s0 + $0x38] sm:$0xf]  ;;  %v6697_v49 = vld [vmem:[%s8845_s1 + $0x8] sm:$0x3]  ;;  %v372_v33 = vld [vmem:[#allocation2 + $0x2c] sm:$0x1]  ;;  %v821_v15 = vor.u32 %v820_v40, %v817_v29  ;;  %5944 = vmatprep.mubr.msk.bf16.mxu0 %vm555_vm10, %v5432_v21 }
  0x3f   :  { %89 = vst [vmem:[#allocation2 + $0x78] sm:$0x1] %v88_v61  ;;  %v272_v43 = vshll.u32 %v175_v18, 16  ;;  %v277_v17 = vshrl.u32 %v176_v48, 16  ;;  %v134_v58 = vld [vmem:[#allocation2 + $0x54] sm:$0x1]  ;;  %6262 = vmatprep.subr.msk.bf16.mxu0 %vm580_vm0, %v6697_v49  ;;  %v373_v14 = vsel %vm6516_vm12, %v219_v7, %v372_v33 }
  0x40   :  { %v378_v52 = vld [vmem:[#allocation2 + $0x34] sm:$0x1]  ;;  %v6704_v6 = vrot.slane %v269_v24, 7  ;;  %v280_v59 = vshll.u32 %v176_v48, 16  ;;  %v91_v57 = vsel %vm6381_vm4, 0, %v90_v60  ;;  %v6708_v29 = vrot.slane %v793_v53, 4 }
  0x41   :  { %374 = vst [vmem:[#allocation2 + $0x2c] sm:$0x1] %v373_v14  ;;  %v379_v40 = vsel %vm6516_vm12, %v227_v35, %v378_v52  ;;  %v384_v18 = vld [vmem:[#allocation2 + $0x3c] sm:$0x1]  ;;  %v6712_v16 = vrot.slane %v807_v38, 4  ;;  %v6717_v61 = vrot.slane %v277_v17, 7 }
  0x42   :  { %92 = vst [vmem:[#allocation2 + $0x80] sm:$0x1] %v91_v57  ;;  %v137_v21 = vld [vmem:[#allocation2 + $0x5c] sm:$0x1]  ;;  %380 = vst [vmem:[#allocation2 + $0x34] sm:$0x1] %v379_v40  ;;  %v385_v7 = vsel %vm6516_vm12, %v235_v63, %v384_v18  ;;  %v274_v48 = vor.u32 %v272_v43, %v6704_v6 }
  0x43   :  { %v94_v53 = vsel %vm6381_vm4, 0, %v93_v28  ;;  %v140_v60 = vld [vmem:[#allocation2 + $0x64] sm:$0x1]  ;;  %v6721_v24 = vld [vmem:[#allocation2 + $0x60] sm:$0xf]  ;;  %v285_v35 = vshrl.u32 %v177_v19, 16  ;;  %v282_v63 = vor.u32 %v280_v59, %v6717_v61 }
  0x44   :  { %386 = vst [vmem:[#allocation2 + $0x3c] sm:$0x1] %v385_v7  ;;  %95 = vst [vmem:[#allocation2 + $0x88] sm:$0x1] %v94_v53  ;;  %v288_v33 = vshll.u32 %v177_v19, 16  ;;  %v293_v38 = vshrl.u32 %v178_v9, 16 }
  0x45   :  { %v296_v14 = vshll.u32 %v178_v9, 16  ;;  %v6723_v52 = vrot.slane %v821_v15, 4  ;;  %v411_v43 = vld [vmem:[#allocation2 + $0x70] sm:$0xf]  ;;  %v135_v17 = vsel %vm6449_vm9, 0, %v134_v58  ;;  %v138_v28 = vsel %vm6449_vm9, 0, %v137_v21 }
  0x46   :  { %v143_v57 = vld [vmem:[#allocation2 + $0x6c] sm:$0x1]  ;;  %v6730_v40 = vld [vmem:[#allocation2 + $0x68] sm:$0xf]  ;;  %v412_v19 = vsel %vm6431_vm8, %v274_v48, %v411_v43  ;;  %v6734_v9 = vrot.slane %v285_v35, 7  ;;  %v6736_v18 = vrot.slane %v293_v38, 7 }
  0x47   :  { %136 = vst [vmem:[#allocation2 + $0x54] sm:$0x1] %v135_v17  ;;  %139 = vst [vmem:[#allocation2 + $0x5c] sm:$0x1] %v138_v28  ;;  %v831_v59 = vrot.slane %v829_v41, 4  ;;  %v6742_v15 = vcombine.low %v6721_v24, %v6730_v40  ;;  %v834_v21 = vrot.slane %v832_v56, 5 }
  0x48   :  { %413 = vst [vmem:[#allocation2 + $0x70] sm:$0xf] %v412_v19  ;;  %v417_v58 = vld [vmem:[#allocation2 + $0x78] sm:$0xf]  ;;  %v843_v7 = vshrl.u32 %v6679_v5, 16  ;;  %v846_v48 = vshll.u32 %v6679_v5, 16  ;;  %v290_v35 = vor.u32 %v288_v33, %v6734_v9  ;;  %v298_v41 = vor.u32 %v296_v14, %v6736_v18 }
  0x49   :  { %8905 = vst [vmem:[#allocation12_spill] sm:$0xff] %v6742_v15  ;;  %v418_v53 = vsel %vm6431_vm8, %v282_v63, %v417_v58  ;;  %v141_v38 = vsel %vm6449_vm9, 0, %v140_v60  ;;  %5945 = vmatmul.mubr.msk.bf16.gmra.mrb[8].mxu0 %vm555_vm10, %v6742_v15  ;;  %v6756_v43 = vld [vmem:[#allocation2 + $0x2c] sm:$0x1]  ;;  %v423_v56 = vld [vmem:[#allocation2 + $0x80] sm:$0xf]  ;;  %v835_v28 = vor.u32 %v834_v21, %v831_v59 }
  0x4a   :  { %419 = vst [vmem:[#allocation2 + $0x78] sm:$0xf] %v418_v53  ;;  %v251_v17 = vrot.slane %v6590_v50, 4  ;;  %v845_v19 = vrot.slane %v843_v7, 4  ;;  %142 = vst [vmem:[#allocation2 + $0x64] sm:$0x1] %v141_v38  ;;  %v424_v14 = vsel %vm6431_vm8, %v290_v35, %v423_v56  ;;  %v6770_v53 = vsel %vm6581_vm15, %v6614_v11, %v6639_v39 }
  0x4b   :  { %v796_v63 = vshll.u32 %v6756_v43, 16  ;;  %v6760_v33 = vld [vmem:[#allocation2 + $0x34] sm:$0x1]  ;;  %v848_v60 = vrot.slane %v846_v48, 5  ;;  %v144_v58 = vsel %vm6449_vm9, 0, %v143_v57  ;;  %v259_v7 = vrot.slane %v6627_v23, 4 }
  0x4c   :  { %v6772_v50 = vld [vmem:[#allocation2 + $0x3c] sm:$0x1]  ;;  %v810_v59 = vshll.u32 %v6760_v33, 16  ;;  %425 = vst [vmem:[#allocation2 + $0x80] sm:$0xf] %v424_v14  ;;  %v6779_v38 = vrot.slane %v835_v28, 4 }
  0x4d   :  { %v429_v21 = vld [vmem:[#allocation2 + $0x88] sm:$0xf]  ;;  %145 = vst [vmem:[#allocation2 + $0x6c] sm:$0x1] %v144_v58  ;;  %v798_v35 = vrot.slane %v796_v63, 5  ;;  %v824_v48 = vshll.u32 %v6772_v50, 16 }
  0x4e   :  { %v430_v57 = vsel %vm6431_vm8, %v298_v41, %v429_v21  ;;  %v6784_v11 = vld [vmem:[%s8845_s1 + $0xa] sm:$0x3]  ;;  %v812_v39 = vrot.slane %v810_v59, 5  ;;  %v396_v56 = vld [vmem:[#allocation2 + $0x5c] sm:$0x1]  ;;  %v267_v23 = vrot.slane %v6657_v1, 4 }
  0x4f   :  { %431 = vst [vmem:[#allocation2 + $0x88] sm:$0xf] %v430_v57  ;;  %v6786_v14 = vld [vmem:[#allocation2 + $0x54] sm:$0x1]  ;;  %6263 = vmatprep.subr.msk.bf16.mxu1 %vm580_vm0, %v6784_v11  ;;  %v6794_v41 = vsel %vm6581_vm15, %v6708_v29, %v798_v35  ;;  %v826_v28 = vrot.slane %v824_v48, 5  ;;  %v397_v58 = vsel %vm6516_vm12, %v251_v17, %v396_v56  ;;  %v857_v29 = vshrl.u32 %v6721_v24, 16 }
  0x50   :  { %v6796_v63 = vld [vmem:[#allocation2 + $0x70] sm:$0xf]  ;;  %v838_v59 = vshll.u32 %v6786_v14, 16  ;;  %v6803_v21 = vcombine.low %v6770_v53, %v6794_v41  ;;  %v6808_v1 = vsel %vm6581_vm15, %v6712_v16, %v812_v39  ;;  %398 = vst [vmem:[#allocation2 + $0x5c] sm:$0x1] %v397_v58  ;;  %v860_v35 = vshll.u32 %v6721_v24, 16 }
  0x51   :  { %v6821_v48 = vsel %vm6581_vm15, %v6723_v52, %v826_v28  ;;  %v6823_v57 = vld [vmem:[#allocation2 + $0x78] sm:$0xf]  ;;  %v849_v39 = vor.u32 %v848_v60, %v845_v19  ;;  %v402_v56 = vld [vmem:[#allocation2 + $0x64] sm:$0x1]  ;;  %v871_v58 = vshrl.u32 %v6730_v40, 16  ;;  %v859_v28 = vrot.slane %v857_v29, 4 }
  0x52   :  { %8906 = vst [vmem:[#allocation13_spill] sm:$0xff] %v6803_v21  ;;  %8909 = vst [vmem:[#allocation14_spill] sm:$0xff] %v6821_v48  ;;  %v6825_v16 = vrot.slane %v838_v59, 5  ;;  %5958 = vmatprep.mubr.msk.bf16.mxu1 %vm555_vm10, %v6803_v21  ;;  %v6832_v62 = vcombine.low %v6808_v1, %v6821_v48  ;;  %v6836_v13 = vcombine.low %v6796_v63, %v6823_v57  ;;  %v146_v59 = vld [vmem:[#allocation2 + $0x74] sm:$0x1]  ;;  %v862_v30 = vrot.slane %v860_v35, 5 }
  0x53   :  { %v403_v52 = vsel %vm6516_vm12, %v259_v7, %v402_v56  ;;  %v6840_v19 = vld [vmem:[#allocation2 + $0x80] sm:$0xf]  ;;  %v873_v15 = vrot.slane %v871_v58, 4  ;;  %v8912_v21 = vrot.slane %v6526_v42, 5  ;;  %v8913_v10 = vrot.slane %v6477_v8, 9 }
  0x54   :  { %8910 = vst [vmem:[#allocation15_spill] sm:$0xff] %v6832_v62  ;;  %8911 = vst [vmem:[#allocation16_spill] sm:$0xff] %v6836_v13  ;;  %v408_v60 = vld [vmem:[#allocation2 + $0x6c] sm:$0x1]  ;;  %5959 = vmatmul.mubr.msk.bf16.gmra.mrb[4].mxu1 %vm555_vm10, %v6832_v62  ;;  %5948 = vmatprep.mubr.msk.bf16.mxu0 %vm555_vm10, %v6836_v13  ;;  %v874_v29 = vshll.u32 %v6730_v40, 16  ;;  %v5462_v35 = vrot.slane %v6497_v25, 9 }
  0x55   :  { %404 = vst [vmem:[#allocation2 + $0x64] sm:$0x1] %v403_v52  ;;  %v1160_v51 = vsel %vm6814_vm3, %v8913_v10, %v8912_v21  ;;  %v409_v7 = vsel %vm6516_vm12, %v267_v23, %v408_v60  ;;  %v5463_v42 = vrot.slane %v6509_v36, 9  ;;  %v149_v56 = vld [vmem:[#allocation2 + $0x7c] sm:$0x1]  ;;  %v850_v58 = vrot.slane %v849_v39, 4 }
  0x56   :  { %v6857_v8 = vld [vmem:[#allocation2 + $0x88] sm:$0xf]  ;;  %410 = vst [vmem:[#allocation2 + $0x6c] sm:$0x1] %v409_v7  ;;  %v863_v10 = vor.u32 %v862_v30, %v859_v28  ;;  %v5464_v21 = vrot.slane %v6511_v37, 9  ;;  %v147_v52 = vsel %vm6449_vm9, 0, %v146_v59  ;;  %v841_v59 = vsel %vm6581_vm15, %v6779_v38, %v6825_v16 }
  0x57   :  { %v6864_v23 = vcombine.low %v6840_v19, %v6857_v8  ;;  %v876_v60 = vrot.slane %v874_v29, 5  ;;  %v8915_v62 = vrot.slane %v6577_v31, 5  ;;  %v8917_v39 = vrot.slane %v6588_v47, 5  ;;  %148 = vst [vmem:[#allocation2 + $0x74] sm:$0x1] %v147_v52 }
  0x58   :  { %v6878_v28 = vld [vmem:[#allocation2 + $0x5c] sm:$0x1]  ;;  %v8919_v7 = vrot.slane %v6594_v54, 5  ;;  %v150_v47 = vsel %vm6449_vm9, 0, %v149_v56  ;;  %v152_v29 = vld [vmem:[#allocation2 + $0x84] sm:$0x1] }
  0x59   :  { %8914 = vst [vmem:[#allocation17_spill] sm:$0xff] %v6864_v23  ;;  %v6870_v13 = vsel %vm6814_vm3, %v5462_v35, %v8915_v62  ;;  %v6876_v30 = vsel %vm6814_vm3, %v5463_v42, %v8917_v39  ;;  %5949 = vmatmul.mubr.msk.bf16.gmra.mrb[12].mxu0 %vm555_vm10, %v6864_v23  ;;  %v852_v35 = vshll.u32 %v6878_v28, 16  ;;  %v864_v42 = vrot.slane %v863_v10, 4  ;;  %151 = vst [vmem:[#allocation2 + $0x7c] sm:$0x1] %v150_v47 }
  0x5a   :  { %8916 = vst [vmem:[#allocation18_spill] sm:$0xff] %v6870_v13  ;;  %8918 = vst [vmem:[#allocation19_spill] sm:$0xff] %v6876_v30  ;;  %v5478_v31 = vcombine.low %v1160_v51, %v6870_v13  ;;  %v6889_v62 = vsel %vm6814_vm3, %v5464_v21, %v8919_v7  ;;  %v877_v52 = vor.u32 %v876_v60, %v873_v15  ;;  %v1686_v51 = vsel %vm580_vm0, %v6697_v49, 0  ;;  %v155_v54 = vld [vmem:[#allocation2 + $0x8c] sm:$0x1] }
  0x5b   :  { %8920 = vst [vmem:[#allocation20_spill] sm:$0xff] %v6889_v62  ;;  %v6901_v38 = vcombine.low %v6876_v30, %v6889_v62  ;;  %v885_v16 = vshrl.u32 %v6796_v63, 16  ;;  %v888_v56 = vshll.u32 %v6796_v63, 16  ;;  %v899_v21 = vshrl.u32 %v6823_v57, 16 }
  0x5c   :  { %5972 = vmatprep.mubr.msk.bf16.mxu0 %vm555_vm10, %v5478_v31 }
  0x5d   :  { %12 = vsyncpa [#allocation5], 0  ;;  %v854_v10 = vrot.slane %v852_v35, 5  ;;  %v6906_v15 = vld [vmem:[#allocation2 + $0x64] sm:$0x1]  ;;  %v275_v49 = vrot.slane %v6704_v6, 4 }
  0x5e   :  { %v902_v60 = vshll.u32 %v6823_v57, 16  ;;  %v153_v39 = vsel %vm6449_vm9, 0, %v152_v29  ;;  %v866_v31 = vshll.u32 %v6906_v15, 16  ;;  %v887_v7 = vrot.slane %v885_v16, 4  ;;  %v6917_v35 = vld [vmem:[#allocation2 + $0x6c] sm:$0x1] }
  0x5f   :  { %v890_v47 = vrot.slane %v888_v56, 5  ;;  %v901_v23 = vrot.slane %v899_v21, 4  ;;  %154 = vst [vmem:[#allocation2 + $0x84] sm:$0x1] %v153_v39  ;;  %v6915_v27 = vsel %vm6581_vm15, %v850_v58, %v854_v10  ;;  %v283_v62 = vrot.slane %v6717_v61, 4 }
  0x60   :  { %v904_v6 = vrot.slane %v902_v60, 5  ;;  %v156_v13 = vsel %vm6449_vm9, 0, %v155_v54  ;;  %v5449_v29 = vcombine.low %v841_v59, %v6915_v27  ;;  %v868_v30 = vrot.slane %v866_v31, 5  ;;  %v414_v56 = vld [vmem:[#allocation2 + $0x74] sm:$0x1] }
  0x61   :  { %v878_v48 = vrot.slane %v877_v52, 4  ;;  %v880_v16 = vshll.u32 %v6917_v35, 16  ;;  %157 = vst [vmem:[#allocation2 + $0x8c] sm:$0x1] %v156_v13  ;;  %v415_v58 = vsel %vm6516_vm12, %v275_v49, %v414_v56  ;;  %v891_v21 = vor.u32 %v890_v47, %v887_v7  ;;  %v420_v52 = vld [vmem:[#allocation2 + $0x7c] sm:$0x1]  ;;  %5973 = vmatmul.mubr.msk.bf16.vlgmr.msra.gmra.mrb[16].mxu0 %vm555_vm10, %v6901_v38 }
  0x62   :  { %v291_v10 = vrot.slane %v6734_v9, 4  ;;  %v913_v61 = vshrl.u32 %v6840_v19, 16  ;;  %5962 = vmatprep.mubr.msk.bf16.mxu1 %vm555_vm10, %v5449_v29  ;;  %v6931_v54 = vsel %vm6581_vm15, %v864_v42, %v868_v30  ;;  %416 = vst [vmem:[#allocation2 + $0x74] sm:$0x1] %v415_v58  ;;  %v905_v60 = vor.u32 %v904_v6, %v901_v23  ;;  %v6937_v49 = vld [vmem:[%s8845_s1 + $0xc] sm:$0x3]  ;;  %6007 = vmatpush3.bf16.msra.mxu0 %v1686_v51 }
  0x63   :  { %v882_v59 = vrot.slane %v880_v16, 5  ;;  %v916_v13 = vshll.u32 %v6840_v19, 16  ;;  %v421_v9 = vsel %vm6516_vm12, %v283_v62, %v420_v52  ;;  %v299_v30 = vrot.slane %v6736_v18, 4  ;;  %6264 = vmatprep.subr.msk.bf16.mxu0 %vm580_vm0, %v6937_v49 }
  0x64   :  { %v915_v42 = vrot.slane %v913_v61, 4  ;;  %v927_v39 = vshrl.u32 %v6857_v8, 16  ;;  %422 = vst [vmem:[#allocation2 + $0x7c] sm:$0x1] %v421_v9  ;;  %v930_v7 = vshll.u32 %v6857_v8, 16  ;;  %v5465_v47 = vrot.slane %v6532_v44, 9 }
  0x65   :  { %v6947_v23 = vsel %vm6581_vm15, %v878_v48, %v882_v59  ;;  %v918_v31 = vrot.slane %v916_v13, 5  ;;  %v1175_v29 = vrot.slane %v6596_v55, 5  ;;  %v5466_v16 = vrot.slane %v6534_v45, 9 }
  0x66   :  { %v6953_v6 = vcombine.low %v6931_v54, %v6947_v23  ;;  %v426_v62 = vld [vmem:[#allocation2 + $0x84] sm:$0x1]  ;;  %v929_v18 = vrot.slane %v927_v39, 4  ;;  %v932_v56 = vrot.slane %v930_v7, 5  ;;  %v1179_v58 = vrot.slane %v6756_v43, 5 }
  0x67   :  { %v427_v48 = vsel %vm6516_vm12, %v291_v10, %v426_v62  ;;  %v919_v51 = vor.u32 %v918_v31, %v915_v42  ;;  %v6966_v55 = vsel %vm6814_vm3, %v5465_v47, %v1175_v29  ;;  %v5467_v59 = vrot.slane %v6556_v2, 9  ;;  %v66_v29 = vld [vmem:[#allocation2 + $0x40] sm:$0x1] }
  0x68   :  { %5963 = vmatmul.mubr.msk.bf16.gmra.mrb[8].mxu1 %vm555_vm10, %v6953_v6  ;;  %428 = vst [vmem:[#allocation2 + $0x84] sm:$0x1] %v427_v48  ;;  %v432_v61 = vld [vmem:[#allocation2 + $0x8c] sm:$0x1]  ;;  %v1183_v52 = vrot.slane %v6760_v33, 5  ;;  %v5468_v13 = vrot.slane %v6558_v3, 9  ;;  %v6975_v42 = vsel %vm6814_vm3, %v5466_v16, %v1179_v58  ;;  %v933_v47 = vor.u32 %v932_v56, %v929_v18 }
  0x69   :  { %v892_v10 = vrot.slane %v891_v21, 4  ;;  %v906_v9 = vrot.slane %v905_v60, 4  ;;  %v433_v43 = vsel %vm6516_vm12, %v299_v30, %v432_v61  ;;  %v487_v39 = vld [vmem:[#allocation2 + $0x74] sm:$0x1]  ;;  %v920_v31 = vrot.slane %v919_v51, 4 }
  0x6a   :  { %434 = vst [vmem:[#allocation2 + $0x8c] sm:$0x1] %v433_v43  ;;  %v6979_v7 = vcombine.low %v6966_v55, %v6975_v42  ;;  %v6983_v33 = vsel %vm6814_vm3, %v5467_v59, %v1183_v52  ;;  %v1187_v21 = vrot.slane %v6772_v50, 5  ;;  %v894_v60 = vshll.u32 %v487_v39, 16  ;;  %v171_v61 = vld [vmem:[%s8844_s0 + $0x1c] sm:$0xf] }
  0x6b   :  { %v5469_v30 = vrot.slane %v6625_v22, 9  ;;  %v1191_v62 = vrot.slane %v6786_v14, 5  ;;  %v489_v16 = vld [vmem:[#allocation2 + $0x7c] sm:$0x1]  ;;  %v5470_v51 = vrot.slane %v6679_v5, 9  ;;  %v1195_v58 = vrot.slane %v6878_v28, 5 }
  0x6c   :  { %8921 = vst [vmem:[#allocation21_spill] sm:$0xff] %v6979_v7  ;;  %5976 = vmatprep.mubr.msk.bf16.mxu0 %vm555_vm10, %v6979_v7  ;;  %v6992_v48 = vsel %vm6814_vm3, %v5468_v13, %v1187_v21  ;;  %v5471_v50 = vrot.slane %v6721_v24, 9  ;;  %v896_v18 = vrot.slane %v894_v60, 5  ;;  %v908_v56 = vshll.u32 %v489_v16, 16 }
  0x6d   :  { %v6999_v22 = vcombine.low %v6983_v33, %v6992_v48  ;;  %v1192_v14 = vsel %vm6814_vm3, %v5469_v30, %v1191_v62  ;;  %v7008_v59 = vsel %vm6814_vm3, %v5470_v51, %v1195_v58  ;;  %v1199_v28 = vrot.slane %v6906_v15, 5 }
  0x6e   :  { %v5472_v52 = vrot.slane %v6730_v40, 9  ;;  %v1203_v13 = vrot.slane %v6917_v35, 5  ;;  %v7015_v43 = vsel %vm6581_vm15, %v892_v10, %v896_v18  ;;  %v910_v21 = vrot.slane %v908_v56, 5 }
  0x6f   :  { %8922 = vst [vmem:[#allocation22_spill] sm:$0xff] %v6999_v22  ;;  %v491_v60 = vld [vmem:[#allocation2 + $0x84] sm:$0x1]  ;;  %5977 = vmatmul.mubr.msk.bf16.gmra.mrb[20].mxu0 %vm555_vm10, %v6999_v22  ;;  %v5482_v30 = vcombine.low %v1192_v14, %v7008_v59  ;;  %v67_v62 = vsel %vm6381_vm4, 0, %v66_v29  ;;  %v7024_v15 = vsel %vm6814_vm3, %v5471_v50, %v1199_v28  ;;  %v237_v10 = vshrl.u32 %v171_v61, 16 }
  0x70   :  { %v922_v51 = vshll.u32 %v491_v60, 16  ;;  %v7028_v35 = vsel %vm6814_vm3, %v5472_v52, %v1203_v13  ;;  %68 = vst [vmem:[#allocation2 + $0x40] sm:$0x1] %v67_v62  ;;  %v7032_v58 = vsel %vm6581_vm15, %v906_v9, %v910_v21  ;;  %v934_v56 = vrot.slane %v933_v47, 4 }
  0x71   :  { %v493_v18 = vld [vmem:[#allocation2 + $0x8c] sm:$0x1]  ;;  %5980 = vmatprep.mubr.msk.bf16.mxu0 %vm555_vm10, %v5482_v30  ;;  %v7037_v29 = vcombine.low %v7024_v15, %v7028_v35  ;;  %v240_v50 = vshll.u32 %v171_v61, 16  ;;  %v7041_v14 = vcombine.low %v7015_v43, %v7032_v58  ;;  %v7043_v13 = vrot.slane %v237_v10, 7  ;;  %v96_v10 = vld [vmem:[#allocation2 + $0x90] sm:$0x1] }
  0x72   :  { %v924_v28 = vrot.slane %v922_v51, 5  ;;  %v936_v52 = vshll.u32 %v493_v18, 16  ;;  %v5473_v9 = vrot.slane %v6796_v63, 9  ;;  %v1207_v21 = vrot.slane %v487_v39, 5 }
  0x73   :  { %8923 = vst [vmem:[#allocation23_spill] sm:$0xff] %v7037_v29  ;;  %8924 = vst [vmem:[#allocation24_spill] sm:$0xff] %v7041_v14  ;;  %v5474_v47 = vrot.slane %v6823_v57, 9  ;;  %v1211_v62 = vrot.slane %v489_v16, 5  ;;  %5966 = vmatprep.mubr.msk.bf16.mxu1 %vm555_vm10, %v7041_v14  ;;  %v242_v22 = vor.u32 %v240_v50, %v7043_v13  ;;  %v5475_v51 = vrot.slane %v6840_v19, 9 }
  0x74   :  { %v7051_v61 = vsel %vm6581_vm15, %v920_v31, %v924_v28  ;;  %v938_v30 = vrot.slane %v936_v52, 5  ;;  %v7057_v7 = vsel %vm6814_vm3, %v5473_v9, %v1207_v21  ;;  %v1215_v16 = vrot.slane %v491_v60, 5  ;;  %v179_v31 = vld [vmem:[%s8844_s0 + $0x3c] sm:$0xf]  ;;  %v128_v21 = vld [vmem:[#allocation2 + $0x44] sm:$0x1] }
  0x75   :  { %v7061_v39 = vsel %vm6814_vm3, %v5474_v47, %v1211_v62  ;;  %v5476_v14 = vrot.slane %v6857_v8, 9  ;;  %v5495_v28 = vcombine.low %v6497_v25, %v6509_v36  ;;  %v1219_v9 = vrot.slane %v493_v18, 5 }
  0x76   :  { %v7069_v50 = vsel %vm6581_vm15, %v934_v56, %v938_v30  ;;  %v7075_v52 = vcombine.low %v7057_v7, %v7061_v39  ;;  %v7085_v56 = vsel %vm6814_vm3, %v5475_v51, %v1215_v16  ;;  %v97_v25 = vsel %vm6381_vm4, 0, %v96_v10  ;;  %v69_v10 = vld [vmem:[#allocation2 + $0x48] sm:$0x1]  ;;  %v131_v16 = vld [vmem:[#allocation2 + $0x4c] sm:$0x1] }
  0x77   :  { %v7079_v60 = vcombine.low %v7051_v61, %v7069_v50  ;;  %5981 = vmatmul.mubr.msk.bf16.gmra.mrb[24].mxu0 %vm555_vm10, %v7037_v29  ;;  %v387_v47 = vld [vmem:[#allocation2 + $0x40] sm:$0xf]  ;;  %v7095_v18 = vsel %vm6814_vm3, %v5476_v14, %v1219_v9  ;;  %98 = vst [vmem:[#allocation2 + $0x90] sm:$0x1] %v97_v25  ;;  %v301_v62 = vshrl.u32 %v179_v31, 16  ;;  %v304_v30 = vshll.u32 %v179_v31, 16 }
  0x78   :  { %v388_v36 = vsel %vm6431_vm8, %v242_v22, %v387_v47  ;;  %5984 = vmatprep.mubr.msk.bf16.mxu0 %vm555_vm10, %v7075_v52  ;;  %v158_v29 = vld [vmem:[#allocation2 + $0x94] sm:$0x1]  ;;  %v129_v51 = vsel %vm6449_vm9, 0, %v128_v21  ;;  %v99_v14 = vld [vmem:[#allocation2 + $0x98] sm:$0x1]  ;;  %v7106_v9 = vcombine.low %v7085_v56, %v7095_v18  ;;  %v5496_v25 = vcombine.low %v6511_v37, %v6532_v44 }
  0x79   :  { %5967 = vmatmul.mubr.msk.bf16.gmra.mrb[12].mxu1 %vm555_vm10, %v7079_v60  ;;  %389 = vst [vmem:[#allocation2 + $0x40] sm:$0xf] %v388_v36  ;;  %v7102_v22 = vrot.slane %v301_v62, 7  ;;  %130 = vst [vmem:[#allocation2 + $0x44] sm:$0x1] %v129_v51  ;;  %v159_v31 = vsel %vm6449_vm9, 0, %v158_v29 }
  0x7a   :  { %5990 = vmatprep.mubr.msk.bf16.mxu1 %vm555_vm10, %v5495_v28  ;;  %v161_v47 = vld [vmem:[#allocation2 + $0x9c] sm:$0x1]  ;;  %160 = vst [vmem:[#allocation2 + $0x94] sm:$0x1] %v159_v31  ;;  %v5497_v28 = vcombine.low %v6534_v45, %v6556_v2  ;;  %v70_v36 = vsel %vm6381_vm4, 0, %v69_v10  ;;  %v132_v62 = vsel %vm6449_vm9, 0, %v131_v16 }
  0x7b   :  { %v306_v21 = vor.u32 %v304_v30, %v7102_v22  ;;  %v100_v51 = vsel %vm6381_vm4, 0, %v99_v14  ;;  %v243_v29 = vrot.slane %v7043_v13, 4  ;;  %71 = vst [vmem:[#allocation2 + $0x48] sm:$0x1] %v70_v36  ;;  %133 = vst [vmem:[#allocation2 + $0x4c] sm:$0x1] %v132_v62  ;;  %v5500_v62 = vcombine.low %v6730_v40, %v6796_v63 }
  0x7c   :  { %101 = vst [vmem:[#allocation2 + $0x98] sm:$0x1] %v100_v51  ;;  %v162_v37 = vsel %vm6449_vm9, 0, %v161_v47  ;;  %vm441_vm5 = vcmask 64512   ;;  %v1880_v44 = vsel %vm580_vm0, %v6784_v11, 0  ;;  %v6324_v2 = vmov 0.0  }
  0x7d   :  { %163 = vst [vmem:[#allocation2 + $0x9c] sm:$0x1] %v162_v37  ;;  %444 = vst.msk [vmem:[#allocation3 + $0x10] sm:$0xff] %vm441_vm5, %v6324_v2  ;;  %v8925_v11 = vcombine.low %v6609_v0, %v6623_v20  ;;  %v7171_v30 = vld [vmem:[%s8845_s1 + $0xe] sm:$0x3]  ;;  %v307_v10 = vrot.slane %v7102_v22, 4  ;;  %v5513_v20 = vcombine.low %v6631_v26, %v6770_v53  ;;  %v5499_v26 = vcombine.low %v6679_v5, %v6721_v24 }
  0x7e   :  { %v435_v45 = vld [vmem:[#allocation2 + $0x90] sm:$0xf]  ;;  %442 = vst.msk [vmem:[#allocation3] sm:$0xff] %vm441_vm5, %v6324_v2  ;;  %443 = vst.msk [vmem:[#allocation3 + $0x8] sm:$0xff] %vm441_vm5, %v6324_v2  ;;  %v2042_v36 = vsel %vm580_vm0, %v6937_v49, 0 }
  0x7f   :  { %5985 = vmatmul.mubr.msk.bf16.gmra.mrb[28].mxu0 %vm555_vm10, %v7106_v9  ;;  %445 = vst.msk [vmem:[#allocation3 + $0x18] sm:$0xff] %vm441_vm5, %v6324_v2  ;;  %446 = vst.msk [vmem:[#allocation3 + $0x20] sm:$0xff] %vm441_vm5, %v6324_v2  ;;  %v436_v13 = vsel %vm6431_vm8, %v306_v21, %v435_v45  ;;  %v5571_v53 = vld [vmem:[%s8845_s1 + $0x10] sm:$0x3]  ;;  %v8926_v45 = vld [vmem:[#allocation14_spill] sm:$0xff] }
  0x80   :  { %447 = vst.msk [vmem:[#allocation3 + $0x28] sm:$0xff] %vm441_vm5, %v6324_v2  ;;  %448 = vst.msk [vmem:[#allocation3 + $0x30] sm:$0xff] %vm441_vm5, %v6324_v2  ;;  %v7160_v46 = vld [vmem:[#allocation2 + $0x40] sm:$0xf]  ;;  %6008 = vmatprep.mubr.msk.bf16.mxu0 %vm555_vm10, %v8925_v11  ;;  %v390_v16 = vld [vmem:[#allocation2 + $0x44] sm:$0x1] }
  0x81   :  { %449 = vst.msk [vmem:[#allocation3 + $0x38] sm:$0xff] %vm441_vm5, %v6324_v2  ;;  %450 = vst.msk [vmem:[#allocation3 + $0x40] sm:$0xff] %vm441_vm5, %v6324_v2  ;;  %5991 = vmatmul.mubr.msk.bf16.vlgmr.msra.gmra.mrb[16].mxu1 %vm555_vm10, %v5496_v25  ;;  %v1606_v14 = vshrl.u32 %v7160_v46, 16  ;;  %v1609_v0 = vshll.u32 %v7160_v46, 16  ;;  %v391_v32 = vsel %vm6516_vm12, %v243_v29, %v390_v16  ;;  %v438_v47 = vld [vmem:[#allocation2 + $0x94] sm:$0x1]  ;;  %v5514_v25 = vcombine.low %v6794_v41, %v6808_v1 }
  0x82   :  { %451 = vst.msk [vmem:[#allocation3 + $0x48] sm:$0xff] %vm441_vm5, %v6324_v2  ;;  %452 = vst.msk [vmem:[#allocation3 + $0x50] sm:$0xff] %vm441_vm5, %v6324_v2  ;;  %5994 = vmatprep.mubr.msk.bf16.mxu1 %vm555_vm10, %v5497_v28  ;;  %6025 = vmatpush3.bf16.msra.mxu1 %v1880_v44  ;;  %v439_v21 = vsel %vm6516_vm12, %v307_v10, %v438_v47  ;;  %v5498_v28 = vcombine.low %v6558_v3, %v7160_v46 }
  0x83   :  { %453 = vst.msk [vmem:[#allocation3 + $0x58] sm:$0xff] %vm441_vm5, %v6324_v2  ;;  %454 = vst.msk [vmem:[#allocation3 + $0x60] sm:$0xff] %vm441_vm5, %v6324_v2  ;;  %v1608_v31 = vrot.slane %v1606_v14, 4  ;;  %v1611_v22 = vrot.slane %v1609_v0, 5  ;;  %6265 = vmatprep.subr.msk.bf16.mxu1 %vm580_vm0, %v7171_v30  ;;  %v5501_v29 = vcombine.low %v6823_v57, %v6840_v19  ;;  %v5516_v44 = vcombine.low %v6915_v27, %v6931_v54  ;;  %v8927_v27 = vld [vmem:[#allocation19_spill] sm:$0xff]  ;;  %v8928_v19 = vld [vmem:[#allocation18_spill] sm:$0xff] }
  0x84   :  { %455 = vst.msk [vmem:[#allocation3 + $0x68] sm:$0xff] %vm441_vm5, %v6324_v2  ;;  %456 = vst.msk [vmem:[#allocation3 + $0x70] sm:$0xff] %vm441_vm5, %v6324_v2  ;;  %v5531_v54 = vcombine.low %v8928_v19, %v8927_v27  ;;  %v5517_v14 = vcombine.low %v6947_v23, %v7015_v43  ;;  %v5518_v0 = vcombine.low %v7032_v58, %v7051_v61  ;;  %v5528_v58 = vrot.slane %v7160_v46, 9 }
  0x85   :  { %457 = vst.msk [vmem:[#allocation3 + $0x78] sm:$0xff] %vm441_vm5, %v6324_v2  ;;  %437 = vst [vmem:[#allocation2 + $0x90] sm:$0xf] %v436_v13  ;;  %v1612_v41 = vor.u32 %v1611_v22, %v1608_v31  ;;  %v8929_v31 = vld [vmem:[#allocation20_spill] sm:$0xff]  ;;  %v5533_v43 = vcombine.low %v6975_v42, %v6983_v33  ;;  %v2230_v22 = vsel %vm580_vm0, %v7171_v30, 0  ;;  %v5535_v33 = vcombine.low %v7008_v59, %v7024_v15  ;;  %v8931_v30 = vld [vmem:[#allocation9_spill] sm:$0xff] }
  0x86   :  { %392 = vst [vmem:[#allocation2 + $0x44] sm:$0x1] %v391_v32  ;;  %440 = vst [vmem:[#allocation2 + $0x94] sm:$0x1] %v439_v21  ;;  %v5532_v23 = vcombine.low %v8929_v31, %v6966_v55  ;;  %v8930_v55 = vld [vmem:[#allocation8_spill] sm:$0xff]  ;;  %v8932_v21 = vld [vmem:[#allocation10_spill] sm:$0xff]  ;;  %v5537_v59 = vcombine.low %v7061_v39, %v7085_v56 }
  0x87   :  { %6009 = vmatmul.mubr.msk.bf16.vlgmr.msra.gmra.mrb[32].mxu0 %vm555_vm10, %v5513_v20  ;;  %v1613_v5 = vrot.slane %v1612_v41, 4 }
  0x88   :  { %6043 = vmatpush3.bf16.msra.mxu0 %v2042_v36  ;;  %6012 = vmatprep.mubr.msk.bf16.mxu0 %vm555_vm10, %v5514_v25 }
  0x89   :  { %5995 = vmatmul.mubr.msk.bf16.gmra.mrb[20].mxu1 %vm555_vm10, %v5498_v28  ;;  %6266 = vmatprep.subr.msk.bf16.mxu0 %vm580_vm0, %v5571_v53  ;;  %v476_v28 = vld [vmem:[#allocation2 + $0x48] sm:$0xf] }
  0x8a   :  { %5998 = vmatprep.mubr.msk.bf16.mxu1 %vm555_vm10, %v5499_v26  ;;  %v5548_v26 = vcombine.low %v7160_v46, %v476_v28  ;;  %v2174_v41 = vshrl.u32 %v476_v28, 16  ;;  %v8934_v46 = vld [vmem:[#allocation11_spill] sm:$0xff]  ;;  %v5569_v27 = vrot.slane %v476_v28, 9 }
  0x8c   :  { %v7202_v3 = vld [vmem:[#allocation2 + $0x90] sm:$0xf]  ;;  %v2176_v39 = vrot.slane %v2174_v41, 4 }
  0x8d   :  { %v475_v12 = vld [vmem:[#allocation2 + $0x44] sm:$0x1]  ;;  %v1620_v1 = vshrl.u32 %v7202_v3, 16  ;;  %v1623_v49 = vshll.u32 %v7202_v3, 16  ;;  %v495_v16 = vld [vmem:[#allocation2 + $0x94] sm:$0x1]  ;;  %v5502_v57 = vcombine.low %v6857_v8, %v7202_v3 }
  0x8e   :  { %v1615_v24 = vshll.u32 %v475_v12, 16  ;;  %v1629_v63 = vshll.u32 %v495_v16, 16  ;;  %v1821_v61 = vrot.slane %v475_v12, 5  ;;  %v5529_v15 = vrot.slane %v7202_v3, 9 }
  0x8f   :  { %v1622_v13 = vrot.slane %v1620_v1, 4  ;;  %v1625_v10 = vrot.slane %v1623_v49, 5  ;;  %v1825_v36 = vrot.slane %v495_v16, 5  ;;  %v2177_v12 = vshll.u32 %v476_v28, 16  ;;  %v8935_v49 = vld [vmem:[#allocation16_spill] sm:$0xff] }
  0x90   :  { %v1617_v51 = vrot.slane %v1615_v24, 5  ;;  %v1631_v20 = vrot.slane %v1629_v63, 5  ;;  %v7251_v25 = vsel %vm6814_vm3, %v5528_v58, %v1821_v61 }
  0x91   :  { %5999 = vmatmul.mubr.msk.bf16.gmra.mrb[24].mxu1 %vm555_vm10, %v5500_v62  ;;  %v1626_v40 = vor.u32 %v1625_v10, %v1622_v13  ;;  %v5534_v42 = vcombine.low %v6992_v48, %v7251_v25  ;;  %v5536_v48 = vcombine.low %v7028_v35, %v7057_v7  ;;  %v8933_v7 = vld [vmem:[#allocation12_spill] sm:$0xff]  ;;  %v2179_v56 = vrot.slane %v2177_v12, 5  ;;  %v8936_v62 = vld [vmem:[#allocation17_spill] sm:$0xff]  ;;  %v503_v12 = vld [vmem:[#allocation3 + $0x28] sm:$0xff] }
  0x92   :  { %v7212_v37 = vsel %vm6581_vm15, %v1613_v5, %v1617_v51  ;;  %6002 = vmatprep.mubr.msk.bf16.mxu1 %vm555_vm10, %v5501_v29  ;;  %v477_v5 = vld [vmem:[#allocation2 + $0x4c] sm:$0x1]  ;;  %v496_v51 = vld [vmem:[#allocation2 + $0x98] sm:$0xf] }
  0x93   :  { %v5515_v11 = vcombine.low %v8926_v45, %v7212_v37  ;;  %v1627_v32 = vrot.slane %v1626_v40, 4  ;;  %v2180_v24 = vor.u32 %v2179_v56, %v2176_v39  ;;  %v2183_v1 = vshll.u32 %v477_v5, 16  ;;  %v8937_v45 = vld [vmem:[#allocation13_spill] sm:$0xff] }
  0x94   :  { %v2188_v10 = vshrl.u32 %v496_v51, 16  ;;  %v2191_v16 = vshll.u32 %v496_v51, 16  ;;  %v2365_v19 = vrot.slane %v477_v5, 5  ;;  %v5570_v61 = vrot.slane %v496_v51, 9 }
  0x95   :  { %6013 = vmatmul.mubr.msk.bf16.gmra.mrb[36].mxu0 %vm555_vm10, %v5515_v11  ;;  %v7236_v8 = vsel %vm6581_vm15, %v1627_v32, %v1631_v20  ;;  %v2181_v29 = vrot.slane %v2180_v24, 4  ;;  %v8938_v11 = vld [vmem:[#allocation15_spill] sm:$0xff]  ;;  %v8940_v32 = vld [vmem:[#allocation22_spill] sm:$0xff] }
  0x96   :  { %6016 = vmatprep.mubr.msk.bf16.mxu0 %vm555_vm10, %v5516_v44  ;;  %v5519_v47 = vcombine.low %v7069_v50, %v7236_v8  ;;  %v2400_v50 = vsel %vm580_vm0, %v5571_v53, 0  ;;  %v1826_v53 = vsel %vm6814_vm3, %v5529_v15, %v1825_v36  ;;  %v2185_v44 = vrot.slane %v2183_v1, 5  ;;  %v502_v15 = vld [vmem:[#allocation3 + $0x20] sm:$0xff] }
  0x97   :  { %v5538_v35 = vcombine.low %v7095_v18, %v1826_v53  ;;  %v5549_v18 = vcombine.low %v7202_v3, %v496_v51  ;;  %v2190_v63 = vrot.slane %v2188_v10, 4  ;;  %v2193_v3 = vrot.slane %v2191_v16, 5  ;;  %v508_v10 = vld [vmem:[#allocation3 + $0x50] sm:$0xff]  ;;  %v506_v16 = vld [vmem:[#allocation3 + $0x40] sm:$0xff] }
  0x98   :  { %v2186_v13 = vsel %vm6581_vm15, %v2181_v29, %v2185_v44  ;;  %vm3213_vm0 = vcmask 1043456  }
  0x99   :  { %6003 = vmatmul.mubr.msk.bf16.gmra.mrb[28].mxu1 %vm555_vm10, %v5502_v57  ;;  %v5559_v40 = vcombine.low %v7212_v37, %v2186_v13  ;;  %v497_v57 = vld [vmem:[#allocation2 + $0x9c] sm:$0x1] }
  0x9a   :  { %6026 = vmatprep.mubr.msk.bf16.mxu1 %vm555_vm10, %v5531_v54  ;;  %v2194_v54 = vor.u32 %v2193_v3, %v2190_v63  ;;  %v509_v63 = vld [vmem:[#allocation3 + $0x58] sm:$0xff] }
  0x9c   :  { %v2195_v37 = vrot.slane %v2194_v54, 4 }
  0x9d   :  { %6017 = vmatmul.mubr.msk.bf16.gmra.mrb[40].mxu0 %vm555_vm10, %v5517_v14  ;;  %v2197_v14 = vshll.u32 %v497_v57, 16 }
  0x9e   :  { %6020 = vmatprep.mubr.msk.bf16.mxu0 %vm555_vm10, %v5518_v0  ;;  %v8939_v0 = vld [vmem:[#allocation21_spill] sm:$0xff] }
  0x9f   :  { %v2199_v20 = vrot.slane %v2197_v14, 5 }
  0xa1   :  { %6027 = vmatmul.mubr.msk.bf16.vlgmr.msra.gmra.mrb[32].mxu1 %vm555_vm10, %v5532_v23  ;;  %v8941_v23 = vld [vmem:[#allocation24_spill] sm:$0xff] }
  0xa2   :  { %6030 = vmatprep.mubr.msk.bf16.mxu1 %vm555_vm10, %v5533_v43  ;;  %6061 = vmatpush3.bf16.msra.mxu1 %v2230_v22  ;;  %v8942_v43 = vld [vmem:[#allocation23_spill] sm:$0xff]  ;;  %v2369_v22 = vrot.slane %v497_v57, 5 }
  0xa5   :  { %6021 = vmatmul.mubr.msk.bf16.gmra.mrb[44].mxu0 %vm555_vm10, %v5519_v47 }
  0xa6   :  { %6044 = vmatprep.mubr.msk.bf16.mxu0 %vm555_vm10, %v8930_v55  ;;  %v498_v55 = vld [vmem:[#allocation3] sm:$0xff] }
  0xa9   :  { %6031 = vmatmul.mubr.msk.bf16.gmra.mrb[36].mxu1 %vm555_vm10, %v5534_v42 }
  0xaa   :  { %6034 = vmatprep.mubr.msk.bf16.mxu1 %vm555_vm10, %v5535_v33 }
  0xad   :  { %6045 = vmatmul.mubr.msk.bf16.vlgmr.msra.gmra.mrb[48].mxu0 %vm555_vm10, %v8931_v30  ;;  %v499_v30 = vld [vmem:[#allocation3 + $0x8] sm:$0xff] }
  0xae   :  { %6079 = vmatpush3.bf16.msra.mxu0 %v2400_v50  ;;  %6048 = vmatprep.mubr.msk.bf16.mxu0 %vm555_vm10, %v8932_v21 }
  0xb1   :  { %6035 = vmatmul.mubr.msk.bf16.gmra.mrb[40].mxu1 %vm555_vm10, %v5536_v48 }
  0xb2   :  { %6038 = vmatprep.mubr.msk.bf16.mxu1 %vm555_vm10, %v5537_v59  ;;  %v504_v59 = vld [vmem:[#allocation3 + $0x30] sm:$0xff] }
  0xb5   :  { %6049 = vmatmul.mubr.msk.bf16.gmra.mrb[52].mxu0 %vm555_vm10, %v5548_v26  ;;  %v505_v26 = vld [vmem:[#allocation3 + $0x38] sm:$0xff] }
  0xb6   :  { %6052 = vmatprep.mubr.msk.bf16.mxu0 %vm555_vm10, %v8933_v7 }
  0xb9   :  { %6039 = vmatmul.mubr.msk.bf16.gmra.mrb[44].mxu1 %vm555_vm10, %v5538_v35 }
  0xba   :  { %6062 = vmatprep.mubr.msk.bf16.mxu1 %vm555_vm10, %v8934_v46 }
  0xbd   :  { %6053 = vmatmul.mubr.msk.bf16.gmra.mrb[56].mxu0 %vm555_vm10, %v8935_v49 }
  0xbe   :  { %6056 = vmatprep.mubr.msk.bf16.mxu0 %vm555_vm10, %v8936_v62 }
  0xc1   :  { %6063 = vmatmul.mubr.msk.bf16.vlgmr.msra.gmra.mrb[48].mxu1 %vm555_vm10, %v8937_v45 }
  0xc2   :  { %6066 = vmatprep.mubr.msk.bf16.mxu1 %vm555_vm10, %v8938_v11 }
  0xc5   :  { %6057 = vmatmul.mubr.msk.bf16.gmra.mrb[60].mxu0 %vm555_vm10, %v5549_v18 }
  0xc6   :  { %6080 = vmatprep.mubr.msk.bf16.mxu0 %vm555_vm10, %v6901_v38  ;;  %v2366_v38 = vsel %vm6814_vm3, %v5569_v27, %v2365_v19  ;;  %v507_v27 = vld [vmem:[#allocation3 + $0x48] sm:$0xff] }
  0xc7   :  { %v5572_v31 = vcombine.low %v7251_v25, %v2366_v38  ;;  %v500_v25 = vld [vmem:[#allocation3 + $0x10] sm:$0xff] }
  0xc9   :  { %6067 = vmatmul.mubr.msk.bf16.gmra.mrb[52].mxu1 %vm555_vm10, %v5559_v40 }
  0xca   :  { %6070 = vmatprep.mubr.msk.bf16.mxu1 %vm555_vm10, %v6953_v6  ;;  %v2200_v6 = vsel %vm6581_vm15, %v2195_v37, %v2199_v20 }
  0xcb   :  { %v5560_v58 = vcombine.low %v7236_v8, %v2200_v6  ;;  %v501_v8 = vld [vmem:[#allocation3 + $0x18] sm:$0xff] }
  0xcd   :  { %6081 = vmatmul.mubr.msk.bf16.vlgmr.msra.gmra.mrb[64].mxu0 %vm555_vm10, %v8939_v0 }
  0xce   :  { %6084 = vmatprep.mubr.msk.bf16.mxu0 %vm555_vm10, %v8940_v32 }
  0xd1   :  { %6071 = vmatmul.mubr.msk.bf16.gmra.mrb[56].mxu1 %vm555_vm10, %v8941_v23 }
  0xd2   :  { %6074 = vmatprep.mubr.msk.bf16.mxu1 %vm555_vm10, %v7079_v60  ;;  %v2370_v60 = vsel %vm6814_vm3, %v5570_v61, %v2369_v22  ;;  %v512_v22 = vld [vmem:[#allocation3 + $0x70] sm:$0xff] }
  0xd3   :  { %v5573_v47 = vcombine.low %v1826_v53, %v2370_v60 }
  0xd5   :  { %6085 = vmatmul.mubr.msk.bf16.gmra.mrb[68].mxu0 %vm555_vm10, %v5572_v31 }
  0xd6   :  { %6088 = vmatprep.mubr.msk.bf16.mxu0 %vm555_vm10, %v8942_v43 }
  0xd9   :  { %6075 = vmatmul.mubr.msk.bf16.gmra.mrb[60].mxu1 %vm555_vm10, %v5560_v58 }
  0xdd   :  { %6089 = vmatmul.mubr.msk.bf16.gmra.mrb[72].mxu0 %vm555_vm10, %v7075_v52 }
  0xde   :  { %6092 = vmatprep.mubr.msk.bf16.mxu0 %vm555_vm10, %v7106_v9 }
  0xe5   :  { %6093 = vmatmul.mubr.msk.bf16.gmra.mrb[76].mxu0 %vm555_vm10, %v5573_v47 }
  0xf3   :  { %v5938_v42 = vpop.f32.mrb[0].mxu0 }
  0xf4   :  { %v683_v33 = vadd.f32 %v5938_v42, %v500_v25  ;;  %v618_v50 = vpop.f32.mrb[1].mxu0  ;;  %v510_v25 = vld [vmem:[#allocation3 + $0x60] sm:$0xff] }
  0xf5   :  { %v681_v21 = vadd.f32 %v618_v50, %v498_v55  ;;  %v5939_v28 = vpop.f32.mrb[2].mxu0 }
  0xf6   :  { %699 = vst.msk [vmem:[#allocation3 + $0x10] sm:$0xff] %vm441_vm5, %v683_v33  ;;  %v684_v52 = vadd.f32 %v5939_v28, %v501_v8  ;;  %v621_v48 = vpop.f32.mrb[3].mxu0  ;;  %v513_v8 = vld [vmem:[#allocation3 + $0x78] sm:$0xff] }
  0xf7   :  { %697 = vst.msk [vmem:[#allocation3] sm:$0xff] %vm441_vm5, %v681_v21  ;;  %v682_v9 = vadd.f32 %v621_v48, %v499_v30  ;;  %v511_v30 = vld [vmem:[#allocation3 + $0x68] sm:$0xff] }
  0xf8   :  { %700 = vst.msk [vmem:[#allocation3 + $0x18] sm:$0xff] %vm441_vm5, %v684_v52 }
  0xf9   :  { %698 = vst.msk [vmem:[#allocation3 + $0x8] sm:$0xff] %vm441_vm5, %v682_v9 }
  0xfc   :  { %v5942_v36 = vpop.f32.mrb[4].mxu0 }
  0xfd   :  { %v687_v53 = vadd.f32 %v5942_v36, %v504_v59  ;;  %v634_v41 = vpop.f32.mrb[5].mxu0  ;;  %v942_v46 = vld [vmem:[#allocation3 + $0x10] sm:$0xff] }
  0xfe   :  { %v685_v7 = vadd.f32 %v634_v41, %v502_v15  ;;  %v5943_v35 = vpop.f32.mrb[6].mxu0  ;;  %v940_v24 = vld [vmem:[#allocation3] sm:$0xff] }
  0xff   :  { %703 = vst.msk [vmem:[#allocation3 + $0x30] sm:$0xff] %vm441_vm5, %v687_v53  ;;  %v688_v39 = vadd.f32 %v5943_v35, %v505_v26  ;;  %v637_v56 = vpop.f32.mrb[7].mxu0  ;;  %v943_v49 = vld [vmem:[#allocation3 + $0x18] sm:$0xff] }
 0x100   :  { %701 = vst.msk [vmem:[#allocation3 + $0x20] sm:$0xff] %vm441_vm5, %v685_v7  ;;  %v686_v5 = vadd.f32 %v637_v56, %v503_v12  ;;  %v941_v29 = vld [vmem:[#allocation3 + $0x8] sm:$0xff] }
 0x101   :  { %704 = vst.msk [vmem:[#allocation3 + $0x38] sm:$0xff] %vm441_vm5, %v688_v39 }
 0x102   :  { %702 = vst.msk [vmem:[#allocation3 + $0x28] sm:$0xff] %vm441_vm5, %v686_v5 }
 0x106   :  { %v946_v38 = vld [vmem:[#allocation3 + $0x30] sm:$0xff] }
 0x107   :  { %v944_v37 = vld [vmem:[#allocation3 + $0x20] sm:$0xff] }
 0x108   :  { %v947_v31 = vld [vmem:[#allocation3 + $0x38] sm:$0xff] }
 0x109   :  { %v5956_v1 = vpop.f32.mrb[0].mxu1  ;;  %v945_v43 = vld [vmem:[#allocation3 + $0x28] sm:$0xff] }
 0x10a   :  { %v1108_v62 = vadd.f32 %v5956_v1, %v942_v46  ;;  %v1043_v51 = vpop.f32.mrb[1].mxu1 }
 0x10b   :  { %v1106_v44 = vadd.f32 %v1043_v51, %v940_v24  ;;  %v5957_v18 = vpop.f32.mrb[2].mxu1 }
 0x10c   :  { %1124 = vst.msk [vmem:[#allocation3 + $0x10] sm:$0xff] %vm441_vm5, %v1108_v62  ;;  %v1109_v45 = vadd.f32 %v5957_v18, %v943_v49  ;;  %v1046_v11 = vpop.f32.mrb[3].mxu1 }
 0x10d   :  { %1122 = vst.msk [vmem:[#allocation3] sm:$0xff] %vm441_vm5, %v1106_v44  ;;  %v1107_v13 = vadd.f32 %v1046_v11, %v941_v29 }
 0x10e   :  { %1125 = vst.msk [vmem:[#allocation3 + $0x18] sm:$0xff] %vm441_vm5, %v1109_v45 }
 0x10f   :  { %1123 = vst.msk [vmem:[#allocation3 + $0x8] sm:$0xff] %vm441_vm5, %v1107_v13 }
 0x113   :  { %v1223_v59 = vld [vmem:[#allocation3 + $0x10] sm:$0xff] }
 0x114   :  { %v1221_v26 = vld [vmem:[#allocation3] sm:$0xff] }
 0x115   :  { %v1224_v7 = vld [vmem:[#allocation3 + $0x18] sm:$0xff] }
 0x116   :  { %v1222_v5 = vld [vmem:[#allocation3 + $0x8] sm:$0xff] }
 0x11c   :  { %v5946_v40 = vpop.f32.mrb[8].mxu0 }
 0x11d   :  { %v691_v3 = vadd.f32 %v5946_v40, %v508_v10  ;;  %v650_v57 = vpop.f32.mrb[9].mxu0 }
 0x11e   :  { %v689_v19 = vadd.f32 %v650_v57, %v506_v16  ;;  %v5947_v54 = vpop.f32.mrb[10].mxu0 }
 0x11f   :  { %707 = vst.msk [vmem:[#allocation3 + $0x50] sm:$0xff] %vm441_vm5, %v691_v3  ;;  %v692_v14 = vadd.f32 %v5947_v54, %v509_v63  ;;  %v653_v0 = vpop.f32.mrb[11].mxu0 }
 0x120   :  { %705 = vst.msk [vmem:[#allocation3 + $0x40] sm:$0xff] %vm441_vm5, %v689_v19  ;;  %v690_v32 = vadd.f32 %v653_v0, %v507_v27 }
 0x121   :  { %708 = vst.msk [vmem:[#allocation3 + $0x58] sm:$0xff] %vm441_vm5, %v692_v14 }
 0x122   :  { %706 = vst.msk [vmem:[#allocation3 + $0x48] sm:$0xff] %vm441_vm5, %v690_v32 }
 0x126   :  { %v950_v41 = vld [vmem:[#allocation3 + $0x50] sm:$0xff] }
 0x127   :  { %v5960_v20 = vpop.f32.mrb[4].mxu1  ;;  %v948_v39 = vld [vmem:[#allocation3 + $0x40] sm:$0xff] }
 0x128   :  { %v1112_v23 = vadd.f32 %v5960_v20, %v946_v38  ;;  %v1059_v6 = vpop.f32.mrb[5].mxu1  ;;  %v951_v1 = vld [vmem:[#allocation3 + $0x58] sm:$0xff] }
 0x129   :  { %v1110_v58 = vadd.f32 %v1059_v6, %v944_v37  ;;  %v5961_v61 = vpop.f32.mrb[6].mxu1  ;;  %v949_v29 = vld [vmem:[#allocation3 + $0x48] sm:$0xff] }
 0x12a   :  { %1128 = vst.msk [vmem:[#allocation3 + $0x30] sm:$0xff] %vm441_vm5, %v1112_v23  ;;  %v1113_v60 = vadd.f32 %v5961_v61, %v947_v31  ;;  %v1062_v47 = vpop.f32.mrb[7].mxu1 }
 0x12b   :  { %1126 = vst.msk [vmem:[#allocation3 + $0x20] sm:$0xff] %vm441_vm5, %v1110_v58  ;;  %v1111_v55 = vadd.f32 %v1062_v47, %v945_v43 }
 0x12c   :  { %v5950_v42 = vpop.f32.mrb[12].mxu0  ;;  %1129 = vst.msk [vmem:[#allocation3 + $0x38] sm:$0xff] %vm441_vm5, %v1113_v60 }
 0x12d   :  { %v695_v33 = vadd.f32 %v5950_v42, %v512_v22  ;;  %v666_v50 = vpop.f32.mrb[13].mxu0  ;;  %1127 = vst.msk [vmem:[#allocation3 + $0x28] sm:$0xff] %vm441_vm5, %v1111_v55 }
 0x12e   :  { %v693_v21 = vadd.f32 %v666_v50, %v510_v25  ;;  %v5951_v28 = vpop.f32.mrb[14].mxu0 }
 0x12f   :  { %711 = vst.msk [vmem:[#allocation3 + $0x70] sm:$0xff] %vm441_vm5, %v695_v33  ;;  %v696_v52 = vadd.f32 %v5951_v28, %v513_v8  ;;  %v669_v48 = vpop.f32.mrb[15].mxu0 }
 0x130   :  { %709 = vst.msk [vmem:[#allocation3 + $0x60] sm:$0xff] %vm441_vm5, %v693_v21  ;;  %v694_v9 = vadd.f32 %v669_v48, %v511_v30 }
 0x131   :  { %712 = vst.msk [vmem:[#allocation3 + $0x78] sm:$0xff] %vm441_vm5, %v696_v52  ;;  %v1227_v10 = vld [vmem:[#allocation3 + $0x30] sm:$0xff] }
 0x132   :  { %710 = vst.msk [vmem:[#allocation3 + $0x68] sm:$0xff] %vm441_vm5, %v694_v9  ;;  %v1225_v63 = vld [vmem:[#allocation3 + $0x20] sm:$0xff] }
 0x133   :  { %v1228_v27 = vld [vmem:[#allocation3 + $0x38] sm:$0xff] }
 0x134   :  { %v5974_v15 = vpop.f32.mrb[16].mxu0  ;;  %v1226_v14 = vld [vmem:[#allocation3 + $0x28] sm:$0xff] }
 0x135   :  { %v1389_v36 = vadd.f32 %v5974_v15, %v1223_v59  ;;  %v1324_v53 = vpop.f32.mrb[17].mxu0 }
 0x136   :  { %v1387_v12 = vadd.f32 %v1324_v53, %v1221_v26  ;;  %v5975_v35 = vpop.f32.mrb[18].mxu0  ;;  %v954_v38 = vld [vmem:[#allocation3 + $0x70] sm:$0xff] }
 0x137   :  { %1405 = vst.msk [vmem:[#allocation3 + $0x10] sm:$0xff] %vm441_vm5, %v1389_v36  ;;  %v1390_v56 = vadd.f32 %v5975_v35, %v1224_v7  ;;  %v1327_v46 = vpop.f32.mrb[19].mxu0  ;;  %v952_v31 = vld [vmem:[#allocation3 + $0x60] sm:$0xff] }
 0x138   :  { %1403 = vst.msk [vmem:[#allocation3] sm:$0xff] %vm441_vm5, %v1387_v12  ;;  %v1388_v49 = vadd.f32 %v1327_v46, %v1222_v5  ;;  %v955_v61 = vld [vmem:[#allocation3 + $0x78] sm:$0xff] }
 0x139   :  { %1406 = vst.msk [vmem:[#allocation3 + $0x18] sm:$0xff] %vm441_vm5, %v1390_v56  ;;  %v953_v42 = vld [vmem:[#allocation3 + $0x68] sm:$0xff] }
 0x13a   :  { %1404 = vst.msk [vmem:[#allocation3 + $0x8] sm:$0xff] %vm441_vm5, %v1388_v49 }
 0x13b   :  { %v5964_v24 = vpop.f32.mrb[8].mxu1 }
 0x13c   :  { %v1116_v62 = vadd.f32 %v5964_v24, %v950_v41  ;;  %v1075_v51 = vpop.f32.mrb[9].mxu1 }
 0x13d   :  { %v1114_v44 = vadd.f32 %v1075_v51, %v948_v39  ;;  %v5965_v18 = vpop.f32.mrb[10].mxu1 }
 0x13e   :  { %1132 = vst.msk [vmem:[#allocation3 + $0x50] sm:$0xff] %vm441_vm5, %v1116_v62  ;;  %v1117_v45 = vadd.f32 %v5965_v18, %v951_v1  ;;  %v1078_v11 = vpop.f32.mrb[11].mxu1  ;;  %v1421_v59 = vld [vmem:[#allocation3 + $0x10] sm:$0xff] }
 0x13f   :  { %1130 = vst.msk [vmem:[#allocation3 + $0x40] sm:$0xff] %vm441_vm5, %v1114_v44  ;;  %v1115_v13 = vadd.f32 %v1078_v11, %v949_v29  ;;  %v1419_v36 = vld [vmem:[#allocation3] sm:$0xff] }
 0x140   :  { %1133 = vst.msk [vmem:[#allocation3 + $0x58] sm:$0xff] %vm441_vm5, %v1117_v45  ;;  %v1422_v41 = vld [vmem:[#allocation3 + $0x18] sm:$0xff] }
 0x141   :  { %1131 = vst.msk [vmem:[#allocation3 + $0x48] sm:$0xff] %vm441_vm5, %v1115_v13  ;;  %v1420_v39 = vld [vmem:[#allocation3 + $0x8] sm:$0xff] }
 0x142   :  { %v5978_v16 = vpop.f32.mrb[20].mxu0 }
 0x143   :  { %v1393_v40 = vadd.f32 %v5978_v16, %v1227_v10  ;;  %v1340_v3 = vpop.f32.mrb[21].mxu0 }
 0x144   :  { %v1391_v57 = vadd.f32 %v1340_v3, %v1225_v63  ;;  %v5979_v19 = vpop.f32.mrb[22].mxu0 }
 0x145   :  { %1409 = vst.msk [vmem:[#allocation3 + $0x30] sm:$0xff] %vm441_vm5, %v1393_v40  ;;  %v1394_v54 = vadd.f32 %v5979_v19, %v1228_v27  ;;  %v1343_v0 = vpop.f32.mrb[23].mxu0  ;;  %v1231_v37 = vld [vmem:[#allocation3 + $0x50] sm:$0xff] }
 0x146   :  { %1407 = vst.msk [vmem:[#allocation3 + $0x20] sm:$0xff] %vm441_vm5, %v1391_v57  ;;  %v1392_v32 = vadd.f32 %v1343_v0, %v1226_v14  ;;  %v1229_v6 = vld [vmem:[#allocation3 + $0x40] sm:$0xff] }
 0x147   :  { %1410 = vst.msk [vmem:[#allocation3 + $0x38] sm:$0xff] %vm441_vm5, %v1394_v54  ;;  %v1232_v60 = vld [vmem:[#allocation3 + $0x58] sm:$0xff] }
 0x148   :  { %1408 = vst.msk [vmem:[#allocation3 + $0x28] sm:$0xff] %vm441_vm5, %v1392_v32  ;;  %v1230_v33 = vld [vmem:[#allocation3 + $0x48] sm:$0xff] }
 0x14a   :  { %v5982_v20 = vpop.f32.mrb[24].mxu0 }
 0x14b   :  { %v1397_v23 = vadd.f32 %v5982_v20, %v1231_v37  ;;  %v1356_v43 = vpop.f32.mrb[25].mxu0 }
 0x14c   :  { %v5968_v58 = vpop.f32.mrb[12].mxu1  ;;  %v1395_v22 = vadd.f32 %v1356_v43, %v1229_v6  ;;  %v5983_v47 = vpop.f32.mrb[26].mxu0  ;;  %v1425_v13 = vld [vmem:[#allocation3 + $0x30] sm:$0xff] }
 0x14d   :  { %v1120_v25 = vadd.f32 %v5968_v58, %v954_v38  ;;  %v1091_v55 = vpop.f32.mrb[13].mxu1  ;;  %1413 = vst.msk [vmem:[#allocation3 + $0x50] sm:$0xff] %vm441_vm5, %v1397_v23  ;;  %v1398_v8 = vadd.f32 %v5983_v47, %v1232_v60  ;;  %v1359_v50 = vpop.f32.mrb[27].mxu0  ;;  %v1423_v40 = vld [vmem:[#allocation3 + $0x20] sm:$0xff] }
 0x14e   :  { %v1118_v30 = vadd.f32 %v1091_v55, %v952_v31  ;;  %v5969_v21 = vpop.f32.mrb[14].mxu1  ;;  %1411 = vst.msk [vmem:[#allocation3 + $0x40] sm:$0xff] %vm441_vm5, %v1395_v22  ;;  %v1396_v28 = vadd.f32 %v1359_v50, %v1230_v33  ;;  %v1426_v57 = vld [vmem:[#allocation3 + $0x38] sm:$0xff] }
 0x14f   :  { %1136 = vst.msk [vmem:[#allocation3 + $0x70] sm:$0xff] %vm441_vm5, %v1120_v25  ;;  %v1121_v52 = vadd.f32 %v5969_v21, %v955_v61  ;;  %v1094_v48 = vpop.f32.mrb[15].mxu1  ;;  %1414 = vst.msk [vmem:[#allocation3 + $0x58] sm:$0xff] %vm441_vm5, %v1398_v8  ;;  %v1424_v14 = vld [vmem:[#allocation3 + $0x28] sm:$0xff] }
 0x150   :  { %1134 = vst.msk [vmem:[#allocation3 + $0x60] sm:$0xff] %vm441_vm5, %v1118_v30  ;;  %v1119_v9 = vadd.f32 %v1094_v48, %v953_v42  ;;  %1412 = vst.msk [vmem:[#allocation3 + $0x48] sm:$0xff] %vm441_vm5, %v1396_v28 }
 0x151   :  { %1137 = vst.msk [vmem:[#allocation3 + $0x78] sm:$0xff] %vm441_vm5, %v1121_v52 }
 0x152   :  { %1135 = vst.msk [vmem:[#allocation3 + $0x68] sm:$0xff] %vm441_vm5, %v1119_v9  ;;  %v5986_v15 = vpop.f32.mrb[28].mxu0 }
 0x153   :  { %v1372_v26 = vpop.f32.mrb[29].mxu0 }
 0x154   :  { %v5992_v53 = vpop.f32.mrb[16].mxu1  ;;  %v5987_v12 = vpop.f32.mrb[30].mxu0  ;;  %v1429_v47 = vld [vmem:[#allocation3 + $0x50] sm:$0xff] }
 0x155   :  { %v1575_v7 = vadd.f32 %v5992_v53, %v1421_v59  ;;  %v1510_v35 = vpop.f32.mrb[17].mxu1  ;;  %v1375_v56 = vpop.f32.mrb[31].mxu0  ;;  %v1427_v55 = vld [vmem:[#allocation3 + $0x40] sm:$0xff] }
 0x156   :  { %v1573_v5 = vadd.f32 %v1510_v35, %v1419_v36  ;;  %v5993_v46 = vpop.f32.mrb[18].mxu1  ;;  %v1235_v24 = vld [vmem:[#allocation3 + $0x70] sm:$0xff]  ;;  %v1430_v8 = vld [vmem:[#allocation3 + $0x58] sm:$0xff] }
 0x157   :  { %1591 = vst.msk [vmem:[#allocation3 + $0x10] sm:$0xff] %vm441_vm5, %v1575_v7  ;;  %v1576_v1 = vadd.f32 %v5993_v46, %v1422_v41  ;;  %v1513_v49 = vpop.f32.mrb[19].mxu1  ;;  %v1401_v62 = vadd.f32 %v5986_v15, %v1235_v24  ;;  %v1233_v51 = vld [vmem:[#allocation3 + $0x60] sm:$0xff]  ;;  %v1428_v30 = vld [vmem:[#allocation3 + $0x48] sm:$0xff] }
 0x158   :  { %1589 = vst.msk [vmem:[#allocation3] sm:$0xff] %vm441_vm5, %v1573_v5  ;;  %v1574_v29 = vadd.f32 %v1513_v49, %v1420_v39  ;;  %v1399_v44 = vadd.f32 %v1372_v26, %v1233_v51  ;;  %v1236_v18 = vld [vmem:[#allocation3 + $0x78] sm:$0xff] }
 0x159   :  { %1592 = vst.msk [vmem:[#allocation3 + $0x18] sm:$0xff] %vm441_vm5, %v1576_v1  ;;  %1417 = vst.msk [vmem:[#allocation3 + $0x70] sm:$0xff] %vm441_vm5, %v1401_v62  ;;  %v1402_v45 = vadd.f32 %v5987_v12, %v1236_v18  ;;  %v1234_v11 = vld [vmem:[#allocation3 + $0x68] sm:$0xff] }
 0x15a   :  { %1590 = vst.msk [vmem:[#allocation3 + $0x8] sm:$0xff] %vm441_vm5, %v1574_v29  ;;  %1415 = vst.msk [vmem:[#allocation3 + $0x60] sm:$0xff] %vm441_vm5, %v1399_v44  ;;  %v1400_v10 = vadd.f32 %v1375_v56, %v1234_v11  ;;  %v6010_v16 = vpop.f32.mrb[32].mxu0 }
 0x15b   :  { %1418 = vst.msk [vmem:[#allocation3 + $0x78] sm:$0xff] %vm441_vm5, %v1402_v45  ;;  %v1722_v63 = vpop.f32.mrb[33].mxu0 }
 0x15c   :  { %v5996_v3 = vpop.f32.mrb[20].mxu1  ;;  %1416 = vst.msk [vmem:[#allocation3 + $0x68] sm:$0xff] %vm441_vm5, %v1400_v10  ;;  %v6011_v27 = vpop.f32.mrb[34].mxu0 }
 0x15d   :  { %v1579_v19 = vadd.f32 %v5996_v3, %v1425_v13  ;;  %v1526_v54 = vpop.f32.mrb[21].mxu1  ;;  %v1725_v0 = vpop.f32.mrb[35].mxu0 }
 0x15e   :  { %v1577_v32 = vadd.f32 %v1526_v54, %v1423_v40  ;;  %v5997_v38 = vpop.f32.mrb[22].mxu1  ;;  %v1635_v37 = vld [vmem:[#allocation3 + $0x10] sm:$0xff] }
 0x15f   :  { %1595 = vst.msk [vmem:[#allocation3 + $0x30] sm:$0xff] %vm441_vm5, %v1579_v19  ;;  %v1580_v20 = vadd.f32 %v5997_v38, %v1426_v57  ;;  %v1529_v31 = vpop.f32.mrb[23].mxu1  ;;  %v1787_v23 = vadd.f32 %v6010_v16, %v1635_v37  ;;  %v1633_v6 = vld [vmem:[#allocation3] sm:$0xff] }
 0x160   :  { %1593 = vst.msk [vmem:[#allocation3 + $0x20] sm:$0xff] %vm441_vm5, %v1577_v32  ;;  %v1578_v43 = vadd.f32 %v1529_v31, %v1424_v14  ;;  %v1785_v58 = vadd.f32 %v1722_v63, %v1633_v6  ;;  %v1636_v61 = vld [vmem:[#allocation3 + $0x18] sm:$0xff]  ;;  %v1433_v5 = vld [vmem:[#allocation3 + $0x70] sm:$0xff] }
 0x161   :  { %1596 = vst.msk [vmem:[#allocation3 + $0x38] sm:$0xff] %vm441_vm5, %v1580_v20  ;;  %1803 = vst.msk [vmem:[#allocation3 + $0x10] sm:$0xff] %vm441_vm5, %v1787_v23  ;;  %v1788_v22 = vadd.f32 %v6011_v27, %v1636_v61  ;;  %v1634_v60 = vld [vmem:[#allocation3 + $0x8] sm:$0xff]  ;;  %v1431_v24 = vld [vmem:[#allocation3 + $0x60] sm:$0xff] }
 0x162   :  { %1594 = vst.msk [vmem:[#allocation3 + $0x28] sm:$0xff] %vm441_vm5, %v1578_v43  ;;  %1801 = vst.msk [vmem:[#allocation3] sm:$0xff] %vm441_vm5, %v1785_v58  ;;  %v1786_v25 = vadd.f32 %v1725_v0, %v1634_v60  ;;  %v1434_v49 = vld [vmem:[#allocation3 + $0x78] sm:$0xff] }
 0x163   :  { %1804 = vst.msk [vmem:[#allocation3 + $0x18] sm:$0xff] %vm441_vm5, %v1788_v22  ;;  %v1432_v29 = vld [vmem:[#allocation3 + $0x68] sm:$0xff] }
 0x164   :  { %v6000_v42 = vpop.f32.mrb[24].mxu1  ;;  %1802 = vst.msk [vmem:[#allocation3 + $0x8] sm:$0xff] %vm441_vm5, %v1786_v25 }
 0x165   :  { %v1583_v33 = vadd.f32 %v6000_v42, %v1429_v47  ;;  %v1542_v50 = vpop.f32.mrb[25].mxu1 }
 0x166   :  { %v1581_v28 = vadd.f32 %v1542_v50, %v1427_v55  ;;  %v6001_v52 = vpop.f32.mrb[26].mxu1  ;;  %v1639_v48 = vld [vmem:[#allocation3 + $0x30] sm:$0xff] }
 0x167   :  { %1599 = vst.msk [vmem:[#allocation3 + $0x50] sm:$0xff] %vm441_vm5, %v1583_v33  ;;  %v1584_v59 = vadd.f32 %v6001_v52, %v1430_v8  ;;  %v1545_v15 = vpop.f32.mrb[27].mxu1  ;;  %v1637_v26 = vld [vmem:[#allocation3 + $0x20] sm:$0xff] }
 0x168   :  { %v6014_v21 = vpop.f32.mrb[36].mxu0  ;;  %1597 = vst.msk [vmem:[#allocation3 + $0x40] sm:$0xff] %vm441_vm5, %v1581_v28  ;;  %v1582_v41 = vadd.f32 %v1545_v15, %v1428_v30  ;;  %v1640_v7 = vld [vmem:[#allocation3 + $0x38] sm:$0xff]  ;;  %v1829_v32 = vld [vmem:[#allocation3 + $0x10] sm:$0xff] }
 0x169   :  { %v1738_v9 = vpop.f32.mrb[37].mxu0  ;;  %v1791_v36 = vadd.f32 %v6014_v21, %v1639_v48  ;;  %1600 = vst.msk [vmem:[#allocation3 + $0x58] sm:$0xff] %vm441_vm5, %v1584_v59  ;;  %v1638_v56 = vld [vmem:[#allocation3 + $0x28] sm:$0xff]  ;;  %v1827_v37 = vld [vmem:[#allocation3] sm:$0xff] }
 0x16a   :  { %v6015_v53 = vpop.f32.mrb[38].mxu0  ;;  %v1789_v12 = vadd.f32 %v1738_v9, %v1637_v26  ;;  %1598 = vst.msk [vmem:[#allocation3 + $0x48] sm:$0xff] %vm441_vm5, %v1582_v41  ;;  %v1830_v31 = vld [vmem:[#allocation3 + $0x18] sm:$0xff] }
 0x16b   :  { %v1741_v35 = vpop.f32.mrb[39].mxu0  ;;  %1807 = vst.msk [vmem:[#allocation3 + $0x30] sm:$0xff] %vm441_vm5, %v1791_v36  ;;  %v1792_v39 = vadd.f32 %v6015_v53, %v1640_v7  ;;  %v1828_v43 = vld [vmem:[#allocation3 + $0x8] sm:$0xff]  ;;  %v3148_v7 = vld [vmem:[%s8848_s4] sm:$0xf] }
 0x16c   :  { %1805 = vst.msk [vmem:[#allocation3 + $0x20] sm:$0xff] %vm441_vm5, %v1789_v12  ;;  %v1790_v46 = vadd.f32 %v1741_v35, %v1638_v56  ;;  %v6004_v1 = vpop.f32.mrb[28].mxu1  ;;  %v5616_v35 = vld [vmem:[%s8848_s4 + $0x4] sm:$0xf]  ;;  %6267 = vmatprep.subr.msk.bf16.mxu1 %vm3213_vm0, %v3148_v7 }
 0x16d   :  { %1808 = vst.msk [vmem:[#allocation3 + $0x38] sm:$0xff] %vm441_vm5, %v1792_v39  ;;  %v1587_v62 = vadd.f32 %v6004_v1, %v1433_v5  ;;  %v1558_v51 = vpop.f32.mrb[29].mxu1  ;;  %6268 = vmatprep.subr.msk.bf16.mxu0 %vm3213_vm0, %v5616_v35  ;;  %v3637_v1 = vsel %vm3213_vm0, %v5616_v35, 0 }
 0x16e   :  { %1806 = vst.msk [vmem:[#allocation3 + $0x28] sm:$0xff] %vm441_vm5, %v1790_v46  ;;  %v1585_v18 = vadd.f32 %v1558_v51, %v1431_v24  ;;  %v6005_v45 = vpop.f32.mrb[30].mxu1  ;;  %v1643_v11 = vld [vmem:[#allocation3 + $0x50] sm:$0xff]  ;;  %v3215_v24 = vsel %vm3213_vm0, %v3148_v7, 0  ;;  %6115 = vmatpush3.bf16.msra.mxu0 %v3637_v1 }
 0x16f   :  { %1603 = vst.msk [vmem:[#allocation3 + $0x70] sm:$0xff] %vm441_vm5, %v1587_v62  ;;  %v1588_v10 = vadd.f32 %v6005_v45, %v1434_v49  ;;  %v1561_v16 = vpop.f32.mrb[31].mxu1  ;;  %v1641_v63 = vld [vmem:[#allocation3 + $0x40] sm:$0xff]  ;;  %6097 = vmatpush3.bf16.msra.mxu1 %v3215_v24 }
 0x170   :  { %v6018_v44 = vpop.f32.mrb[40].mxu0  ;;  %1601 = vst.msk [vmem:[#allocation3 + $0x60] sm:$0xff] %vm441_vm5, %v1585_v18  ;;  %v1586_v57 = vadd.f32 %v1561_v16, %v1432_v29  ;;  %v1644_v19 = vld [vmem:[#allocation3 + $0x58] sm:$0xff] }
 0x171   :  { %v1754_v13 = vpop.f32.mrb[41].mxu0  ;;  %v1795_v40 = vadd.f32 %v6018_v44, %v1643_v11  ;;  %1604 = vst.msk [vmem:[#allocation3 + $0x78] sm:$0xff] %vm441_vm5, %v1588_v10  ;;  %v1642_v0 = vld [vmem:[#allocation3 + $0x48] sm:$0xff] }
 0x172   :  { %v6019_v3 = vpop.f32.mrb[42].mxu0  ;;  %v1793_v27 = vadd.f32 %v1754_v13, %v1641_v63  ;;  %1602 = vst.msk [vmem:[#allocation3 + $0x68] sm:$0xff] %vm441_vm5, %v1586_v57  ;;  %v1833_v9 = vld [vmem:[#allocation3 + $0x30] sm:$0xff] }
 0x173   :  { %v1757_v54 = vpop.f32.mrb[43].mxu0  ;;  %1811 = vst.msk [vmem:[#allocation3 + $0x50] sm:$0xff] %vm441_vm5, %v1795_v40  ;;  %v1796_v14 = vadd.f32 %v6019_v3, %v1644_v19  ;;  %v1831_v15 = vld [vmem:[#allocation3 + $0x20] sm:$0xff] }
 0x174   :  { %1809 = vst.msk [vmem:[#allocation3 + $0x40] sm:$0xff] %vm441_vm5, %v1793_v27  ;;  %v1794_v38 = vadd.f32 %v1757_v54, %v1642_v0  ;;  %v6028_v20 = vpop.f32.mrb[32].mxu1  ;;  %v1834_v26 = vld [vmem:[#allocation3 + $0x38] sm:$0xff] }
 0x175   :  { %1812 = vst.msk [vmem:[#allocation3 + $0x58] sm:$0xff] %vm441_vm5, %v1796_v14  ;;  %v1981_v23 = vadd.f32 %v6028_v20, %v1829_v32  ;;  %v1916_v6 = vpop.f32.mrb[33].mxu1  ;;  %v1832_v53 = vld [vmem:[#allocation3 + $0x28] sm:$0xff] }
 0x176   :  { %1810 = vst.msk [vmem:[#allocation3 + $0x48] sm:$0xff] %vm441_vm5, %v1794_v38  ;;  %v1979_v58 = vadd.f32 %v1916_v6, %v1827_v37  ;;  %v6029_v61 = vpop.f32.mrb[34].mxu1  ;;  %v1647_v22 = vld [vmem:[#allocation3 + $0x70] sm:$0xff] }
 0x177   :  { %1997 = vst.msk [vmem:[#allocation3 + $0x10] sm:$0xff] %vm441_vm5, %v1981_v23  ;;  %v1982_v47 = vadd.f32 %v6029_v61, %v1830_v31  ;;  %v1919_v25 = vpop.f32.mrb[35].mxu1  ;;  %v1645_v42 = vld [vmem:[#allocation3 + $0x60] sm:$0xff] }
 0x178   :  { %v6022_v60 = vpop.f32.mrb[44].mxu0  ;;  %1995 = vst.msk [vmem:[#allocation3] sm:$0xff] %vm441_vm5, %v1979_v58  ;;  %v1980_v33 = vadd.f32 %v1919_v25, %v1828_v43  ;;  %v1648_v30 = vld [vmem:[#allocation3 + $0x78] sm:$0xff] }
 0x179   :  { %v1799_v55 = vadd.f32 %v6022_v60, %v1647_v22  ;;  %v1770_v8 = vpop.f32.mrb[45].mxu0  ;;  %1998 = vst.msk [vmem:[#allocation3 + $0x18] sm:$0xff] %vm441_vm5, %v1982_v47  ;;  %v1646_v52 = vld [vmem:[#allocation3 + $0x68] sm:$0xff] }
 0x17a   :  { %v1797_v50 = vadd.f32 %v1770_v8, %v1645_v42  ;;  %v6023_v21 = vpop.f32.mrb[46].mxu0  ;;  %1996 = vst.msk [vmem:[#allocation3 + $0x8] sm:$0xff] %vm441_vm5, %v1980_v33  ;;  %v1837_v63 = vld [vmem:[#allocation3 + $0x50] sm:$0xff] }
 0x17b   :  { %1815 = vst.msk [vmem:[#allocation3 + $0x70] sm:$0xff] %vm441_vm5, %v1799_v55  ;;  %v1800_v28 = vadd.f32 %v6023_v21, %v1648_v30  ;;  %v1773_v48 = vpop.f32.mrb[47].mxu0  ;;  %v1835_v57 = vld [vmem:[#allocation3 + $0x40] sm:$0xff] }
 0x17c   :  { %1813 = vst.msk [vmem:[#allocation3 + $0x60] sm:$0xff] %vm441_vm5, %v1797_v50  ;;  %v1798_v59 = vadd.f32 %v1773_v48, %v1646_v52  ;;  %v6032_v36 = vpop.f32.mrb[36].mxu1  ;;  %v1838_v19 = vld [vmem:[#allocation3 + $0x58] sm:$0xff]  ;;  %v7438_v50 = vld [vmem:[%s8848_s4 + $0x8] sm:$0xf] }
 0x17d   :  { %1816 = vst.msk [vmem:[#allocation3 + $0x78] sm:$0xff] %vm441_vm5, %v1800_v28  ;;  %v1985_v41 = vadd.f32 %v6032_v36, %v1833_v9  ;;  %v1932_v12 = vpop.f32.mrb[37].mxu1  ;;  %v1836_v0 = vld [vmem:[#allocation3 + $0x48] sm:$0xff]  ;;  %6269 = vmatprep.subr.msk.bf16.mxu1 %vm3213_vm0, %v7438_v50 }
 0x17e   :  { %1814 = vst.msk [vmem:[#allocation3 + $0x68] sm:$0xff] %vm441_vm5, %v1798_v59  ;;  %v1983_v39 = vadd.f32 %v1932_v12, %v1831_v15  ;;  %v6033_v56 = vpop.f32.mrb[38].mxu1  ;;  %v2013_v5 = vld [vmem:[#allocation3 + $0x10] sm:$0xff] }
 0x17f   :  { %2001 = vst.msk [vmem:[#allocation3 + $0x30] sm:$0xff] %vm441_vm5, %v1985_v41  ;;  %v1986_v49 = vadd.f32 %v6033_v56, %v1834_v26  ;;  %v1935_v62 = vpop.f32.mrb[39].mxu1  ;;  %v2011_v29 = vld [vmem:[#allocation3] sm:$0xff] }
 0x180   :  { %v6046_v46 = vpop.f32.mrb[48].mxu0  ;;  %1999 = vst.msk [vmem:[#allocation3 + $0x20] sm:$0xff] %vm441_vm5, %v1983_v39  ;;  %v1984_v18 = vadd.f32 %v1935_v62, %v1832_v53  ;;  %v2014_v11 = vld [vmem:[#allocation3 + $0x18] sm:$0xff] }
 0x181   :  { %v2143_v51 = vadd.f32 %v6046_v46, %v2013_v5  ;;  %v2078_v44 = vpop.f32.mrb[49].mxu0  ;;  %2002 = vst.msk [vmem:[#allocation3 + $0x38] sm:$0xff] %vm441_vm5, %v1986_v49  ;;  %v2012_v16 = vld [vmem:[#allocation3 + $0x8] sm:$0xff] }
 0x182   :  { %v2141_v45 = vadd.f32 %v2078_v44, %v2011_v29  ;;  %v6047_v13 = vpop.f32.mrb[50].mxu0  ;;  %2000 = vst.msk [vmem:[#allocation3 + $0x28] sm:$0xff] %vm441_vm5, %v1984_v18  ;;  %v1841_v8 = vld [vmem:[#allocation3 + $0x70] sm:$0xff] }
 0x183   :  { %2159 = vst.msk [vmem:[#allocation3 + $0x10] sm:$0xff] %vm441_vm5, %v2143_v51  ;;  %v2144_v10 = vadd.f32 %v6047_v13, %v2014_v11  ;;  %v2081_v40 = vpop.f32.mrb[51].mxu0  ;;  %v1839_v30 = vld [vmem:[#allocation3 + $0x60] sm:$0xff] }
 0x184   :  { %2157 = vst.msk [vmem:[#allocation3] sm:$0xff] %vm441_vm5, %v2141_v45  ;;  %v2142_v3 = vadd.f32 %v2081_v40, %v2012_v16  ;;  %v6036_v27 = vpop.f32.mrb[40].mxu1  ;;  %v1842_v28 = vld [vmem:[#allocation3 + $0x78] sm:$0xff] }
 0x185   :  { %2160 = vst.msk [vmem:[#allocation3 + $0x18] sm:$0xff] %vm441_vm5, %v2144_v10  ;;  %v1989_v54 = vadd.f32 %v6036_v27, %v1837_v63  ;;  %v1948_v14 = vpop.f32.mrb[41].mxu1  ;;  %v1840_v9 = vld [vmem:[#allocation3 + $0x68] sm:$0xff] }
 0x186   :  { %2158 = vst.msk [vmem:[#allocation3 + $0x8] sm:$0xff] %vm441_vm5, %v2142_v3  ;;  %v1987_v32 = vadd.f32 %v1948_v14, %v1835_v57  ;;  %v6037_v38 = vpop.f32.mrb[42].mxu1  ;;  %v2017_v37 = vld [vmem:[#allocation3 + $0x30] sm:$0xff] }
 0x187   :  { %2005 = vst.msk [vmem:[#allocation3 + $0x50] sm:$0xff] %vm441_vm5, %v1989_v54  ;;  %v1990_v31 = vadd.f32 %v6037_v38, %v1838_v19  ;;  %v1951_v23 = vpop.f32.mrb[43].mxu1  ;;  %v2015_v43 = vld [vmem:[#allocation3 + $0x20] sm:$0xff] }
 0x188   :  { %v6050_v20 = vpop.f32.mrb[52].mxu0  ;;  %2003 = vst.msk [vmem:[#allocation3 + $0x40] sm:$0xff] %vm441_vm5, %v1987_v32  ;;  %v1988_v61 = vadd.f32 %v1951_v23, %v1836_v0  ;;  %v2018_v60 = vld [vmem:[#allocation3 + $0x38] sm:$0xff] }
 0x189   :  { %v2147_v6 = vadd.f32 %v6050_v20, %v2017_v37  ;;  %v2094_v58 = vpop.f32.mrb[53].mxu0  ;;  %2006 = vst.msk [vmem:[#allocation3 + $0x58] sm:$0xff] %vm441_vm5, %v1990_v31  ;;  %v2016_v55 = vld [vmem:[#allocation3 + $0x28] sm:$0xff] }
 0x18a   :  { %v2145_v22 = vadd.f32 %v2094_v58, %v2015_v43  ;;  %v6051_v47 = vpop.f32.mrb[54].mxu0  ;;  %2004 = vst.msk [vmem:[#allocation3 + $0x48] sm:$0xff] %vm441_vm5, %v1988_v61  ;;  %v2203_v62 = vld [vmem:[#allocation3 + $0x10] sm:$0xff] }
 0x18b   :  { %2163 = vst.msk [vmem:[#allocation3 + $0x30] sm:$0xff] %vm441_vm5, %v2147_v6  ;;  %v2148_v25 = vadd.f32 %v6051_v47, %v2018_v60  ;;  %v2097_v42 = vpop.f32.mrb[55].mxu0  ;;  %v2201_v29 = vld [vmem:[#allocation3] sm:$0xff] }
 0x18c   :  { %2161 = vst.msk [vmem:[#allocation3 + $0x20] sm:$0xff] %vm441_vm5, %v2145_v22  ;;  %v2146_v33 = vadd.f32 %v2097_v42, %v2016_v55  ;;  %v6040_v21 = vpop.f32.mrb[44].mxu1  ;;  %v2204_v18 = vld [vmem:[#allocation3 + $0x18] sm:$0xff] }
 0x18d   :  { %2164 = vst.msk [vmem:[#allocation3 + $0x38] sm:$0xff] %vm441_vm5, %v2148_v25  ;;  %v1993_v52 = vadd.f32 %v6040_v21, %v1841_v8  ;;  %v1964_v48 = vpop.f32.mrb[45].mxu1  ;;  %v2202_v13 = vld [vmem:[#allocation3 + $0x8] sm:$0xff] }
 0x18e   :  { %2162 = vst.msk [vmem:[#allocation3 + $0x28] sm:$0xff] %vm441_vm5, %v2146_v33  ;;  %v1991_v59 = vadd.f32 %v1964_v48, %v1839_v30  ;;  %v6041_v15 = vpop.f32.mrb[46].mxu1  ;;  %v2021_v36 = vld [vmem:[#allocation3 + $0x50] sm:$0xff] }
 0x18f   :  { %2009 = vst.msk [vmem:[#allocation3 + $0x70] sm:$0xff] %vm441_vm5, %v1993_v52  ;;  %v1994_v53 = vadd.f32 %v6041_v15, %v1842_v28  ;;  %v1967_v41 = vpop.f32.mrb[47].mxu1  ;;  %v2019_v7 = vld [vmem:[#allocation3 + $0x40] sm:$0xff] }
 0x190   :  { %v6054_v26 = vpop.f32.mrb[56].mxu0  ;;  %2007 = vst.msk [vmem:[#allocation3 + $0x60] sm:$0xff] %vm441_vm5, %v1991_v59  ;;  %v1992_v39 = vadd.f32 %v1967_v41, %v1840_v9  ;;  %v2022_v5 = vld [vmem:[#allocation3 + $0x58] sm:$0xff] }
 0x191   :  { %v2151_v12 = vadd.f32 %v6054_v26, %v2021_v36  ;;  %v2110_v35 = vpop.f32.mrb[57].mxu0  ;;  %2010 = vst.msk [vmem:[#allocation3 + $0x78] sm:$0xff] %vm441_vm5, %v1994_v53  ;;  %v2020_v1 = vld [vmem:[#allocation3 + $0x48] sm:$0xff] }
 0x192   :  { %v2149_v56 = vadd.f32 %v2110_v35, %v2019_v7  ;;  %v6055_v46 = vpop.f32.mrb[58].mxu0  ;;  %2008 = vst.msk [vmem:[#allocation3 + $0x68] sm:$0xff] %vm441_vm5, %v1992_v39  ;;  %v2207_v23 = vld [vmem:[#allocation3 + $0x30] sm:$0xff] }
 0x193   :  { %2167 = vst.msk [vmem:[#allocation3 + $0x50] sm:$0xff] %vm441_vm5, %v2151_v12  ;;  %v2152_v24 = vadd.f32 %v6055_v46, %v2022_v5  ;;  %v2113_v49 = vpop.f32.mrb[59].mxu0  ;;  %v2205_v43 = vld [vmem:[#allocation3 + $0x20] sm:$0xff] }
 0x194   :  { %2165 = vst.msk [vmem:[#allocation3 + $0x40] sm:$0xff] %vm441_vm5, %v2149_v56  ;;  %v2150_v51 = vadd.f32 %v2113_v49, %v2020_v1  ;;  %v6064_v44 = vpop.f32.mrb[48].mxu1  ;;  %v2208_v61 = vld [vmem:[#allocation3 + $0x38] sm:$0xff] }
 0x195   :  { %2168 = vst.msk [vmem:[#allocation3 + $0x58] sm:$0xff] %vm441_vm5, %v2152_v24  ;;  %v2331_v45 = vadd.f32 %v6064_v44, %v2203_v62  ;;  %v2266_v11 = vpop.f32.mrb[49].mxu1  ;;  %v2206_v47 = vld [vmem:[#allocation3 + $0x28] sm:$0xff] }
 0x196   :  { %2166 = vst.msk [vmem:[#allocation3 + $0x48] sm:$0xff] %vm441_vm5, %v2150_v51  ;;  %v2329_v10 = vadd.f32 %v2266_v11, %v2201_v29  ;;  %v6065_v16 = vpop.f32.mrb[50].mxu1  ;;  %v2025_v40 = vld [vmem:[#allocation3 + $0x70] sm:$0xff] }
 0x197   :  { %2347 = vst.msk [vmem:[#allocation3 + $0x10] sm:$0xff] %vm441_vm5, %v2331_v45  ;;  %v2332_v3 = vadd.f32 %v6065_v16, %v2204_v18  ;;  %v2269_v57 = vpop.f32.mrb[51].mxu1  ;;  %v2023_v19 = vld [vmem:[#allocation3 + $0x60] sm:$0xff] }
 0x198   :  { %v6058_v63 = vpop.f32.mrb[60].mxu0  ;;  %2345 = vst.msk [vmem:[#allocation3] sm:$0xff] %vm441_vm5, %v2329_v10  ;;  %v2330_v14 = vadd.f32 %v2269_v57, %v2202_v13  ;;  %v2026_v32 = vld [vmem:[#allocation3 + $0x78] sm:$0xff] }
 0x199   :  { %v2155_v27 = vadd.f32 %v6058_v63, %v2025_v40  ;;  %v2126_v54 = vpop.f32.mrb[61].mxu0  ;;  %2348 = vst.msk [vmem:[#allocation3 + $0x18] sm:$0xff] %vm441_vm5, %v2332_v3  ;;  %v2024_v20 = vld [vmem:[#allocation3 + $0x68] sm:$0xff] }
 0x19a   :  { %v2153_v0 = vadd.f32 %v2126_v54, %v2023_v19  ;;  %v6059_v38 = vpop.f32.mrb[62].mxu0  ;;  %2346 = vst.msk [vmem:[#allocation3 + $0x8] sm:$0xff] %vm441_vm5, %v2330_v14  ;;  %v2211_v41 = vld [vmem:[#allocation3 + $0x50] sm:$0xff] }
 0x19b   :  { %2171 = vst.msk [vmem:[#allocation3 + $0x70] sm:$0xff] %vm441_vm5, %v2155_v27  ;;  %v2156_v37 = vadd.f32 %v6059_v38, %v2026_v32  ;;  %v2129_v31 = vpop.f32.mrb[63].mxu0  ;;  %v2209_v7 = vld [vmem:[#allocation3 + $0x40] sm:$0xff] }
 0x19c   :  { %2169 = vst.msk [vmem:[#allocation3 + $0x60] sm:$0xff] %vm441_vm5, %v2153_v0  ;;  %v2154_v6 = vadd.f32 %v2129_v31, %v2024_v20  ;;  %v6068_v58 = vpop.f32.mrb[52].mxu1  ;;  %v2212_v39 = vld [vmem:[#allocation3 + $0x58] sm:$0xff] }
 0x19d   :  { %2172 = vst.msk [vmem:[#allocation3 + $0x78] sm:$0xff] %vm441_vm5, %v2156_v37  ;;  %v2335_v22 = vadd.f32 %v6068_v58, %v2207_v23  ;;  %v2282_v60 = vpop.f32.mrb[53].mxu1  ;;  %v2210_v46 = vld [vmem:[#allocation3 + $0x48] sm:$0xff] }
 0x19e   :  { %2170 = vst.msk [vmem:[#allocation3 + $0x68] sm:$0xff] %vm441_vm5, %v2154_v6  ;;  %v2333_v25 = vadd.f32 %v2282_v60, %v2205_v43  ;;  %v6069_v55 = vpop.f32.mrb[54].mxu1  ;;  %v2373_v42 = vld [vmem:[#allocation3 + $0x10] sm:$0xff] }
 0x19f   :  { %2351 = vst.msk [vmem:[#allocation3 + $0x30] sm:$0xff] %vm441_vm5, %v2335_v22  ;;  %v2336_v33 = vadd.f32 %v6069_v55, %v2208_v61  ;;  %v2285_v30 = vpop.f32.mrb[55].mxu1  ;;  %v2371_v28 = vld [vmem:[#allocation3] sm:$0xff] }
 0x1a0   :  { %v6082_v8 = vpop.f32.mrb[64].mxu0  ;;  %2349 = vst.msk [vmem:[#allocation3 + $0x20] sm:$0xff] %vm441_vm5, %v2333_v25  ;;  %v2334_v48 = vadd.f32 %v2285_v30, %v2206_v47  ;;  %v2374_v59 = vld [vmem:[#allocation3 + $0x18] sm:$0xff] }
 0x1a1   :  { %v2501_v21 = vadd.f32 %v6082_v8, %v2373_v42  ;;  %v2436_v52 = vpop.f32.mrb[65].mxu0  ;;  %2352 = vst.msk [vmem:[#allocation3 + $0x38] sm:$0xff] %vm441_vm5, %v2336_v33  ;;  %v2372_v26 = vld [vmem:[#allocation3 + $0x8] sm:$0xff] }
 0x1a2   :  { %v2499_v9 = vadd.f32 %v2436_v52, %v2371_v28  ;;  %v6083_v15 = vpop.f32.mrb[66].mxu0  ;;  %2350 = vst.msk [vmem:[#allocation3 + $0x28] sm:$0xff] %vm441_vm5, %v2334_v48  ;;  %v2215_v54 = vld [vmem:[#allocation3 + $0x70] sm:$0xff] }
 0x1a3   :  { %2517 = vst.msk [vmem:[#allocation3 + $0x10] sm:$0xff] %vm441_vm5, %v2501_v21  ;;  %v2502_v36 = vadd.f32 %v6083_v15, %v2374_v59  ;;  %v2439_v53 = vpop.f32.mrb[67].mxu0  ;;  %v2213_v32 = vld [vmem:[#allocation3 + $0x60] sm:$0xff] }
 0x1a4   :  { %2515 = vst.msk [vmem:[#allocation3] sm:$0xff] %vm441_vm5, %v2499_v9  ;;  %v2500_v12 = vadd.f32 %v2439_v53, %v2372_v26  ;;  %v6072_v35 = vpop.f32.mrb[56].mxu1  ;;  %v2216_v43 = vld [vmem:[#allocation3 + $0x78] sm:$0xff] }
 0x1a5   :  { %2518 = vst.msk [vmem:[#allocation3 + $0x18] sm:$0xff] %vm441_vm5, %v2502_v36  ;;  %v2339_v56 = vadd.f32 %v6072_v35, %v2211_v41  ;;  %v2298_v5 = vpop.f32.mrb[57].mxu1  ;;  %v2214_v47 = vld [vmem:[#allocation3 + $0x68] sm:$0xff] }
 0x1a6   :  { %2516 = vst.msk [vmem:[#allocation3 + $0x8] sm:$0xff] %vm441_vm5, %v2500_v12  ;;  %v2337_v24 = vadd.f32 %v2298_v5, %v2209_v7  ;;  %v6073_v1 = vpop.f32.mrb[58].mxu1  ;;  %v2377_v49 = vld [vmem:[#allocation3 + $0x30] sm:$0xff] }
 0x1a7   :  { %2355 = vst.msk [vmem:[#allocation3 + $0x50] sm:$0xff] %vm441_vm5, %v2339_v56  ;;  %v2340_v51 = vadd.f32 %v6073_v1, %v2212_v39  ;;  %v2301_v29 = vpop.f32.mrb[59].mxu1  ;;  %v2375_v18 = vld [vmem:[#allocation3 + $0x20] sm:$0xff] }
 0x1a8   :  { %v6086_v62 = vpop.f32.mrb[68].mxu0  ;;  %2353 = vst.msk [vmem:[#allocation3 + $0x40] sm:$0xff] %vm441_vm5, %v2337_v24  ;;  %v2338_v11 = vadd.f32 %v2301_v29, %v2210_v46  ;;  %v2378_v16 = vld [vmem:[#allocation3 + $0x38] sm:$0xff] }
 0x1a9   :  { %v2505_v44 = vadd.f32 %v6086_v62, %v2377_v49  ;;  %v2452_v45 = vpop.f32.mrb[69].mxu0  ;;  %2356 = vst.msk [vmem:[#allocation3 + $0x58] sm:$0xff] %vm441_vm5, %v2340_v51  ;;  %v2376_v57 = vld [vmem:[#allocation3 + $0x28] sm:$0xff] }
 0x1aa   :  { %v7470_v13 = vld [vmem:[#allocation3 + $0x10] sm:$0xff]  ;;  %v2503_v10 = vadd.f32 %v2452_v45, %v2375_v18  ;;  %v6087_v40 = vpop.f32.mrb[70].mxu0  ;;  %2354 = vst.msk [vmem:[#allocation3 + $0x48] sm:$0xff] %vm441_vm5, %v2338_v11 }
 0x1ab   :  { %3078 = vst.msk [vmem:[#allocation3 + $0x10] sm:$0xff] %vm441_vm5, %v6324_v2  ;;  %v7475_v63 = vld [vmem:[#allocation3] sm:$0xff]  ;;  %2521 = vst.msk [vmem:[#allocation3 + $0x30] sm:$0xff] %vm441_vm5, %v2505_v44  ;;  %v2506_v3 = vadd.f32 %v6087_v40, %v2378_v16  ;;  %v2455_v27 = vpop.f32.mrb[71].mxu0  ;;  %v2588_v37 = vmul.f32 %v7470_v13, %v7470_v13  ;;  %v2552_v25 = vsel %vm441_vm5, %v7470_v13, 0.0 }
 0x1ac   :  { %v2586_v19 = vmul.f32 %v7475_v63, %v7475_v63  ;;  %3076 = vst.msk [vmem:[#allocation3] sm:$0xff] %vm441_vm5, %v6324_v2  ;;  %v7483_v14 = vld [vmem:[#allocation3 + $0x18] sm:$0xff]  ;;  %2519 = vst.msk [vmem:[#allocation3 + $0x20] sm:$0xff] %vm441_vm5, %v2503_v10  ;;  %v2504_v0 = vadd.f32 %v2455_v27, %v2376_v57  ;;  %v2549_v20 = vsel %vm441_vm5, %v7475_v63, 0.0  ;;  %v6076_v31 = vpop.f32.mrb[60].mxu1 }
 0x1ad   :  { %3079 = vst.msk [vmem:[#allocation3 + $0x18] sm:$0xff] %vm441_vm5, %v6324_v2  ;;  %v7488_v38 = vld [vmem:[#allocation3 + $0x8] sm:$0xff]  ;;  %2522 = vst.msk [vmem:[#allocation3 + $0x38] sm:$0xff] %vm441_vm5, %v2506_v3  ;;  %v2343_v58 = vadd.f32 %v6076_v31, %v2215_v54  ;;  %v2589_v61 = vmul.f32 %v7483_v14, %v7483_v14  ;;  %v2314_v22 = vpop.f32.mrb[61].mxu1  ;;  %v2605_v26 = vsel %vm441_vm5, %v2588_v37, 0.0  ;;  %v2554_v53 = vsel %vm441_vm5, %v7483_v14, 0.0 }
 0x1ae   :  { %v2550_v23 = vsel %vm441_vm5, %v7488_v38, 0.0  ;;  %v2587_v6 = vmul.f32 %v7488_v38, %v7488_v38  ;;  %3077 = vst.msk [vmem:[#allocation3 + $0x8] sm:$0xff] %vm441_vm5, %v6324_v2  ;;  %2520 = vst.msk [vmem:[#allocation3 + $0x28] sm:$0xff] %vm441_vm5, %v2504_v0  ;;  %v2602_v55 = vsel %vm441_vm5, %v2586_v19, 0.0  ;;  %v2341_v42 = vadd.f32 %v2314_v22, %v2213_v32  ;;  %v6077_v33 = vpop.f32.mrb[62].mxu1  ;;  %v2381_v30 = vld [vmem:[#allocation3 + $0x50] sm:$0xff] }
 0x1af   :  { %v2551_v60 = vadd.f32 %v2550_v23, %v2549_v20  ;;  %2359 = vst.msk [vmem:[#allocation3 + $0x70] sm:$0xff] %vm441_vm5, %v2343_v58  ;;  %v2344_v48 = vadd.f32 %v6077_v33, %v2216_v43  ;;  %v2317_v9 = vpop.f32.mrb[63].mxu1  ;;  %v2379_v15 = vld [vmem:[#allocation3 + $0x40] sm:$0xff]  ;;  %v2607_v39 = vsel %vm441_vm5, %v2589_v61, 0.0  ;;  %v7550_v27 = vld [vmem:[%s8848_s4 + $0xc] sm:$0xf] }
 0x1b0   :  { %v2603_v8 = vsel %vm441_vm5, %v2587_v6, 0.0  ;;  %v6090_v21 = vpop.f32.mrb[72].mxu0  ;;  %2357 = vst.msk [vmem:[#allocation3 + $0x60] sm:$0xff] %vm441_vm5, %v2341_v42  ;;  %v2342_v41 = vadd.f32 %v2317_v9, %v2214_v47  ;;  %v2382_v24 = vld [vmem:[#allocation3 + $0x58] sm:$0xff]  ;;  %6270 = vmatprep.subr.msk.bf16.mxu0 %vm3213_vm0, %v7550_v27 }
 0x1b1   :  { %v2553_v28 = vadd.f32 %v2552_v25, %v2551_v60  ;;  %v2604_v52 = vadd.f32 %v2603_v8, %v2602_v55  ;;  %v2509_v59 = vadd.f32 %v6090_v21, %v2381_v30  ;;  %v2468_v36 = vpop.f32.mrb[73].mxu0  ;;  %2360 = vst.msk [vmem:[#allocation3 + $0x78] sm:$0xff] %vm441_vm5, %v2344_v48  ;;  %v2380_v1 = vld [vmem:[#allocation3 + $0x48] sm:$0xff] }
 0x1b2   :  { %v7513_v12 = vld [vmem:[#allocation3 + $0x30] sm:$0xff]  ;;  %v2507_v7 = vadd.f32 %v2468_v36, %v2379_v15  ;;  %v6091_v35 = vpop.f32.mrb[74].mxu0  ;;  %2358 = vst.msk [vmem:[#allocation3 + $0x68] sm:$0xff] %vm441_vm5, %v2342_v41 }
 0x1b3   :  { %v2606_v56 = vadd.f32 %v2605_v26, %v2604_v52  ;;  %3082 = vst.msk [vmem:[#allocation3 + $0x30] sm:$0xff] %vm441_vm5, %v6324_v2  ;;  %v7519_v5 = vld [vmem:[#allocation3 + $0x20] sm:$0xff]  ;;  %v2555_v46 = vadd.f32 %v2554_v53, %v2553_v28  ;;  %2525 = vst.msk [vmem:[#allocation3 + $0x50] sm:$0xff] %vm441_vm5, %v2509_v59  ;;  %v2471_v49 = vpop.f32.mrb[75].mxu0  ;;  %v2510_v44 = vadd.f32 %v6091_v35, %v2382_v24  ;;  %v2560_v32 = vsel %vm441_vm5, %v7513_v12, 0.0 }
 0x1b4   :  { %v2556_v62 = vsel %vm441_vm5, %v7519_v5, 0.0  ;;  %v2590_v51 = vmul.f32 %v7519_v5, %v7519_v5  ;;  %3080 = vst.msk [vmem:[#allocation3 + $0x20] sm:$0xff] %vm441_vm5, %v6324_v2  ;;  %v7529_v29 = vld [vmem:[#allocation3 + $0x38] sm:$0xff]  ;;  %2523 = vst.msk [vmem:[#allocation3 + $0x40] sm:$0xff] %vm441_vm5, %v2507_v7  ;;  %v2508_v18 = vadd.f32 %v2471_v49, %v2380_v1  ;;  %v2592_v16 = vmul.f32 %v7513_v12, %v7513_v12 }
 0x1b5   :  { %v2557_v45 = vadd.f32 %v2556_v62, %v2555_v46  ;;  %v2608_v11 = vadd.f32 %v2607_v39, %v2606_v56  ;;  %3083 = vst.msk [vmem:[#allocation3 + $0x38] sm:$0xff] %vm441_vm5, %v6324_v2  ;;  %v7534_v10 = vld [vmem:[#allocation3 + $0x28] sm:$0xff]  ;;  %2526 = vst.msk [vmem:[#allocation3 + $0x58] sm:$0xff] %vm441_vm5, %v2510_v44  ;;  %v2593_v54 = vmul.f32 %v7529_v29, %v7529_v29  ;;  %v2562_v60 = vsel %vm441_vm5, %v7529_v29, 0.0 }
 0x1b6   :  { %v2609_v40 = vsel %vm441_vm5, %v2590_v51, 0.0  ;;  %v2558_v3 = vsel %vm441_vm5, %v7534_v10, 0.0  ;;  %v2591_v57 = vmul.f32 %v7534_v10, %v7534_v10  ;;  %3081 = vst.msk [vmem:[#allocation3 + $0x28] sm:$0xff] %vm441_vm5, %v6324_v2  ;;  %2524 = vst.msk [vmem:[#allocation3 + $0x48] sm:$0xff] %vm441_vm5, %v2508_v18  ;;  %v2385_v20 = vld [vmem:[#allocation3 + $0x70] sm:$0xff]  ;;  %v2613_v22 = vsel %vm441_vm5, %v2592_v16, 0.0 }
 0x1b7   :  { %v2610_v19 = vadd.f32 %v2609_v40, %v2608_v11  ;;  %v2559_v0 = vadd.f32 %v2558_v3, %v2557_v45  ;;  %v2383_v58 = vld [vmem:[#allocation3 + $0x60] sm:$0xff]  ;;  %v2615_v42 = vsel %vm441_vm5, %v2593_v54, 0.0 }
 0x1b8   :  { %v2611_v37 = vsel %vm441_vm5, %v2591_v57, 0.0  ;;  %v6094_v31 = vpop.f32.mrb[76].mxu0  ;;  %v2386_v21 = vld [vmem:[#allocation3 + $0x78] sm:$0xff] }
 0x1b9   :  { %v2561_v23 = vadd.f32 %v2560_v32, %v2559_v0  ;;  %v2612_v6 = vadd.f32 %v2611_v37, %v2610_v19  ;;  %v2513_v43 = vadd.f32 %v6094_v31, %v2385_v20  ;;  %v2484_v61 = vpop.f32.mrb[77].mxu0  ;;  %v2384_v28 = vld [vmem:[#allocation3 + $0x68] sm:$0xff] }
 0x1ba   :  { %v7562_v47 = vld [vmem:[#allocation3 + $0x50] sm:$0xff]  ;;  %v2511_v25 = vadd.f32 %v2484_v61, %v2383_v58  ;;  %v6095_v55 = vpop.f32.mrb[78].mxu0 }
 0x1bb   :  { %v2614_v8 = vadd.f32 %v2613_v22, %v2612_v6  ;;  %3086 = vst.msk [vmem:[#allocation3 + $0x50] sm:$0xff] %vm441_vm5, %v6324_v2  ;;  %v7567_v33 = vld [vmem:[#allocation3 + $0x40] sm:$0xff]  ;;  %v2563_v30 = vadd.f32 %v2562_v60, %v2561_v23  ;;  %2529 = vst.msk [vmem:[#allocation3 + $0x70] sm:$0xff] %vm441_vm5, %v2513_v43  ;;  %v2487_v52 = vpop.f32.mrb[79].mxu0  ;;  %v2514_v59 = vadd.f32 %v6095_v55, %v2386_v21  ;;  %v2568_v1 = vsel %vm441_vm5, %v7562_v47, 0.0 }
 0x1bc   :  { %v2564_v48 = vsel %vm441_vm5, %v7567_v33, 0.0  ;;  %v2594_v9 = vmul.f32 %v7567_v33, %v7567_v33  ;;  %3084 = vst.msk [vmem:[#allocation3 + $0x40] sm:$0xff] %vm441_vm5, %v6324_v2  ;;  %2527 = vst.msk [vmem:[#allocation3 + $0x60] sm:$0xff] %vm441_vm5, %v2511_v25  ;;  %v2512_v15 = vadd.f32 %v2487_v52, %v2384_v28  ;;  %v7577_v53 = vld [vmem:[#allocation3 + $0x58] sm:$0xff]  ;;  %v2596_v39 = vmul.f32 %v7562_v47, %v7562_v47 }
 0x1bd   :  { %v2565_v36 = vadd.f32 %v2564_v48, %v2563_v30  ;;  %v2616_v26 = vadd.f32 %v2615_v42, %v2614_v8  ;;  %v7579_v41 = vld [vmem:[#allocation3 + $0x48] sm:$0xff]  ;;  %3087 = vst.msk [vmem:[#allocation3 + $0x58] sm:$0xff] %vm441_vm5, %v6324_v2  ;;  %2530 = vst.msk [vmem:[#allocation3 + $0x78] sm:$0xff] %vm441_vm5, %v2514_v59  ;;  %v2597_v49 = vmul.f32 %v7577_v53, %v7577_v53  ;;  %v2570_v44 = vsel %vm441_vm5, %v7577_v53, 0.0 }
 0x1be   :  { %v2617_v7 = vsel %vm441_vm5, %v2594_v9, 0.0  ;;  %v2566_v35 = vsel %vm441_vm5, %v7579_v41, 0.0  ;;  %3085 = vst.msk [vmem:[#allocation3 + $0x48] sm:$0xff] %vm441_vm5, %v6324_v2  ;;  %2528 = vst.msk [vmem:[#allocation3 + $0x68] sm:$0xff] %vm441_vm5, %v2512_v15  ;;  %v2595_v24 = vmul.f32 %v7579_v41, %v7579_v41  ;;  %v2621_v11 = vsel %vm441_vm5, %v2596_v39, 0.0 }
 0x1bf   :  { %v2618_v56 = vadd.f32 %v2617_v7, %v2616_v26  ;;  %v2567_v46 = vadd.f32 %v2566_v35, %v2565_v36  ;;  %v2623_v54 = vsel %vm441_vm5, %v2597_v49, 0.0 }
 0x1c0   :  { %v2619_v51 = vsel %vm441_vm5, %v2595_v24, 0.0  ;;  %v7639_v24 = vld [vmem:[#allocation2] sm:$0xf] }
 0x1c1   :  { %v2569_v62 = vadd.f32 %v2568_v1, %v2567_v46  ;;  %v2620_v18 = vadd.f32 %v2619_v51, %v2618_v56  ;;  %v3350_v51 = vshll.u32 %v7639_v24, 16 }
 0x1c2   :  { %v7601_v45 = vld [vmem:[#allocation3 + $0x70] sm:$0xff] }
 0x1c3   :  { %3090 = vst.msk [vmem:[#allocation3 + $0x70] sm:$0xff] %vm441_vm5, %v6324_v2  ;;  %v7606_v16 = vld [vmem:[#allocation3 + $0x60] sm:$0xff]  ;;  %v2571_v40 = vadd.f32 %v2570_v44, %v2569_v62  ;;  %v2622_v3 = vadd.f32 %v2621_v11, %v2620_v18  ;;  %v2600_v23 = vmul.f32 %v7601_v45, %v7601_v45  ;;  %v2576_v22 = vsel %vm441_vm5, %v7601_v45, 0.0  ;;  %v7647_v11 = vld [vmem:[#allocation2 + $0x50] sm:$0xf] }
 0x1c4   :  { %v2572_v57 = vsel %vm441_vm5, %v7606_v16, 0.0  ;;  %v2598_v19 = vmul.f32 %v7606_v16, %v7606_v16  ;;  %3088 = vst.msk [vmem:[#allocation3 + $0x60] sm:$0xff] %vm441_vm5, %v6324_v2  ;;  %v7615_v32 = vld [vmem:[#allocation3 + $0x78] sm:$0xff]  ;;  %v3347_v62 = vshrl.u32 %v7639_v24, 16 }
 0x1c5   :  { %v2573_v0 = vadd.f32 %v2572_v57, %v2571_v40  ;;  %v7617_v37 = vld [vmem:[#allocation3 + $0x68] sm:$0xff]  ;;  %v2624_v20 = vadd.f32 %v2623_v54, %v2622_v3  ;;  %3091 = vst.msk [vmem:[#allocation3 + $0x78] sm:$0xff] %vm441_vm5, %v6324_v2  ;;  %v2601_v60 = vmul.f32 %v7615_v32, %v7615_v32  ;;  %v2629_v42 = vsel %vm441_vm5, %v2600_v23, 0.0 }
 0x1c6   :  { %v2625_v31 = vsel %vm441_vm5, %v2598_v19, 0.0  ;;  %3089 = vst.msk [vmem:[#allocation3 + $0x68] sm:$0xff] %vm441_vm5, %v6324_v2  ;;  %v2574_v6 = vsel %vm441_vm5, %v7617_v37, 0.0  ;;  %v2599_v43 = vmul.f32 %v7617_v37, %v7617_v37  ;;  %v2578_v8 = vsel %vm441_vm5, %v7615_v32, 0.0  ;;  %v2983_v23 = vld [vmem:[#allocation2 + $0xc] sm:$0x1] }
 0x1c7   :  { %v2626_v58 = vadd.f32 %v2625_v31, %v2624_v20  ;;  %v2575_v61 = vadd.f32 %v2574_v6, %v2573_v0  ;;  %v2631_v28 = vsel %vm441_vm5, %v2601_v60, 0.0  ;;  %v3349_v3 = vrot.slane %v3347_v62, 4 }
 0x1c8   :  { %v2627_v25 = vsel %vm441_vm5, %v2599_v43, 0.0  ;;  %v3352_v57 = vrot.slane %v3350_v51, 5  ;;  %v3459_v19 = vshrl.u32 %v7647_v11, 16  ;;  %v3462_v54 = vshll.u32 %v7647_v11, 16  ;;  %v7657_v43 = vld [vmem:[#allocation2 + $0x4] sm:$0x1] }
 0x1c9   :  { %v2577_v2 = vadd.f32 %v2576_v22, %v2575_v61  ;;  %v2628_v55 = vadd.f32 %v2627_v25, %v2626_v58  ;;  %v3356_v61 = vshll.u32 %v7657_v43, 16  ;;  %v7660_v25 = vld [vmem:[#allocation2 + $0x54] sm:$0x1] }
 0x1ca   :  { %v3353_v58 = vor.u32 %v3352_v57, %v3349_v3  ;;  %v3461_v22 = vrot.slane %v3459_v19, 4  ;;  %v3464_v60 = vrot.slane %v3462_v54, 5 }
 0x1cb   :  { %v2579_v30 = vadd.f32 %v2578_v8, %v2577_v2  ;;  %v2630_v21 = vadd.f32 %v2629_v42, %v2628_v55  ;;  %v7664_v55 = vrot.slane %v3356_v61, 5  ;;  %v3468_v8 = vshll.u32 %v7660_v25, 16 }
 0x1cc   :  { %v7662_v2 = vrot.slane %v3353_v58, 4  ;;  %v3465_v42 = vor.u32 %v3464_v60, %v3461_v22 }
 0x1cd   :  { %v2580_v52 = vrot.slane %v2579_v30, 4  ;;  %v2632_v48 = vadd.f32 %v2631_v28, %v2630_v21 }
 0x1ce   :  { %v3359_v21 = vsel %vm6581_vm15, %v7662_v2, %v7664_v55  ;;  %v7675_v28 = vrot.slane %v3465_v42, 4 }
 0x1cf   :  { %v2581_v9 = vadd.f32 %v2580_v52, %v2579_v30  ;;  %v2633_v59 = vrot.slane %v2632_v48, 4  ;;  %v7669_v30 = vsel %vm3213_vm0, %v7438_v50, 0  ;;  %v7677_v52 = vrot.slane %v3468_v8, 5 }
 0x1d1   :  { %v2582_v15 = vrot.slane %v2581_v9, 2  ;;  %v2634_v36 = vadd.f32 %v2633_v59, %v2632_v48  ;;  %v7681_v48 = vsel %vm3213_vm0, %v7550_v27, 0 }
 0x1d3   :  { %v2583_v26 = vadd.f32 %v2582_v15, %v2581_v9  ;;  %v2635_v7 = vrot.slane %v2634_v36, 2 }
 0x1d5   :  { %v2584_v35 = vrot.slane %v2583_v26, 1  ;;  %v2636_v39 = vadd.f32 %v2635_v7, %v2634_v36 }
 0x1d7   :  { %v2585_v56 = vadd.f32 %v2584_v35, %v2583_v26  ;;  %v2637_v46 = vrot.slane %v2636_v39, 1 }
 0x1d9   :  { %v2638_v1 = vadd.f32 %v2637_v46, %v2636_v39  ;;  %v7641_v49 = vmul.f32 0.0078125, %v2585_v56 }
 0x1db   :  { %v2640_v44 = vmul.f32 0.0078125, %v2638_v1  ;;  %v2641_v18 = vmul.f32 %v7641_v49, %v7641_v49  ;;  %v2657_v9 = vsub.f32 %v7617_v37, %v7641_v49  ;;  %v2644_v50 = vsub.f32 %v7475_v63, %v7641_v49  ;;  %v7704_v63 = vld [vmem:[%s8846_s2] ss:$0 sm:$0xff] }
 0x1dc   :  { %v2645_v59 = vsub.f32 %v7488_v38, %v7641_v49  ;;  %v2646_v15 = vsub.f32 %v7470_v13, %v7641_v49  ;;  %v2647_v36 = vsub.f32 %v7483_v14, %v7641_v49  ;;  %v2648_v26 = vsub.f32 %v7519_v5, %v7641_v49 }
 0x1dd   :  { %v2642_v40 = vsub.f32 %v2640_v44, %v2641_v18  ;;  %v2649_v27 = vsub.f32 %v7534_v10, %v7641_v49  ;;  %v2650_v37 = vsub.f32 %v7513_v12, %v7641_v49  ;;  %v2652_v13 = vsub.f32 %v7567_v33, %v7641_v49  ;;  %v7721_v33 = vld [vmem:[%s8847_s3] ss:$0 sm:$0xff] }
 0x1de   :  { %v2653_v14 = vsub.f32 %v7579_v41, %v7641_v49  ;;  %v2654_v38 = vsub.f32 %v7562_v47, %v7641_v49  ;;  %v2655_v5 = vsub.f32 %v7577_v53, %v7641_v49 }
 0x1df   :  { %v2643_v0 = vmax.f32 %v2642_v40, 0.0 }
 0x1e1   :  { %v2660_v6 = vadd.f32 1e-05, %v2643_v0 }
 0x1e3   :  { %6295 = vrsqrt.f32 %v2660_v6 }
 0x1ed   :  { %v7699_v7 = vpop.eup %6295 }
 0x1ee   :  { %v2675_v12 = vmul.f32 %v7699_v7, %v2657_v9  ;;  %v2662_v10 = vmul.f32 %v7699_v7, %v2644_v50  ;;  %v2663_v35 = vmul.f32 %v7699_v7, %v2645_v59  ;;  %v2664_v39 = vmul.f32 %v7699_v7, %v2646_v15 }
 0x1ef   :  { %v2665_v41 = vmul.f32 %v7699_v7, %v2647_v36  ;;  %v2666_v56 = vmul.f32 %v7699_v7, %v2648_v26  ;;  %v2667_v46 = vmul.f32 %v7699_v7, %v2649_v27  ;;  %v2668_v1 = vmul.f32 %v7699_v7, %v2650_v37 }
 0x1f0   :  { %v2697_v62 = vmul.f32 %v7704_v63, %v2675_v12  ;;  %v2684_v51 = vmul.f32 %v7704_v63, %v2662_v10  ;;  %v2685_v44 = vmul.f32 %v7704_v63, %v2663_v35  ;;  %v2686_v18 = vmul.f32 %v7704_v63, %v2664_v39 }
 0x1f1   :  { %v2687_v40 = vmul.f32 %v7704_v63, %v2665_v41  ;;  %v2688_v3 = vmul.f32 %v7704_v63, %v2666_v56  ;;  %v2689_v57 = vmul.f32 %v7704_v63, %v2667_v46  ;;  %v2690_v19 = vmul.f32 %v7704_v63, %v2668_v1 }
 0x1f2   :  { %v2719_v54 = vadd.f32 %v7721_v33, %v2697_v62  ;;  %v2706_v0 = vadd.f32 %v7721_v33, %v2684_v51  ;;  %v2707_v6 = vadd.f32 %v7721_v33, %v2685_v44  ;;  %v2708_v58 = vadd.f32 %v7721_v33, %v2686_v18 }
 0x1f3   :  { %v2709_v61 = vadd.f32 %v7721_v33, %v2687_v40  ;;  %v2710_v22 = vadd.f32 %v7721_v33, %v2688_v3  ;;  %v2711_v60 = vadd.f32 %v7721_v33, %v2689_v57  ;;  %v2712_v42 = vadd.f32 %v7721_v33, %v2690_v19 }
 0x1f4   :  { %v2735_v8 = vmul.f32 0.01, %v2719_v54  ;;  %v2722_v9 = vmul.f32 0.01, %v2706_v0  ;;  %v2723_v50 = vmul.f32 0.01, %v2707_v6  ;;  %v2656_v59 = vsub.f32 %v7606_v16, %v7641_v49 }
 0x1f5   :  { %v2724_v15 = vmul.f32 0.01, %v2708_v58  ;;  %v2725_v36 = vmul.f32 0.01, %v2709_v61  ;;  %v2726_v26 = vmul.f32 0.01, %v2710_v22  ;;  %v7746_v27 = vmul.f32 %v7699_v7, %v2652_v13 }
 0x1f6   :  { %v2751_v37 = vmax.f32 %v2719_v54, %v2735_v8  ;;  %v2738_v12 = vmax.f32 %v2706_v0, %v2722_v9  ;;  %v2739_v10 = vmax.f32 %v2707_v6, %v2723_v50  ;;  %v2727_v35 = vmul.f32 0.01, %v2711_v60 }
 0x1f7   :  { %v2740_v39 = vmax.f32 %v2708_v58, %v2724_v15  ;;  %v2741_v41 = vmax.f32 %v2709_v61, %v2725_v36  ;;  %v2742_v56 = vmax.f32 %v2710_v22, %v2726_v26  ;;  %v2728_v46 = vmul.f32 0.01, %v2712_v42  ;;  %v2980_v36 = vld [vmem:[#allocation2 + $0x8] sm:$0xf] }
 0x1f8   :  { %v5769_v1 = vpack.c.bf16 %v2751_v37, %v2751_v37  ;;  %v5756_v62 = vpack.c.bf16 %v2738_v12, %v2738_v12  ;;  %v5757_v51 = vpack.c.bf16 %v2739_v10, %v2739_v10  ;;  %v7749_v44 = vmul.f32 %v7699_v7, %v2653_v14 }
 0x1f9   :  { %v5758_v18 = vpack.c.bf16 %v2740_v39, %v2740_v39  ;;  %v5759_v40 = vpack.c.bf16 %v2741_v41, %v2741_v41  ;;  %v5760_v3 = vpack.c.bf16 %v2742_v56, %v2742_v56  ;;  %v2743_v57 = vmax.f32 %v2711_v60, %v2727_v35  ;;  %v2986_v35 = vld [vmem:[#allocation2 + $0x10] sm:$0xf] }
 0x1fa   :  { %v2923_v13 = vshrl.u32 %v5769_v1, 16  ;;  %v2926_v19 = vshll.u32 %v5769_v1, 16  ;;  %v2819_v54 = vshrl.u32 %v5756_v62, 16  ;;  %v2744_v0 = vmax.f32 %v2712_v42, %v2728_v46  ;;  %v2992_v42 = vld [vmem:[#allocation2 + $0x18] sm:$0xf] }
 0x1fb   :  { %v2822_v6 = vshll.u32 %v5756_v62, 16  ;;  %v2827_v8 = vshrl.u32 %v5757_v51, 16  ;;  %v2830_v58 = vshll.u32 %v5757_v51, 16  ;;  %v2835_v61 = vshrl.u32 %v5758_v18, 16  ;;  %v2998_v62 = vld [vmem:[#allocation2 + $0x20] sm:$0xf] }
 0x1fc   :  { %v7751_v22 = vrot.slane %v2923_v13, 7  ;;  %v2821_v9 = vrot.slane %v2819_v54, 7  ;;  %v2838_v50 = vshll.u32 %v5758_v18, 16  ;;  %v2843_v15 = vshrl.u32 %v5759_v40, 16 }
 0x1fd   :  { %v2829_v14 = vrot.slane %v2827_v8, 7  ;;  %v2837_v26 = vrot.slane %v2835_v61, 7  ;;  %v2846_v37 = vshll.u32 %v5759_v40, 16  ;;  %v2851_v12 = vshrl.u32 %v5760_v3, 16  ;;  %v3004_v8 = vld [vmem:[#allocation2 + $0x28] sm:$0xf] }
 0x1fe   :  { %v7754_v60 = vor.u32 %v2926_v19, %v7751_v22  ;;  %v2824_v10 = vor.u32 %v2822_v6, %v2821_v9  ;;  %v2845_v39 = vrot.slane %v2843_v15, 7  ;;  %v2854_v41 = vshll.u32 %v5760_v3, 16 }
 0x1ff   :  { %v2832_v56 = vor.u32 %v2830_v58, %v2829_v14  ;;  %v2840_v46 = vor.u32 %v2838_v50, %v2837_v26  ;;  %v2853_v1 = vrot.slane %v2851_v12, 7  ;;  %v5761_v51 = vpack.c.bf16 %v2743_v57, %v2743_v57 }
 0x200   :  { %v2981_v13 = vsel %vm6401_vm7, %v2824_v10, %v2980_v36  ;;  %v2848_v54 = vor.u32 %v2846_v37, %v2845_v39  ;;  %v5762_v40 = vpack.c.bf16 %v2744_v0, %v2744_v0  ;;  %v2825_v61 = vrot.slane %v2821_v9, 4  ;;  %v3010_v0 = vld [vmem:[#allocation2 + $0x30] sm:$0xf]  ;;  %v2989_v9 = vld [vmem:[#allocation2 + $0x14] sm:$0x1] }
 0x201   :  { %2982 = vst [vmem:[#allocation2 + $0x8] sm:$0xf] %v2981_v13  ;;  %v2987_v19 = vsel %vm6401_vm7, %v2832_v56, %v2986_v35  ;;  %v2993_v3 = vsel %vm6401_vm7, %v2840_v46, %v2992_v42  ;;  %v2856_v6 = vor.u32 %v2854_v41, %v2853_v1  ;;  %v2859_v58 = vshrl.u32 %v5761_v51, 16  ;;  %v2995_v42 = vld [vmem:[#allocation2 + $0x1c] sm:$0x1] }
 0x202   :  { %2988 = vst [vmem:[#allocation2 + $0x10] sm:$0xf] %v2987_v19  ;;  %2994 = vst [vmem:[#allocation2 + $0x18] sm:$0xf] %v2993_v3  ;;  %v2999_v57 = vsel %vm6401_vm7, %v2848_v54, %v2998_v62  ;;  %v2862_v50 = vshll.u32 %v5761_v51, 16  ;;  %v2867_v15 = vshrl.u32 %v5762_v40, 16  ;;  %v2984_v10 = vsel %vm6381_vm4, %v2825_v61, %v2983_v23 }
 0x203   :  { %v2870_v36 = vshll.u32 %v5762_v40, 16  ;;  %3000 = vst [vmem:[#allocation2 + $0x20] sm:$0xf] %v2999_v57  ;;  %v3005_v37 = vsel %vm6401_vm7, %v2856_v6, %v3004_v8  ;;  %v7766_v12 = vrot.slane %v2859_v58, 7  ;;  %v2692_v35 = vmul.f32 %v7704_v63, %v7746_v27  ;;  %v3001_v41 = vld [vmem:[#allocation2 + $0x24] sm:$0x1] }
 0x204   :  { %3006 = vst [vmem:[#allocation2 + $0x28] sm:$0xf] %v3005_v37  ;;  %v7772_v56 = vrot.slane %v2867_v15, 7  ;;  %2985 = vst [vmem:[#allocation2 + $0xc] sm:$0x1] %v2984_v10  ;;  %v2833_v46 = vrot.slane %v2829_v14, 4  ;;  %v2672_v23 = vmul.f32 %v7699_v7, %v2654_v38  ;;  %v2693_v38 = vmul.f32 %v7704_v63, %v7749_v44 }
 0x205   :  { %v2841_v62 = vrot.slane %v2837_v26, 4  ;;  %v2849_v51 = vrot.slane %v2845_v39, 4  ;;  %v3007_v13 = vld [vmem:[#allocation2 + $0x2c] sm:$0x1]  ;;  %v2864_v54 = vor.u32 %v2862_v50, %v7766_v12  ;;  %v3016_v8 = vld [vmem:[#allocation2 + $0x38] sm:$0xf]  ;;  %v2714_v40 = vadd.f32 %v7721_v33, %v2692_v35 }
 0x206   :  { %v2857_v19 = vrot.slane %v2853_v1, 4  ;;  %v2872_v27 = vor.u32 %v2870_v36, %v7772_v56  ;;  %v2990_v61 = vsel %vm6381_vm4, %v2833_v46, %v2989_v9  ;;  %v2694_v58 = vmul.f32 %v7704_v63, %v2672_v23 }
 0x207   :  { %v2996_v14 = vsel %vm6381_vm4, %v2841_v62, %v2995_v42  ;;  %v3002_v26 = vsel %vm6381_vm4, %v2849_v51, %v3001_v41  ;;  %v3011_v39 = vsel %vm6401_vm7, %v2864_v54, %v3010_v0  ;;  %v2730_v1 = vmul.f32 0.01, %v2714_v40  ;;  %2991 = vst [vmem:[#allocation2 + $0x14] sm:$0x1] %v2990_v61 }
 0x208   :  { %2997 = vst [vmem:[#allocation2 + $0x1c] sm:$0x1] %v2996_v14  ;;  %3003 = vst [vmem:[#allocation2 + $0x24] sm:$0x1] %v3002_v26  ;;  %v3008_v47 = vsel %vm6381_vm4, %v2857_v19, %v3007_v13  ;;  %v7793_v3 = vld [vmem:[#allocation2 + $0x8] sm:$0xf]  ;;  %v3017_v6 = vsel %vm6401_vm7, %v2872_v27, %v3016_v8  ;;  %v2673_v57 = vmul.f32 %v7699_v7, %v2655_v5 }
 0x209   :  { %3012 = vst [vmem:[#allocation2 + $0x30] sm:$0xf] %v3011_v39  ;;  %3009 = vst [vmem:[#allocation2 + $0x2c] sm:$0x1] %v3008_v47  ;;  %v2674_v50 = vmul.f32 %v7699_v7, %v2656_v59  ;;  %v5600_v44 = vcombine.low %v7639_v24, %v7793_v3  ;;  %v7808_v15 = vld [vmem:[#allocation2 + $0x10] sm:$0xf]  ;;  %v2746_v53 = vmax.f32 %v2714_v40, %v2730_v1 }
 0x20a   :  { %v7810_v36 = vld [vmem:[#allocation2 + $0x18] sm:$0xf]  ;;  %3018 = vst [vmem:[#allocation2 + $0x38] sm:$0xf] %v3017_v6  ;;  %v3361_v0 = vshrl.u32 %v7793_v3, 16  ;;  %v3364_v9 = vshll.u32 %v7793_v3, 16  ;;  %v2715_v13 = vadd.f32 %v7721_v33, %v2693_v38 }
 0x20b   :  { %v7817_v5 = vld [vmem:[%s8848_s4 + $0x10] sm:$0xf]  ;;  %v7821_v16 = vcombine.low %v7808_v15, %v7810_v36  ;;  %v7823_v59 = vld [vmem:[#allocation2 + $0x20] sm:$0xf]  ;;  %v3375_v37 = vshrl.u32 %v7808_v15, 16  ;;  %v3378_v10 = vshll.u32 %v7808_v15, 16  ;;  %6098 = vmatprep.mubr.msk.bf16.mxu1 %vm441_vm5, %v5600_v44  ;;  %v5764_v51 = vpack.c.bf16 %v2746_v53, %v2746_v53 }
 0x20c   :  { %v3389_v35 = vshrl.u32 %v7810_v36, 16  ;;  %v7829_v42 = vld [vmem:[#allocation2 + $0x28] sm:$0xf]  ;;  %v7831_v41 = vld [vmem:[#allocation2 + $0xc] sm:$0x1]  ;;  %v3363_v46 = vrot.slane %v3361_v0, 4  ;;  %v2716_v44 = vadd.f32 %v7721_v33, %v2694_v58  ;;  %v2695_v58 = vmul.f32 %v7704_v63, %v2673_v57 }
 0x20d   :  { %8944 = vst [vmem:[#allocation14_spill] sm:$0xff] %v7821_v16  ;;  %v3366_v62 = vrot.slane %v3364_v9, 5  ;;  %6099 = vmatmul.mubr.msk.bf16.vlgmr.msra.gmra.mrb[64].mxu1 %vm441_vm5, %v7821_v16  ;;  %v7838_v54 = vcombine.low %v7823_v59, %v7829_v42  ;;  %v3370_v8 = vshll.u32 %v7831_v41, 16  ;;  %v3377_v40 = vrot.slane %v3375_v37, 4  ;;  %v3028_v39 = vld [vmem:[#allocation2 + $0x58] sm:$0xf] }
 0x20e   :  { %v3380_v19 = vrot.slane %v3378_v10, 5  ;;  %6133 = vmatpush3.bf16.msra.mxu1 %v7669_v30  ;;  %v2883_v27 = vshrl.u32 %v5764_v51, 16  ;;  %v2886_v61 = vshll.u32 %v5764_v51, 16  ;;  %v3391_v14 = vrot.slane %v3389_v35, 4  ;;  %v7844_v1 = vld [vmem:[#allocation2 + $0x14] sm:$0x1] }
 0x20f   :  { %8945 = vst [vmem:[#allocation19_spill] sm:$0xff] %v7838_v54  ;;  %v3367_v23 = vor.u32 %v3366_v62, %v3363_v46  ;;  %6102 = vmatprep.mubr.msk.bf16.mxu1 %vm441_vm5, %v7838_v54  ;;  %v3372_v26 = vrot.slane %v3370_v8, 5  ;;  %v7846_v47 = vld [vmem:[#allocation2 + $0x1c] sm:$0x1]  ;;  %v3392_v6 = vshll.u32 %v7810_v36, 16  ;;  %6271 = vmatprep.subr.msk.bf16.mxu1 %vm3213_vm0, %v7817_v5  ;;  %v3384_v53 = vshll.u32 %v7844_v1, 16 }
 0x210   :  { %v3381_v38 = vor.u32 %v3380_v19, %v3377_v40  ;;  %v7852_v30 = vld [vmem:[#allocation2 + $0x30] sm:$0xf]  ;;  %v7854_v9 = vrot.slane %v2883_v27, 7  ;;  %v3398_v37 = vshll.u32 %v7846_v47, 16  ;;  %v7860_v62 = vld [vmem:[#allocation2 + $0x24] sm:$0x1]  ;;  %v2696_v51 = vmul.f32 %v7704_v63, %v2674_v50 }
 0x211   :  { %v3368_v0 = vrot.slane %v3367_v23, 4  ;;  %v7858_v10 = vld [vmem:[#allocation2 + $0x38] sm:$0xf]  ;;  %v3394_v46 = vrot.slane %v3392_v6, 5  ;;  %v3386_v23 = vrot.slane %v3384_v53, 5  ;;  %v3403_v6 = vshrl.u32 %v7823_v59, 16 }
 0x212   :  { %v3382_v35 = vrot.slane %v3381_v38, 4  ;;  %v7866_v8 = vcombine.low %v7852_v30, %v7858_v10  ;;  %v2888_v19 = vor.u32 %v2886_v61, %v7854_v9  ;;  %v3400_v50 = vrot.slane %v3398_v37, 5  ;;  %v7879_v38 = vld [vmem:[#allocation2 + $0x2c] sm:$0x1]  ;;  %v3013_v16 = vld [vmem:[#allocation2 + $0x34] sm:$0x1] }
 0x213   :  { %v7870_v40 = vsel %vm6581_vm15, %v3368_v0, %v3372_v26  ;;  %v3395_v27 = vor.u32 %v3394_v46, %v3391_v14  ;;  %v3406_v0 = vshll.u32 %v7823_v59, 16  ;;  %v3412_v53 = vshll.u32 %v7860_v62, 16 }
 0x214   :  { %8946 = vst [vmem:[#allocation18_spill] sm:$0xff] %v7866_v8  ;;  %v5617_v57 = vcombine.low %v3359_v21, %v7870_v40  ;;  %v3029_v26 = vsel %vm6401_vm7, %v2888_v19, %v3028_v39  ;;  %v7886_v61 = vsel %vm6581_vm15, %v3382_v35, %v3386_v23  ;;  %v3405_v55 = vrot.slane %v3403_v6, 4 }
 0x215   :  { %6103 = vmatmul.mubr.msk.bf16.gmra.mrb[68].mxu1 %vm441_vm5, %v7866_v8  ;;  %3030 = vst [vmem:[#allocation2 + $0x58] sm:$0xf] %v3029_v26  ;;  %v3396_v2 = vrot.slane %v3395_v27, 4  ;;  %v3417_v21 = vshrl.u32 %v7829_v42, 16  ;;  %v3420_v14 = vshll.u32 %v7829_v42, 16  ;;  %v3408_v39 = vrot.slane %v3406_v0, 5 }
 0x216   :  { %6116 = vmatprep.mubr.msk.bf16.mxu0 %vm441_vm5, %v5617_v57  ;;  %v3414_v37 = vrot.slane %v3412_v53, 5  ;;  %v3426_v35 = vshll.u32 %v7879_v38, 16  ;;  %v2731_v46 = vmul.f32 0.01, %v2715_v13  ;;  %v2732_v20 = vmul.f32 0.01, %v2716_v44 }
 0x217   :  { %v7898_v19 = vsel %vm6581_vm15, %v3396_v2, %v3400_v50  ;;  %v3419_v23 = vrot.slane %v3417_v21, 4  ;;  %v3422_v31 = vrot.slane %v3420_v14, 5  ;;  %v3409_v27 = vor.u32 %v3408_v39, %v3405_v55  ;;  %v7909_v50 = vld [vmem:[%s8848_s4 + $0x14] sm:$0xf] }
 0x218   :  { %8947 = vst [vmem:[#allocation20_spill] sm:$0xff] %v7898_v19  ;;  %v7902_v57 = vcombine.low %v7886_v61, %v7898_v19  ;;  %v3428_v6 = vrot.slane %v3426_v35, 5  ;;  %v2747_v26 = vmax.f32 %v2715_v13, %v2731_v46  ;;  %v2748_v0 = vmax.f32 %v2716_v44, %v2732_v20  ;;  %8949 = vst [vmem:[#allocation9_spill] sm:$0xff] %v7909_v50 }
 0x219   :  { %v3423_v8 = vor.u32 %v3422_v31, %v3419_v23  ;;  %v2717_v53 = vadd.f32 %v7721_v33, %v2695_v58  ;;  %v2718_v54 = vadd.f32 %v7721_v33, %v2696_v51  ;;  %v3410_v2 = vrot.slane %v3409_v27, 4 }
 0x21a   :  { %8948 = vst [vmem:[#allocation8_spill] sm:$0xff] %v7902_v57  ;;  %6117 = vmatmul.mubr.msk.bf16.vlgmr.msra.gmra.mrb[80].mxu0 %vm441_vm5, %v7902_v57  ;;  %v5765_v21 = vpack.c.bf16 %v2747_v26, %v2747_v26  ;;  %v2865_v55 = vrot.slane %v7766_v12, 4  ;;  %v2873_v31 = vrot.slane %v7772_v56, 4  ;;  %v5766_v13 = vpack.c.bf16 %v2748_v0, %v2748_v0  ;;  %v3019_v12 = vld [vmem:[#allocation2 + $0x3c] sm:$0x1] }
 0x21b   :  { %v3424_v20 = vrot.slane %v3423_v8, 4  ;;  %v2733_v44 = vmul.f32 0.01, %v2717_v53  ;;  %v2734_v58 = vmul.f32 0.01, %v2718_v54  ;;  %6151 = vmatpush3.bf16.msra.mxu0 %v7681_v48  ;;  %v7920_v14 = vsel %vm6581_vm15, %v3410_v2, %v3414_v37 }
 0x21c   :  { %v7916_v51 = vld [vmem:[#allocation2 + $0x58] sm:$0xf]  ;;  %8950 = vst [vmem:[#allocation10_spill] sm:$0xff] %v7920_v14  ;;  %v2891_v39 = vshrl.u32 %v5765_v21, 16  ;;  %v2894_v35 = vshll.u32 %v5765_v21, 16  ;;  %v3014_v46 = vsel %vm6381_vm4, %v2865_v55, %v3013_v16  ;;  %6272 = vmatprep.subr.msk.bf16.mxu0 %vm3213_vm0, %v7909_v50  ;;  %v2899_v37 = vshrl.u32 %v5766_v13, 16 }
 0x21d   :  { %v5604_v56 = vcombine.low %v7647_v11, %v7916_v51  ;;  %v7930_v48 = vsel %vm6581_vm15, %v3424_v20, %v3428_v6  ;;  %3015 = vst [vmem:[#allocation2 + $0x34] sm:$0x1] %v3014_v46  ;;  %v2902_v27 = vshll.u32 %v5766_v13, 16  ;;  %v2749_v26 = vmax.f32 %v2717_v53, %v2733_v44  ;;  %v3034_v2 = vld [vmem:[#allocation2 + $0x60] sm:$0xf] }
 0x21e   :  { %8951 = vst [vmem:[#allocation12_spill] sm:$0xff] %v7930_v48  ;;  %v7936_v23 = vcombine.low %v7920_v14, %v7930_v48  ;;  %v7938_v16 = vrot.slane %v2891_v39, 7  ;;  %v7941_v0 = vrot.slane %v2899_v37, 7  ;;  %v2750_v6 = vmax.f32 %v2718_v54, %v2734_v58  ;;  %v3040_v39 = vld [vmem:[#allocation2 + $0x68] sm:$0xf] }
 0x21f   :  { %6106 = vmatprep.mubr.msk.bf16.mxu1 %vm441_vm5, %v5604_v56  ;;  %v3020_v21 = vsel %vm6381_vm4, %v2873_v31, %v3019_v12  ;;  %v3431_v55 = vshrl.u32 %v7852_v30, 16  ;;  %v5767_v46 = vpack.c.bf16 %v2749_v26, %v2749_v26  ;;  %v3434_v53 = vshll.u32 %v7852_v30, 16  ;;  %v3031_v57 = vld [vmem:[#allocation2 + $0x5c] sm:$0x1] }
 0x220   :  { %8952 = vst [vmem:[#allocation11_spill] sm:$0xff] %v7936_v23  ;;  %6120 = vmatprep.mubr.msk.bf16.mxu0 %vm441_vm5, %v7936_v23  ;;  %v2896_v20 = vor.u32 %v2894_v35, %v7938_v16  ;;  %3021 = vst [vmem:[#allocation2 + $0x3c] sm:$0x1] %v3020_v21  ;;  %v3445_v13 = vshrl.u32 %v7858_v10, 16  ;;  %v2904_v44 = vor.u32 %v2902_v27, %v7941_v0  ;;  %v3448_v31 = vshll.u32 %v7858_v10, 16 }
 0x221   :  { %v5768_v54 = vpack.c.bf16 %v2750_v6, %v2750_v6  ;;  %v3433_v58 = vrot.slane %v3431_v55, 4  ;;  %v2907_v56 = vshrl.u32 %v5767_v46, 16  ;;  %v2910_v37 = vshll.u32 %v5767_v46, 16  ;;  %v3046_v46 = vld [vmem:[#allocation2 + $0x70] sm:$0xf] }
 0x222   :  { %v3035_v12 = vsel %vm6401_vm7, %v2896_v20, %v3034_v2  ;;  %v3436_v8 = vrot.slane %v3434_v53, 5  ;;  %v3041_v35 = vsel %vm6401_vm7, %v2904_v44, %v3040_v39  ;;  %v3447_v23 = vrot.slane %v3445_v13, 4 }
 0x223   :  { %3036 = vst [vmem:[#allocation2 + $0x60] sm:$0xf] %v3035_v12  ;;  %v2915_v26 = vshrl.u32 %v5768_v54, 16  ;;  %v2918_v21 = vshll.u32 %v5768_v54, 16  ;;  %3042 = vst [vmem:[#allocation2 + $0x68] sm:$0xf] %v3041_v35 }
 0x224   :  { %v7957_v27 = vrot.slane %v2907_v56, 7  ;;  %v7959_v6 = vld [vmem:[#allocation2 + $0x34] sm:$0x1]  ;;  %v3437_v55 = vor.u32 %v3436_v8, %v3433_v58  ;;  %v3450_v14 = vrot.slane %v3448_v31, 5  ;;  %v2889_v2 = vrot.slane %v7854_v9, 4 }
 0x225   :  { %v7962_v20 = vrot.slane %v2915_v26, 7  ;;  %v3440_v53 = vshll.u32 %v7959_v6, 16  ;;  %v3473_v39 = vshrl.u32 %v7916_v51, 16  ;;  %v3476_v44 = vshll.u32 %v7916_v51, 16  ;;  %v3052_v54 = vld [vmem:[#allocation2 + $0x78] sm:$0xf] }
 0x226   :  { %v2912_v13 = vor.u32 %v2910_v37, %v7957_v27  ;;  %v3438_v12 = vrot.slane %v3437_v55, 4  ;;  %v3451_v56 = vor.u32 %v3450_v14, %v3447_v23  ;;  %v3032_v8 = vsel %vm6381_vm4, %v2889_v2, %v3031_v57  ;;  %v3058_v58 = vld [vmem:[#allocation2 + $0x80] sm:$0xf] }
 0x227   :  { %v2920_v9 = vor.u32 %v2918_v21, %v7962_v20  ;;  %v7971_v31 = vld [vmem:[#allocation2 + $0x3c] sm:$0x1]  ;;  %v3442_v35 = vrot.slane %v3440_v53, 5  ;;  %3033 = vst [vmem:[#allocation2 + $0x5c] sm:$0x1] %v3032_v8  ;;  %v3475_v26 = vrot.slane %v3473_v39, 4  ;;  %v8953_v14 = vsub.f32 %v7601_v45, %v7641_v49 }
 0x228   :  { %v3478_v19 = vrot.slane %v3476_v44, 5  ;;  %v3047_v48 = vsel %vm6401_vm7, %v2912_v13, %v3046_v46  ;;  %v3452_v50 = vrot.slane %v3451_v56, 4  ;;  %v3454_v37 = vshll.u32 %v7971_v31, 16  ;;  %v3037_v46 = vld [vmem:[#allocation2 + $0x64] sm:$0x1] }
 0x229   :  { %v2676_v57 = vmul.f32 %v7699_v7, %v8953_v14  ;;  %v2929_v23 = vrot.slane %v7751_v22, 4  ;;  %3048 = vst [vmem:[#allocation2 + $0x70] sm:$0xf] %v3047_v48  ;;  %v3053_v21 = vsel %vm6401_vm7, %v2920_v9, %v3052_v54  ;;  %v7985_v55 = vsel %vm6581_vm15, %v3438_v12, %v3442_v35  ;;  %v3043_v53 = vld [vmem:[#allocation2 + $0x6c] sm:$0x1] }
 0x22a   :  { %v3059_v2 = vsel %vm6401_vm7, %v7754_v60, %v3058_v58  ;;  %v7990_v39 = vld [vmem:[#allocation2 + $0x60] sm:$0xf]  ;;  %3054 = vst [vmem:[#allocation2 + $0x78] sm:$0xf] %v3053_v21  ;;  %v3456_v45 = vrot.slane %v3454_v37, 5  ;;  %v2897_v48 = vrot.slane %v7938_v16, 4  ;;  %v3479_v54 = vor.u32 %v3478_v19, %v3475_v26 }
 0x22b   :  { %v2698_v22 = vmul.f32 %v7704_v63, %v2676_v57  ;;  %3060 = vst [vmem:[#allocation2 + $0x80] sm:$0xf] %v3059_v2  ;;  %v2905_v44 = vrot.slane %v7941_v0, 4  ;;  %v7995_v13 = vld [vmem:[#allocation2 + $0x68] sm:$0xf]  ;;  %v3487_v12 = vshrl.u32 %v7990_v39, 16  ;;  %v5671_v4 = vcombine.low %v7916_v51, %v7990_v39 }
 0x22c   :  { %v3490_v60 = vshll.u32 %v7990_v39, 16  ;;  %v3061_v56 = vld [vmem:[#allocation2 + $0x84] sm:$0x1]  ;;  %v8001_v8 = vcombine.low %v7990_v39, %v7995_v13  ;;  %v8005_v58 = vsel %vm6581_vm15, %v3452_v50, %v3456_v45  ;;  %v3038_v0 = vsel %vm6381_vm4, %v2897_v48, %v3037_v46  ;;  %v3049_v37 = vld [vmem:[#allocation2 + $0x74] sm:$0x1] }
 0x22d   :  { %v2720_v16 = vadd.f32 %v7721_v33, %v2698_v22  ;;  %v8012_v19 = vcombine.low %v7985_v55, %v8005_v58  ;;  %3039 = vst [vmem:[#allocation2 + $0x64] sm:$0x1] %v3038_v0  ;;  %v3044_v9 = vsel %vm6381_vm4, %v2905_v44, %v3043_v53  ;;  %v3489_v35 = vrot.slane %v3487_v12, 4  ;;  %v3055_v48 = vld [vmem:[#allocation2 + $0x7c] sm:$0x1] }
 0x22e   :  { %8954 = vst [vmem:[#allocation16_spill] sm:$0xff] %v8001_v8  ;;  %v3492_v26 = vrot.slane %v3490_v60, 5  ;;  %6107 = vmatmul.mubr.msk.bf16.gmra.mrb[72].mxu1 %vm441_vm5, %v8001_v8  ;;  %v8018_v50 = vld [vmem:[#allocation2 + $0x5c] sm:$0x1]  ;;  %3045 = vst [vmem:[#allocation2 + $0x6c] sm:$0x1] %v3044_v9  ;;  %v3062_v2 = vsel %vm6381_vm4, %v2929_v23, %v3061_v56  ;;  %v3471_v23 = vsel %vm6581_vm15, %v7675_v28, %v7677_v52 }
 0x22f   :  { %8955 = vst [vmem:[#allocation17_spill] sm:$0xff] %v8012_v19  ;;  %v2736_v14 = vmul.f32 0.01, %v2720_v16  ;;  %v3501_v57 = vshrl.u32 %v7995_v13, 16  ;;  %v3504_v21 = vshll.u32 %v7995_v13, 16  ;;  %6121 = vmatmul.mubr.msk.bf16.gmra.mrb[84].mxu0 %vm441_vm5, %v8012_v19  ;;  %v3480_v46 = vrot.slane %v3479_v54, 4 }
 0x230   :  { %v3482_v53 = vshll.u32 %v8018_v50, 16  ;;  %v3493_v45 = vor.u32 %v3492_v26, %v3489_v35  ;;  %v2913_v22 = vrot.slane %v7957_v27, 4  ;;  %3063 = vst [vmem:[#allocation2 + $0x84] sm:$0x1] %v3062_v2  ;;  %v8028_v44 = vld [vmem:[#allocation2 + $0x70] sm:$0xf] }
 0x231   :  { %v2752_v12 = vmax.f32 %v2720_v16, %v2736_v14  ;;  %v3503_v60 = vrot.slane %v3501_v57, 4  ;;  %v3506_v0 = vrot.slane %v3504_v21, 5  ;;  %v2921_v9 = vrot.slane %v7962_v20, 4  ;;  %v8031_v8 = vld [vmem:[#allocation2 + $0x78] sm:$0xf] }
 0x232   :  { %v3484_v54 = vrot.slane %v3482_v53, 5  ;;  %v3050_v27 = vsel %vm6381_vm4, %v2913_v22, %v3049_v37  ;;  %v8041_v56 = vcombine.low %v8028_v44, %v8031_v8  ;;  %v3515_v28 = vshrl.u32 %v8028_v44, 16  ;;  %v8063_v19 = vld [vmem:[#allocation2 + $0x80] sm:$0xf] }
 0x233   :  { %v5770_v16 = vpack.c.bf16 %v2752_v12, %v2752_v12  ;;  %v3507_v35 = vor.u32 %v3506_v0, %v3503_v60  ;;  %3051 = vst [vmem:[#allocation2 + $0x74] sm:$0x1] %v3050_v27  ;;  %v3056_v26 = vsel %vm6381_vm4, %v2921_v9, %v3055_v48  ;;  %v3518_v52 = vshll.u32 %v8028_v44, 16 }
 0x234   :  { %8956 = vst [vmem:[#allocation13_spill] sm:$0xff] %v8041_v56  ;;  %v8045_v20 = vsel %vm6581_vm15, %v3480_v46, %v3484_v54  ;;  %6110 = vmatprep.mubr.msk.bf16.mxu1 %vm441_vm5, %v8041_v56  ;;  %v8054_v21 = vld [vmem:[#allocation2 + $0x64] sm:$0x1]  ;;  %v3494_v2 = vrot.slane %v3493_v45, 4  ;;  %3057 = vst [vmem:[#allocation2 + $0x7c] sm:$0x1] %v3056_v26 }
 0x235   :  { %8957 = vst [vmem:[#allocation15_spill] sm:$0xff] %v8045_v20  ;;  %v5621_v37 = vcombine.low %v3471_v23, %v8045_v20  ;;  %v2931_v14 = vshrl.u32 %v5770_v16, 16  ;;  %v2934_v57 = vshll.u32 %v5770_v16, 16  ;;  %v8056_v46 = vld [vmem:[#allocation2 + $0x6c] sm:$0x1]  ;;  %v3496_v53 = vshll.u32 %v8054_v21, 16 }
 0x236   :  { %v3517_v22 = vrot.slane %v3515_v28, 4  ;;  %v3520_v48 = vrot.slane %v3518_v52, 5  ;;  %v3529_v12 = vshrl.u32 %v8031_v8, 16  ;;  %v3508_v0 = vrot.slane %v3507_v35, 4  ;;  %v3064_v54 = vld [vmem:[#allocation2 + $0x88] sm:$0xf] }
 0x237   :  { %6124 = vmatprep.mubr.msk.bf16.mxu0 %vm441_vm5, %v5621_v37  ;;  %v2933_v60 = vrot.slane %v2931_v14, 7  ;;  %v3510_v9 = vshll.u32 %v8056_v46, 16  ;;  %v3532_v23 = vshll.u32 %v8031_v8, 16  ;;  %v3498_v27 = vrot.slane %v3496_v53, 5 }
 0x238   :  { %v3521_v45 = vor.u32 %v3520_v48, %v3517_v22  ;;  %v3531_v16 = vrot.slane %v3529_v12, 4  ;;  %v5633_v28 = vrot.slane %v7639_v24, 9  ;;  %v3786_v35 = vrot.slane %v7657_v43, 5  ;;  %v3067_v12 = vld [vmem:[#allocation2 + $0x8c] sm:$0x1] }
 0x239   :  { %v2936_v26 = vor.u32 %v2934_v57, %v2933_v60  ;;  %v3512_v56 = vrot.slane %v3510_v9, 5  ;;  %v3534_v52 = vrot.slane %v3532_v23, 5  ;;  %v8068_v37 = vsel %vm6581_vm15, %v3494_v2, %v3498_v27 }
 0x23a   :  { %v5634_v14 = vrot.slane %v7793_v3, 9  ;;  %v8072_v20 = vld [vmem:[#allocation2 + $0x74] sm:$0x1]  ;;  %v3522_v53 = vrot.slane %v3521_v45, 4  ;;  %v3790_v2 = vrot.slane %v7831_v41, 5  ;;  %v2937_v23 = vrot.slane %v2933_v60, 4 }
 0x23b   :  { %v3065_v57 = vsel %vm6401_vm7, %v2936_v26, %v3064_v54  ;;  %v8078_v22 = vsel %vm6581_vm15, %v3508_v0, %v3512_v56  ;;  %v3524_v24 = vshll.u32 %v8072_v20, 16  ;;  %v3535_v48 = vor.u32 %v3534_v52, %v3531_v16  ;;  %v8086_v9 = vld [vmem:[#allocation2 + $0x7c] sm:$0x1] }
 0x23c   :  { %3066 = vst [vmem:[#allocation2 + $0x88] sm:$0xf] %v3065_v57  ;;  %v8083_v43 = vcombine.low %v8068_v37, %v8078_v22  ;;  %v3543_v54 = vshrl.u32 %v8063_v19, 16  ;;  %v3538_v56 = vshll.u32 %v8086_v9, 16  ;;  %v3068_v0 = vsel %vm6381_vm4, %v2937_v23, %v3067_v12  ;;  %v8109_v12 = vld [vmem:[#allocation2 + $0x84] sm:$0x1] }
 0x23d   :  { %v3526_v27 = vrot.slane %v3524_v24, 5  ;;  %v3536_v45 = vrot.slane %v3535_v48, 4  ;;  %v3546_v26 = vshll.u32 %v8063_v19, 16  ;;  %3069 = vst [vmem:[#allocation2 + $0x8c] sm:$0x1] %v3068_v0  ;;  %v3787_v52 = vsel %vm6814_vm3, %v5633_v28, %v3786_v35 }
 0x23e   :  { %8958 = vst [vmem:[#allocation21_spill] sm:$0xff] %v8083_v43  ;;  %6125 = vmatmul.mubr.msk.bf16.gmra.mrb[88].mxu0 %vm441_vm5, %v8083_v43  ;;  %v3545_v16 = vrot.slane %v3543_v54, 4  ;;  %v3540_v60 = vrot.slane %v3538_v56, 5  ;;  %v8103_v57 = vsel %vm6814_vm3, %v5634_v14, %v3790_v2  ;;  %v5635_v14 = vrot.slane %v7808_v15, 9 }
 0x23f   :  { %v8097_v41 = vsel %vm6581_vm15, %v3522_v53, %v3526_v27  ;;  %v3548_v24 = vrot.slane %v3546_v26, 5  ;;  %v5667_v53 = vcombine.low %v7793_v3, %v7808_v15  ;;  %v5650_v35 = vcombine.low %v3787_v52, %v8103_v57 }
 0x240   :  { %v8107_v48 = vsel %vm6581_vm15, %v3536_v45, %v3540_v60  ;;  %v3794_v2 = vrot.slane %v7844_v1, 5  ;;  %v5641_v27 = vrot.slane %v7647_v11, 9  ;;  %v3552_v3 = vshll.u32 %v8109_v12, 16 }
 0x241   :  { %8959 = vst [vmem:[#allocation22_spill] sm:$0xff] %v8107_v48  ;;  %v8115_v23 = vcombine.low %v8097_v41, %v8107_v48  ;;  %v3549_v54 = vor.u32 %v3548_v24, %v3545_v16  ;;  %v5636_v16 = vrot.slane %v7810_v36, 9  ;;  %v3798_v15 = vrot.slane %v7846_v47, 5 }
 0x242   :  { %v5637_v1 = vrot.slane %v7823_v59, 9  ;;  %v3802_v11 = vrot.slane %v7860_v62, 5  ;;  %v3806_v47 = vrot.slane %v7879_v38, 5  ;;  %v5668_v48 = vcombine.low %v7810_v36, %v7823_v59 }
 0x243   :  { %8960 = vst [vmem:[#allocation24_spill] sm:$0xff] %v8115_v23  ;;  %v8117_v28 = vld [vmem:[#allocation2 + $0x88] sm:$0xf]  ;;  %6128 = vmatprep.mubr.msk.bf16.mxu0 %vm441_vm5, %v8115_v23  ;;  %v3550_v60 = vrot.slane %v3549_v54, 4  ;;  %v5638_v23 = vrot.slane %v7829_v42, 9  ;;  %v5669_v62 = vcombine.low %v7829_v42, %v7852_v30  ;;  %v3554_v54 = vrot.slane %v3552_v3, 5 }
 0x244   :  { %v8125_v45 = vcombine.low %v8063_v19, %v8117_v28  ;;  %v3557_v56 = vshrl.u32 %v8117_v28, 16  ;;  %v3560_v0 = vshll.u32 %v8117_v28, 16  ;;  %v8138_v26 = vld [vmem:[#allocation2 + $0x8c] sm:$0x1]  ;;  %v8157_v38 = vsel %vm6814_vm3, %v5636_v16, %v3798_v15 }
 0x245   :  { %v3566_v43 = vshll.u32 %v8138_v26, 16  ;;  %v8161_v36 = vsel %vm6814_vm3, %v5637_v1, %v3802_v11  ;;  %v5639_v59 = vrot.slane %v7852_v30, 9  ;;  %v3810_v3 = vrot.slane %v7959_v6, 5 }
 0x246   :  { %8961 = vst [vmem:[#allocation23_spill] sm:$0xff] %v8125_v45  ;;  %6111 = vmatmul.mubr.msk.bf16.gmra.mrb[76].mxu1 %vm441_vm5, %v8125_v45  ;;  %v3559_v52 = vrot.slane %v3557_v56, 4  ;;  %v3562_v24 = vrot.slane %v3560_v0, 5  ;;  %v4313_v45 = vsel %vm3213_vm0, %v7817_v5, 0  ;;  %v3818_v0 = vrot.slane %v7660_v25, 5 }
 0x247   :  { %6134 = vmatprep.mubr.msk.bf16.mxu1 %vm441_vm5, %v5650_v35  ;;  %v8153_v35 = vsel %vm6814_vm3, %v5635_v14, %v3794_v2  ;;  %v8166_v5 = vsel %vm6581_vm15, %v3550_v60, %v3554_v54  ;;  %v3568_v25 = vrot.slane %v3566_v43, 5  ;;  %v8171_v14 = vsel %vm6814_vm3, %v5638_v23, %v3806_v47 }
 0x248   :  { %v3563_v56 = vor.u32 %v3562_v24, %v3559_v52  ;;  %v5640_v2 = vrot.slane %v7858_v10, 9  ;;  %v3814_v16 = vrot.slane %v7971_v31, 5  ;;  %v8962_v15 = vsub.f32 %v7529_v29, %v7641_v49 }
 0x249   :  { %v8181_v1 = vcombine.low %v8153_v35, %v8157_v38  ;;  %v5642_v43 = vrot.slane %v7916_v51, 9  ;;  %v3822_v23 = vrot.slane %v8018_v50, 5  ;;  %v8198_v11 = vcombine.low %v8161_v36, %v8171_v14  ;;  %v8207_v50 = vld [vmem:[%s8848_s4 + $0x18] sm:$0xf] }
 0x24a   :  { %v3564_v42 = vrot.slane %v3563_v56, 4  ;;  %v2669_v30 = vmul.f32 %v7699_v7, %v8962_v15  ;;  %v8202_v60 = vsel %vm6814_vm3, %v5639_v59, %v3810_v3  ;;  %v8213_v52 = vsel %vm6814_vm3, %v5640_v2, %v3814_v16 }
 0x24b   :  { %v5684_v47 = vcombine.low %v7870_v40, %v7886_v61  ;;  %v8225_v54 = vsel %vm6814_vm3, %v5642_v43, %v3822_v23  ;;  %v8963_v56 = vsub.f32 %v7615_v32, %v7641_v49  ;;  %v5643_v2 = vrot.slane %v7990_v39, 9  ;;  %v5743_v40 = vld [vmem:[%s8848_s4 + $0x20] sm:$0xf] }
 0x24c   :  { %v8185_v6 = vsel %vm6581_vm15, %v3564_v42, %v3568_v25  ;;  %v2691_v29 = vmul.f32 %v7704_v63, %v2669_v30  ;;  %v8235_v25 = vcombine.low %v8202_v60, %v8213_v52  ;;  %v3826_v32 = vrot.slane %v8054_v21, 5 }
 0x24d   :  { %v8191_v31 = vcombine.low %v8166_v5, %v8185_v6  ;;  %v2677_v59 = vmul.f32 %v7699_v7, %v8963_v56  ;;  %v5644_v7 = vrot.slane %v7995_v13, 9  ;;  %v3830_v16 = vrot.slane %v8056_v46, 5 }
 0x24e   :  { %6135 = vmatmul.mubr.msk.bf16.vlgmr.msra.gmra.mrb[80].mxu1 %vm441_vm5, %v8181_v1  ;;  %v2713_v24 = vadd.f32 %v7721_v33, %v2691_v29  ;;  %v5645_v15 = vrot.slane %v8028_v44, 9  ;;  %v3834_v43 = vrot.slane %v8072_v20, 5  ;;  %v5646_v23 = vrot.slane %v8031_v8, 9 }
 0x24f   :  { %6169 = vmatpush3.bf16.msra.mxu1 %v4313_v45  ;;  %6129 = vmatmul.mubr.msk.bf16.gmra.mrb[92].mxu0 %vm441_vm5, %v8191_v31  ;;  %v3819_v45 = vsel %vm6814_vm3, %v5641_v27, %v3818_v0  ;;  %v2699_v0 = vmul.f32 %v7704_v63, %v2677_v59  ;;  %v3838_v63 = vrot.slane %v8086_v9, 5  ;;  %v8262_v20 = vsel %vm6814_vm3, %v5643_v2, %v3826_v32  ;;  %v3022_v59 = vld [vmem:[#allocation2 + $0x40] sm:$0xf] }
 0x250   :  { %6138 = vmatprep.mubr.msk.bf16.mxu1 %vm441_vm5, %v8198_v11  ;;  %6152 = vmatprep.mubr.msk.bf16.mxu0 %vm441_vm5, %v5667_v53  ;;  %v2729_v42 = vmul.f32 0.01, %v2713_v24  ;;  %v8964_v53 = vld [vmem:[#allocation9_spill] sm:$0xff]  ;;  %v5654_v3 = vcombine.low %v3819_v45, %v8225_v54  ;;  %v8266_v46 = vsel %vm6814_vm3, %v5644_v7, %v3830_v16  ;;  %v8270_v45 = vsel %vm6814_vm3, %v5645_v15, %v3834_v43 }
 0x251   :  { %6273 = vmatprep.subr.msk.bf16.mxu1 %vm3213_vm0, %v8207_v50  ;;  %v4507_v27 = vsel %vm3213_vm0, %v8964_v53, 0  ;;  %v2721_v30 = vadd.f32 %v7721_v33, %v2699_v0  ;;  %v3025_v53 = vld [vmem:[#allocation2 + $0x44] sm:$0x1]  ;;  %v5647_v32 = vrot.slane %v8063_v19, 9  ;;  %v5648_v15 = vrot.slane %v8117_v28, 9 }
 0x252   :  { %v2745_v49 = vmax.f32 %v2713_v24, %v2729_v42  ;;  %v8255_v24 = vld [vmem:[%s8848_s4 + $0x1c] sm:$0xf]  ;;  %v5672_v61 = vcombine.low %v7995_v13, %v8028_v44 }
 0x253   :  { %v2737_v21 = vmul.f32 0.01, %v2721_v30 }
 0x254   :  { %v5763_v29 = vpack.c.bf16 %v2745_v49, %v2745_v49  ;;  %v3842_v49 = vrot.slane %v8109_v12, 5  ;;  %v3070_v12 = vld [vmem:[#allocation2 + $0x90] sm:$0xf] }
 0x255   :  { %v2753_v9 = vmax.f32 %v2721_v30, %v2737_v21  ;;  %v3846_v30 = vrot.slane %v8138_v26, 5 }
 0x256   :  { %6139 = vmatmul.mubr.msk.bf16.gmra.mrb[84].mxu1 %vm441_vm5, %v8235_v25  ;;  %v2875_v33 = vshrl.u32 %v5763_v29, 16  ;;  %v8300_v26 = vsel %vm6814_vm3, %v5647_v32, %v3842_v49 }
 0x257   :  { %6142 = vmatprep.mubr.msk.bf16.mxu1 %vm441_vm5, %v5654_v3  ;;  %6153 = vmatmul.mubr.msk.bf16.vlgmr.msra.gmra.mrb[96].mxu0 %vm441_vm5, %v5668_v48  ;;  %v8274_v48 = vsel %vm6814_vm3, %v5646_v23, %v3838_v63  ;;  %v5771_v42 = vpack.c.bf16 %v2753_v9, %v2753_v9  ;;  %v8304_v9 = vsel %vm6814_vm3, %v5648_v15, %v3846_v30  ;;  %v8965_v15 = vld [vmem:[#allocation12_spill] sm:$0xff]  ;;  %v8967_v30 = vld [vmem:[#allocation10_spill] sm:$0xff] }
 0x258   :  { %6156 = vmatprep.mubr.msk.bf16.mxu0 %vm441_vm5, %v5669_v62  ;;  %6187 = vmatpush3.bf16.msra.mxu0 %v4507_v27  ;;  %v2877_v56 = vrot.slane %v2875_v33, 7  ;;  %v2878_v62 = vshll.u32 %v5763_v29, 16  ;;  %v8280_v27 = vcombine.low %v8262_v20, %v8266_v46  ;;  %v8284_v2 = vcombine.low %v8270_v45, %v8274_v48  ;;  %v3073_v29 = vld [vmem:[#allocation2 + $0x94] sm:$0x1] }
 0x259   :  { %6274 = vmatprep.subr.msk.bf16.mxu0 %vm3213_vm0, %v8255_v24  ;;  %v2939_v7 = vshrl.u32 %v5771_v42, 16  ;;  %v2942_v63 = vshll.u32 %v5771_v42, 16  ;;  %v5686_v51 = vcombine.low %v8965_v15, %v7985_v55 }
 0x25a   :  { %v2880_v0 = vor.u32 %v2878_v62, %v2877_v56  ;;  %v2881_v3 = vrot.slane %v2877_v56, 4 }
 0x25b   :  { %v2941_v23 = vrot.slane %v2939_v7, 7 }
 0x25c   :  { %v3023_v16 = vsel %vm6401_vm7, %v2880_v0, %v3022_v59  ;;  %v3026_v43 = vsel %vm6381_vm4, %v2881_v3, %v3025_v53  ;;  %v8312_v59 = vcombine.low %v8300_v26, %v8304_v9 }
 0x25d   :  { %3024 = vst [vmem:[#allocation2 + $0x40] sm:$0xf] %v3023_v16  ;;  %3027 = vst [vmem:[#allocation2 + $0x44] sm:$0x1] %v3026_v43  ;;  %v2944_v21 = vor.u32 %v2942_v63, %v2941_v23  ;;  %v2945_v33 = vrot.slane %v2941_v23, 4  ;;  %v4669_v16 = vsel %vm3213_vm0, %v8207_v50, 0  ;;  %v5673_v50 = vcombine.low %v8031_v8, %v8063_v19 }
 0x25e   :  { %6143 = vmatmul.mubr.msk.bf16.gmra.mrb[88].mxu1 %vm441_vm5, %v8280_v27  ;;  %v8969_v19 = vld [vmem:[#allocation15_spill] sm:$0xff] }
 0x25f   :  { %6146 = vmatprep.mubr.msk.bf16.mxu1 %vm441_vm5, %v8284_v2  ;;  %v3071_v56 = vsel %vm6401_vm7, %v2944_v21, %v3070_v12  ;;  %v3074_v62 = vsel %vm6381_vm4, %v2945_v33, %v3073_v29  ;;  %v5688_v12 = vcombine.low %v8969_v19, %v8068_v37  ;;  %v5689_v37 = vcombine.low %v8078_v22, %v8097_v41 }
 0x260   :  { %3072 = vst [vmem:[#allocation2 + $0x90] sm:$0xf] %v3071_v56  ;;  %3075 = vst [vmem:[#allocation2 + $0x94] sm:$0x1] %v3074_v62  ;;  %v5703_v56 = vcombine.low %v8103_v57, %v8153_v35  ;;  %v4857_v57 = vsel %vm3213_vm0, %v8255_v24, 0  ;;  %v5705_v35 = vcombine.low %v8171_v14, %v8202_v60  ;;  %v5707_v60 = vcombine.low %v8225_v54, %v8262_v20  ;;  %v8971_v24 = vld [vmem:[#allocation14_spill] sm:$0xff] }
 0x264   :  { %v8314_v42 = vld [vmem:[#allocation2 + $0x40] sm:$0xf]  ;;  %v3109_v3 = vld [vmem:[#allocation2 + $0x44] sm:$0x1] }
 0x265   :  { %v5670_v53 = vcombine.low %v7858_v10, %v8314_v42  ;;  %v4233_v18 = vshrl.u32 %v8314_v42, 16  ;;  %v4236_v0 = vshll.u32 %v8314_v42, 16  ;;  %v4242_v7 = vshll.u32 %v3109_v3, 16 }
 0x266   :  { %6147 = vmatmul.mubr.msk.bf16.gmra.mrb[92].mxu1 %vm441_vm5, %v8312_v59  ;;  %v4448_v22 = vrot.slane %v3109_v3, 5  ;;  %v5027_v3 = vsel %vm3213_vm0, %v5743_v40, 0 }
 0x267   :  { %6170 = vmatprep.mubr.msk.bf16.mxu1 %vm441_vm5, %v5684_v47  ;;  %6157 = vmatmul.mubr.msk.bf16.gmra.mrb[100].mxu0 %vm441_vm5, %v5670_v53  ;;  %v4235_v32 = vrot.slane %v4233_v18, 4  ;;  %v4238_v10 = vrot.slane %v4236_v0, 5  ;;  %v8966_v47 = vld [vmem:[#allocation20_spill] sm:$0xff]  ;;  %v4244_v55 = vrot.slane %v4242_v7, 5  ;;  %v8970_v18 = vld [vmem:[#allocation22_spill] sm:$0xff] }
 0x268   :  { %6160 = vmatprep.mubr.msk.bf16.mxu0 %vm441_vm5, %v5671_v4  ;;  %v8968_v43 = vcombine.low %v8966_v47, %v8967_v30  ;;  %v8343_v23 = vld [vmem:[#allocation2 + $0x90] sm:$0xf]  ;;  %v3129_v62 = vld [vmem:[#allocation2 + $0x94] sm:$0x1]  ;;  %v5704_v4 = vcombine.low %v8157_v38, %v8161_v36  ;;  %v3110_v7 = vld [vmem:[#allocation2 + $0x48] sm:$0xf] }
 0x269   :  { %v4239_v49 = vor.u32 %v4238_v10, %v4235_v32  ;;  %v4247_v44 = vshrl.u32 %v8343_v23, 16  ;;  %v4250_v63 = vshll.u32 %v8343_v23, 16  ;;  %v5674_v33 = vcombine.low %v8117_v28, %v8343_v23  ;;  %v8972_v10 = vld [vmem:[#allocation19_spill] sm:$0xff] }
 0x26a   :  { %v4256_v53 = vshll.u32 %v3129_v62, 16  ;;  %v5690_v28 = vcombine.low %v8970_v18, %v8166_v5  ;;  %v5700_v32 = vrot.slane %v8314_v42, 9  ;;  %v5701_v54 = vrot.slane %v8343_v23, 9 }
 0x26b   :  { %v4240_v39 = vrot.slane %v4239_v49, 4  ;;  %v4249_v29 = vrot.slane %v4247_v44, 4  ;;  %v4252_v21 = vrot.slane %v4250_v63, 5  ;;  %v4452_v20 = vrot.slane %v3129_v62, 5  ;;  %v8973_v49 = vld [vmem:[#allocation18_spill] sm:$0xff]  ;;  %v8979_v63 = vld [vmem:[#allocation17_spill] sm:$0xff] }
 0x26c   :  { %v4258_v41 = vrot.slane %v4256_v53, 5  ;;  %v8390_v36 = vsel %vm6814_vm3, %v5700_v32, %v4448_v22  ;;  %v5720_v15 = vcombine.low %v8314_v42, %v3110_v7  ;;  %v8977_v42 = vld [vmem:[#allocation23_spill] sm:$0xff]  ;;  %v3130_v44 = vld [vmem:[#allocation2 + $0x98] sm:$0xf]  ;;  %v5741_v18 = vrot.slane %v3110_v7, 9  ;;  %v3134_v32 = vld [vmem:[#allocation3 + $0x10] sm:$0xff] }
 0x26d   :  { %v8353_v13 = vsel %vm6581_vm15, %v4240_v39, %v4244_v55  ;;  %v5706_v14 = vcombine.low %v8213_v52, %v8390_v36  ;;  %v5709_v52 = vcombine.low %v8274_v48, %v8300_v26  ;;  %v8974_v26 = vld [vmem:[#allocation16_spill] sm:$0xff]  ;;  %v8978_v55 = vld [vmem:[#allocation11_spill] sm:$0xff]  ;;  %v4815_v19 = vshrl.u32 %v3130_v44, 16  ;;  %v8980_v62 = vld [vmem:[#allocation21_spill] sm:$0xff] }
 0x26e   :  { %6171 = vmatmul.mubr.msk.bf16.vlgmr.msra.gmra.mrb[96].mxu1 %vm441_vm5, %v8968_v43  ;;  %v5687_v8 = vcombine.low %v8005_v58, %v8353_v13  ;;  %v4253_v58 = vor.u32 %v4252_v21, %v4249_v29  ;;  %v8976_v43 = vld [vmem:[#allocation13_spill] sm:$0xff]  ;;  %v5721_v29 = vcombine.low %v8343_v23, %v3130_v44  ;;  %v3132_v22 = vld [vmem:[#allocation3] sm:$0xff] }
 0x26f   :  { %6205 = vmatpush3.bf16.msra.mxu1 %v4669_v16  ;;  %6174 = vmatprep.mubr.msk.bf16.mxu1 %vm441_vm5, %v5686_v51  ;;  %v4804_v16 = vshll.u32 %v3110_v7, 16 }
 0x270   :  { %6161 = vmatmul.mubr.msk.bf16.gmra.mrb[104].mxu0 %vm441_vm5, %v5672_v61  ;;  %6275 = vmatprep.subr.msk.bf16.mxu1 %vm3213_vm0, %v5743_v40  ;;  %v4254_v0 = vrot.slane %v4253_v58, 4  ;;  %v8975_v40 = vld [vmem:[#allocation8_spill] sm:$0xff]  ;;  %v3111_v61 = vld [vmem:[#allocation2 + $0x4c] sm:$0x1]  ;;  %v3131_v58 = vld [vmem:[#allocation2 + $0x9c] sm:$0x1] }
 0x271   :  { %6164 = vmatprep.mubr.msk.bf16.mxu0 %vm441_vm5, %v5673_v50  ;;  %v4806_v39 = vrot.slane %v4804_v16, 5  ;;  %v4810_v30 = vshll.u32 %v3111_v61, 16 }
 0x272   :  { %v8386_v38 = vsel %vm6581_vm15, %v4254_v0, %v4258_v41 }
 0x273   :  { %v5691_v5 = vcombine.low %v8185_v6, %v8386_v38  ;;  %v5708_v6 = vcombine.low %v8266_v46, %v8270_v45  ;;  %v4453_v46 = vsel %vm6814_vm3, %v5701_v54, %v4452_v20  ;;  %v4801_v45 = vshrl.u32 %v3110_v7, 16  ;;  %v3137_v20 = vld [vmem:[#allocation3 + $0x28] sm:$0xff] }
 0x274   :  { %v5710_v48 = vcombine.low %v8304_v9, %v4453_v46  ;;  %v4812_v50 = vrot.slane %v4810_v30, 5 }
 0x275   :  { %v4803_v51 = vrot.slane %v4801_v45, 4 }
 0x276   :  { %6175 = vmatmul.mubr.msk.bf16.gmra.mrb[100].mxu1 %vm441_vm5, %v5687_v8 }
 0x277   :  { %6178 = vmatprep.mubr.msk.bf16.mxu1 %vm441_vm5, %v5688_v12  ;;  %v4807_v47 = vor.u32 %v4806_v39, %v4803_v51  ;;  %v4818_v12 = vshll.u32 %v3130_v44, 16 }
 0x278   :  { %6165 = vmatmul.mubr.msk.bf16.gmra.mrb[108].mxu0 %vm441_vm5, %v5674_v33  ;;  %v4817_v33 = vrot.slane %v4815_v19, 4 }
 0x279   :  { %6188 = vmatprep.mubr.msk.bf16.mxu0 %vm441_vm5, %v5703_v56  ;;  %v4808_v9 = vrot.slane %v4807_v47, 4  ;;  %v4820_v56 = vrot.slane %v4818_v12, 5 }
 0x27b   :  { %v4813_v8 = vsel %vm6581_vm15, %v4808_v9, %v4812_v50  ;;  %v4821_v53 = vor.u32 %v4820_v56, %v4817_v33  ;;  %v3142_v50 = vld [vmem:[#allocation3 + $0x50] sm:$0xff]  ;;  %v3141_v33 = vld [vmem:[#allocation3 + $0x48] sm:$0xff] }
 0x27c   :  { %v5731_v21 = vcombine.low %v8353_v13, %v4813_v8  ;;  %v3143_v8 = vld [vmem:[#allocation3 + $0x58] sm:$0xff] }
 0x27d   :  { %v4822_v23 = vrot.slane %v4821_v53, 4 }
 0x27e   :  { %6179 = vmatmul.mubr.msk.bf16.gmra.mrb[104].mxu1 %vm441_vm5, %v5689_v37  ;;  %v4824_v37 = vshll.u32 %v3131_v58, 16 }
 0x27f   :  { %6182 = vmatprep.mubr.msk.bf16.mxu1 %vm441_vm5, %v5690_v28  ;;  %v4992_v28 = vrot.slane %v3111_v61, 5 }
 0x280   :  { %6189 = vmatmul.mubr.msk.bf16.vlgmr.msra.gmra.mrb[112].mxu0 %vm441_vm5, %v5704_v4  ;;  %v4826_v13 = vrot.slane %v4824_v37, 5 }
 0x281   :  { %6192 = vmatprep.mubr.msk.bf16.mxu0 %vm441_vm5, %v5705_v35  ;;  %6223 = vmatpush3.bf16.msra.mxu0 %v4857_v57  ;;  %v4993_v0 = vsel %vm6814_vm3, %v5741_v18, %v4992_v28  ;;  %v4996_v35 = vrot.slane %v3131_v58, 5 }
 0x282   :  { %v4827_v4 = vsel %vm6581_vm15, %v4822_v23, %v4826_v13  ;;  %v5744_v57 = vcombine.low %v8390_v36, %v4993_v0 }
 0x286   :  { %6183 = vmatmul.mubr.msk.bf16.gmra.mrb[108].mxu1 %vm441_vm5, %v5691_v5  ;;  %v3133_v5 = vld [vmem:[#allocation3 + $0x8] sm:$0xff] }
 0x287   :  { %6206 = vmatprep.mubr.msk.bf16.mxu1 %vm441_vm5, %v8971_v24 }
 0x288   :  { %6193 = vmatmul.mubr.msk.bf16.gmra.mrb[116].mxu0 %vm441_vm5, %v5706_v14 }
 0x289   :  { %6196 = vmatprep.mubr.msk.bf16.mxu0 %vm441_vm5, %v5707_v60 }
 0x28e   :  { %6207 = vmatmul.mubr.msk.bf16.vlgmr.msra.gmra.mrb[112].mxu1 %vm441_vm5, %v8972_v10  ;;  %v3139_v10 = vld [vmem:[#allocation3 + $0x38] sm:$0xff] }
 0x28f   :  { %6241 = vmatpush3.bf16.msra.mxu1 %v5027_v3  ;;  %6210 = vmatprep.mubr.msk.bf16.mxu1 %vm441_vm5, %v8973_v49  ;;  %v3136_v3 = vld [vmem:[#allocation3 + $0x20] sm:$0xff] }
 0x290   :  { %6197 = vmatmul.mubr.msk.bf16.gmra.mrb[120].mxu0 %vm441_vm5, %v5708_v6 }
 0x291   :  { %6200 = vmatprep.mubr.msk.bf16.mxu0 %vm441_vm5, %v5709_v52 }
 0x296   :  { %6211 = vmatmul.mubr.msk.bf16.gmra.mrb[116].mxu1 %vm441_vm5, %v5720_v15 }
 0x297   :  { %6214 = vmatprep.mubr.msk.bf16.mxu1 %vm441_vm5, %v8974_v26 }
 0x298   :  { %6201 = vmatmul.mubr.msk.bf16.gmra.mrb[124].mxu0 %vm441_vm5, %v5710_v48 }
 0x299   :  { %6224 = vmatprep.mubr.msk.bf16.mxu0 %vm441_vm5, %v8975_v40 }
 0x29e   :  { %6215 = vmatmul.mubr.msk.bf16.gmra.mrb[120].mxu1 %vm441_vm5, %v8976_v43 }
 0x29f   :  { %6218 = vmatprep.mubr.msk.bf16.mxu1 %vm441_vm5, %v8977_v42 }
 0x2a0   :  { %6225 = vmatmul.mubr.msk.bf16.vlgmr.msra.gmra.mrb[128].mxu0 %vm441_vm5, %v8978_v55  ;;  %v3140_v55 = vld [vmem:[#allocation3 + $0x40] sm:$0xff] }
 0x2a1   :  { %6228 = vmatprep.mubr.msk.bf16.mxu0 %vm441_vm5, %v8979_v63 }
 0x2a6   :  { %6219 = vmatmul.mubr.msk.bf16.gmra.mrb[124].mxu1 %vm441_vm5, %v5721_v29 }
 0x2a7   :  { %6242 = vmatprep.mubr.msk.bf16.mxu1 %vm441_vm5, %v8181_v1  ;;  %v8981_v1 = vld [vmem:[#allocation24_spill] sm:$0xff] }
 0x2a8   :  { %6229 = vmatmul.mubr.msk.bf16.gmra.mrb[132].mxu0 %vm441_vm5, %v5731_v21 }
 0x2a9   :  { %6232 = vmatprep.mubr.msk.bf16.mxu0 %vm441_vm5, %v8980_v62 }
 0x2ae   :  { %6243 = vmatmul.mubr.msk.bf16.vlgmr.msra.gmra.mrb[128].mxu1 %vm441_vm5, %v8198_v11  ;;  %v5732_v11 = vcombine.low %v8386_v38, %v4827_v4 }
 0x2af   :  { %6246 = vmatprep.mubr.msk.bf16.mxu1 %vm441_vm5, %v8235_v25  ;;  %v5742_v25 = vrot.slane %v3130_v44, 9 }
 0x2b0   :  { %6233 = vmatmul.mubr.msk.bf16.gmra.mrb[136].mxu0 %vm441_vm5, %v8981_v1 }
 0x2b1   :  { %6236 = vmatprep.mubr.msk.bf16.mxu0 %vm441_vm5, %v8191_v31  ;;  %v4997_v34 = vsel %vm6814_vm3, %v5742_v25, %v4996_v35 }
 0x2b2   :  { %v5745_v31 = vcombine.low %v4453_v46, %v4997_v34 }
 0x2b6   :  { %6247 = vmatmul.mubr.msk.bf16.gmra.mrb[132].mxu1 %vm441_vm5, %v5744_v57 }
 0x2b7   :  { %6250 = vmatprep.mubr.msk.bf16.mxu1 %vm441_vm5, %v8280_v27  ;;  %v3135_v27 = vld [vmem:[#allocation3 + $0x18] sm:$0xff] }
 0x2b8   :  { %6237 = vmatmul.mubr.msk.bf16.gmra.mrb[140].mxu0 %vm441_vm5, %v5732_v11 }
 0x2be   :  { %6251 = vmatmul.mubr.msk.bf16.gmra.mrb[136].mxu1 %vm441_vm5, %v8284_v2 }
 0x2bf   :  { %6254 = vmatprep.mubr.msk.bf16.mxu1 %vm441_vm5, %v8312_v59  ;;  %v3138_v59 = vld [vmem:[#allocation3 + $0x30] sm:$0xff] }
 0x2c6   :  { %6255 = vmatmul.mubr.msk.bf16.gmra.mrb[140].mxu1 %vm441_vm5, %v5745_v31 }
 0x2e0   :  { %v6100_v41 = vpop.f32.mrb[64].mxu1 }
 0x2e1   :  { %v3316_v38 = vadd.f32 %v6100_v41, %v3134_v32  ;;  %v3251_v36 = vpop.f32.mrb[65].mxu1 }
 0x2e2   :  { %v3314_v14 = vadd.f32 %v3251_v36, %v3132_v22  ;;  %v6101_v60 = vpop.f32.mrb[66].mxu1 }
 0x2e3   :  { %3332 = vst.msk [vmem:[#allocation3 + $0x10] sm:$0xff] %vm441_vm5, %v3316_v38  ;;  %v3317_v2 = vadd.f32 %v6101_v60, %v3135_v27  ;;  %v3254_v24 = vpop.f32.mrb[67].mxu1  ;;  %v3146_v60 = vld [vmem:[#allocation3 + $0x70] sm:$0xff] }
 0x2e4   :  { %3330 = vst.msk [vmem:[#allocation3] sm:$0xff] %vm441_vm5, %v3314_v14  ;;  %v3315_v17 = vadd.f32 %v3254_v24, %v3133_v5 }
 0x2e5   :  { %3333 = vst.msk [vmem:[#allocation3 + $0x18] sm:$0xff] %vm441_vm5, %v3317_v2  ;;  %v3144_v2 = vld [vmem:[#allocation3 + $0x60] sm:$0xff] }
 0x2e6   :  { %3331 = vst.msk [vmem:[#allocation3 + $0x8] sm:$0xff] %vm441_vm5, %v3315_v17  ;;  %v3147_v17 = vld [vmem:[#allocation3 + $0x78] sm:$0xff] }
 0x2e8   :  { %v6104_v6 = vpop.f32.mrb[68].mxu1 }
 0x2e9   :  { %v3320_v52 = vadd.f32 %v6104_v6, %v3138_v59  ;;  %v3267_v54 = vpop.f32.mrb[69].mxu1  ;;  %v3145_v6 = vld [vmem:[#allocation3 + $0x68] sm:$0xff] }
 0x2ea   :  { %v3318_v49 = vadd.f32 %v3267_v54, %v3136_v3  ;;  %v6105_v7 = vpop.f32.mrb[70].mxu1  ;;  %v3572_v46 = vld [vmem:[#allocation3 + $0x10] sm:$0xff] }
 0x2eb   :  { %3336 = vst.msk [vmem:[#allocation3 + $0x30] sm:$0xff] %vm441_vm5, %v3320_v52  ;;  %v3321_v45 = vadd.f32 %v6105_v7, %v3139_v10  ;;  %v3270_v16 = vpop.f32.mrb[71].mxu1  ;;  %v3570_v15 = vld [vmem:[#allocation3] sm:$0xff] }
 0x2ec   :  { %3334 = vst.msk [vmem:[#allocation3 + $0x20] sm:$0xff] %vm441_vm5, %v3318_v49  ;;  %v3319_v48 = vadd.f32 %v3270_v16, %v3137_v20  ;;  %v3573_v51 = vld [vmem:[#allocation3 + $0x18] sm:$0xff] }
 0x2ed   :  { %v6118_v26 = vpop.f32.mrb[80].mxu0  ;;  %3337 = vst.msk [vmem:[#allocation3 + $0x38] sm:$0xff] %vm441_vm5, %v3321_v45  ;;  %v3571_v61 = vld [vmem:[#allocation3 + $0x8] sm:$0xff] }
 0x2ee   :  { %v3738_v39 = vadd.f32 %v6118_v26, %v3572_v46  ;;  %v3673_v40 = vpop.f32.mrb[81].mxu0  ;;  %3335 = vst.msk [vmem:[#allocation3 + $0x28] sm:$0xff] %vm441_vm5, %v3319_v48 }
 0x2ef   :  { %v3736_v47 = vadd.f32 %v3673_v40, %v3570_v15  ;;  %v6119_v30 = vpop.f32.mrb[82].mxu0 }
 0x2f0   :  { %3754 = vst.msk [vmem:[#allocation3 + $0x10] sm:$0xff] %vm441_vm5, %v3738_v39  ;;  %v3739_v43 = vadd.f32 %v6119_v30, %v3573_v51  ;;  %v3676_v42 = vpop.f32.mrb[83].mxu0 }
 0x2f1   :  { %3752 = vst.msk [vmem:[#allocation3] sm:$0xff] %vm441_vm5, %v3736_v47  ;;  %v3737_v9 = vadd.f32 %v3676_v42, %v3571_v61 }
 0x2f2   :  { %3755 = vst.msk [vmem:[#allocation3 + $0x18] sm:$0xff] %vm441_vm5, %v3739_v43  ;;  %v3576_v44 = vld [vmem:[#allocation3 + $0x30] sm:$0xff] }
 0x2f3   :  { %3753 = vst.msk [vmem:[#allocation3 + $0x8] sm:$0xff] %vm441_vm5, %v3737_v9  ;;  %v3574_v19 = vld [vmem:[#allocation3 + $0x20] sm:$0xff] }
 0x2f4   :  { %v3577_v56 = vld [vmem:[#allocation3 + $0x38] sm:$0xff] }
 0x2f5   :  { %v3575_v18 = vld [vmem:[#allocation3 + $0x28] sm:$0xff] }
 0x2f7   :  { %v3850_v7 = vld [vmem:[#allocation3 + $0x10] sm:$0xff] }
 0x2f8   :  { %v3848_v15 = vld [vmem:[#allocation3] sm:$0xff] }
 0x2f9   :  { %v3851_v40 = vld [vmem:[#allocation3 + $0x18] sm:$0xff] }
 0x2fa   :  { %v3849_v9 = vld [vmem:[#allocation3 + $0x8] sm:$0xff] }
 0x301   :  { %v6108_v63 = vpop.f32.mrb[72].mxu1 }
 0x302   :  { %v3324_v12 = vadd.f32 %v6108_v63, %v3142_v50  ;;  %v3283_v29 = vpop.f32.mrb[73].mxu1  ;;  %v6122_v21 = vpop.f32.mrb[84].mxu0 }
 0x303   :  { %v3322_v62 = vadd.f32 %v3283_v29, %v3140_v55  ;;  %v3742_v58 = vadd.f32 %v6122_v21, %v3576_v44  ;;  %v6109_v53 = vpop.f32.mrb[74].mxu1  ;;  %v3689_v37 = vpop.f32.mrb[85].mxu0 }
 0x304   :  { %3340 = vst.msk [vmem:[#allocation3 + $0x50] sm:$0xff] %vm441_vm5, %v3324_v12  ;;  %v3325_v28 = vadd.f32 %v6109_v53, %v3143_v8  ;;  %v3740_v23 = vadd.f32 %v3689_v37, %v3574_v19  ;;  %v3286_v13 = vpop.f32.mrb[75].mxu1  ;;  %v6123_v1 = vpop.f32.mrb[86].mxu0 }
 0x305   :  { %3338 = vst.msk [vmem:[#allocation3 + $0x40] sm:$0xff] %vm441_vm5, %v3322_v62  ;;  %3758 = vst.msk [vmem:[#allocation3 + $0x30] sm:$0xff] %vm441_vm5, %v3742_v58  ;;  %v3323_v0 = vadd.f32 %v3286_v13, %v3141_v33  ;;  %v3743_v4 = vadd.f32 %v6123_v1, %v3577_v56  ;;  %v3692_v57 = vpop.f32.mrb[87].mxu0 }
 0x306   :  { %3341 = vst.msk [vmem:[#allocation3 + $0x58] sm:$0xff] %vm441_vm5, %v3325_v28  ;;  %3756 = vst.msk [vmem:[#allocation3 + $0x20] sm:$0xff] %vm441_vm5, %v3740_v23  ;;  %v3741_v11 = vadd.f32 %v3692_v57, %v3575_v18 }
 0x307   :  { %3339 = vst.msk [vmem:[#allocation3 + $0x48] sm:$0xff] %vm441_vm5, %v3323_v0  ;;  %3759 = vst.msk [vmem:[#allocation3 + $0x38] sm:$0xff] %vm441_vm5, %v3743_v4 }
 0x308   :  { %3757 = vst.msk [vmem:[#allocation3 + $0x28] sm:$0xff] %vm441_vm5, %v3741_v11 }
 0x30b   :  { %v3580_v25 = vld [vmem:[#allocation3 + $0x50] sm:$0xff] }
 0x30c   :  { %v3578_v35 = vld [vmem:[#allocation3 + $0x40] sm:$0xff]  ;;  %v3854_v21 = vld [vmem:[#allocation3 + $0x30] sm:$0xff] }
 0x30d   :  { %v3581_v31 = vld [vmem:[#allocation3 + $0x58] sm:$0xff]  ;;  %v3852_v62 = vld [vmem:[#allocation3 + $0x20] sm:$0xff] }
 0x30e   :  { %v3579_v41 = vld [vmem:[#allocation3 + $0x48] sm:$0xff]  ;;  %v3855_v28 = vld [vmem:[#allocation3 + $0x38] sm:$0xff] }
 0x30f   :  { %v3853_v57 = vld [vmem:[#allocation3 + $0x28] sm:$0xff] }
 0x311   :  { %v6126_v34 = vpop.f32.mrb[88].mxu0 }
 0x312   :  { %v3746_v32 = vadd.f32 %v6126_v34, %v3580_v25  ;;  %v3705_v22 = vpop.f32.mrb[89].mxu0 }
 0x313   :  { %v3744_v27 = vadd.f32 %v3705_v22, %v3578_v35  ;;  %v6127_v38 = vpop.f32.mrb[90].mxu0 }
 0x314   :  { %3762 = vst.msk [vmem:[#allocation3 + $0x50] sm:$0xff] %vm441_vm5, %v3746_v32  ;;  %v3747_v36 = vadd.f32 %v6127_v38, %v3581_v31  ;;  %v3708_v5 = vpop.f32.mrb[91].mxu0 }
 0x315   :  { %3760 = vst.msk [vmem:[#allocation3 + $0x40] sm:$0xff] %vm441_vm5, %v3744_v27  ;;  %v3745_v14 = vadd.f32 %v3708_v5, %v3579_v41 }
 0x316   :  { %3763 = vst.msk [vmem:[#allocation3 + $0x58] sm:$0xff] %vm441_vm5, %v3747_v36 }
 0x317   :  { %3761 = vst.msk [vmem:[#allocation3 + $0x48] sm:$0xff] %vm441_vm5, %v3745_v14 }
 0x319   :  { %v6112_v24 = vpop.f32.mrb[76].mxu1 }
 0x31a   :  { %v3328_v59 = vadd.f32 %v6112_v24, %v3146_v60  ;;  %v3299_v3 = vpop.f32.mrb[77].mxu1 }
 0x31b   :  { %v3326_v10 = vadd.f32 %v3299_v3, %v3144_v2  ;;  %v6113_v52 = vpop.f32.mrb[78].mxu1  ;;  %v3858_v38 = vld [vmem:[#allocation3 + $0x50] sm:$0xff] }
 0x31c   :  { %3344 = vst.msk [vmem:[#allocation3 + $0x70] sm:$0xff] %vm441_vm5, %v3328_v59  ;;  %v3329_v54 = vadd.f32 %v6113_v52, %v3147_v17  ;;  %v3302_v20 = vpop.f32.mrb[79].mxu1  ;;  %v3856_v14 = vld [vmem:[#allocation3 + $0x40] sm:$0xff] }
 0x31d   :  { %3342 = vst.msk [vmem:[#allocation3 + $0x60] sm:$0xff] %vm441_vm5, %v3326_v10  ;;  %v3327_v49 = vadd.f32 %v3302_v20, %v3145_v6  ;;  %v3859_v24 = vld [vmem:[#allocation3 + $0x58] sm:$0xff] }
 0x31e   :  { %3345 = vst.msk [vmem:[#allocation3 + $0x78] sm:$0xff] %vm441_vm5, %v3329_v54  ;;  %v3857_v3 = vld [vmem:[#allocation3 + $0x48] sm:$0xff] }
 0x31f   :  { %3343 = vst.msk [vmem:[#allocation3 + $0x68] sm:$0xff] %vm441_vm5, %v3327_v49 }
 0x321   :  { %v6136_v46 = vpop.f32.mrb[80].mxu1 }
 0x322   :  { %v4016_v45 = vadd.f32 %v6136_v46, %v3850_v7  ;;  %v6130_v16 = vpop.f32.mrb[92].mxu0  ;;  %v3951_v48 = vpop.f32.mrb[81].mxu1 }
 0x323   :  { %v3584_v26 = vld [vmem:[#allocation3 + $0x70] sm:$0xff]  ;;  %v4014_v51 = vadd.f32 %v3951_v48, %v3848_v15  ;;  %v3721_v39 = vpop.f32.mrb[93].mxu0  ;;  %v6137_v61 = vpop.f32.mrb[82].mxu1 }
 0x324   :  { %4032 = vst.msk [vmem:[#allocation3 + $0x10] sm:$0xff] %vm441_vm5, %v4016_v45  ;;  %v3750_v47 = vadd.f32 %v6130_v16, %v3584_v26  ;;  %v3582_v30 = vld [vmem:[#allocation3 + $0x60] sm:$0xff]  ;;  %v4017_v43 = vadd.f32 %v6137_v61, %v3851_v40  ;;  %v6131_v42 = vpop.f32.mrb[94].mxu0  ;;  %v3954_v50 = vpop.f32.mrb[83].mxu1 }
 0x325   :  { %4030 = vst.msk [vmem:[#allocation3] sm:$0xff] %vm441_vm5, %v4014_v51  ;;  %v3748_v55 = vadd.f32 %v3721_v39, %v3582_v30  ;;  %v3585_v44 = vld [vmem:[#allocation3 + $0x78] sm:$0xff]  ;;  %v4015_v63 = vadd.f32 %v3954_v50, %v3849_v9  ;;  %v3724_v8 = vpop.f32.mrb[95].mxu0 }
 0x326   :  { %3766 = vst.msk [vmem:[#allocation3 + $0x70] sm:$0xff] %vm441_vm5, %v3750_v47  ;;  %4033 = vst.msk [vmem:[#allocation3 + $0x18] sm:$0xff] %vm441_vm5, %v4017_v43  ;;  %v3751_v19 = vadd.f32 %v6131_v42, %v3585_v44  ;;  %v3583_v12 = vld [vmem:[#allocation3 + $0x68] sm:$0xff] }
 0x327   :  { %3764 = vst.msk [vmem:[#allocation3 + $0x60] sm:$0xff] %vm441_vm5, %v3748_v55  ;;  %4031 = vst.msk [vmem:[#allocation3 + $0x8] sm:$0xff] %vm441_vm5, %v4015_v63  ;;  %v3749_v29 = vadd.f32 %v3724_v8, %v3583_v12 }
 0x328   :  { %3767 = vst.msk [vmem:[#allocation3 + $0x78] sm:$0xff] %vm441_vm5, %v3751_v19 }
 0x329   :  { %3765 = vst.msk [vmem:[#allocation3 + $0x68] sm:$0xff] %vm441_vm5, %v3749_v29  ;;  %v6140_v33 = vpop.f32.mrb[84].mxu1 }
 0x32a   :  { %v4020_v56 = vadd.f32 %v6140_v33, %v3854_v21  ;;  %v3967_v58 = vpop.f32.mrb[85].mxu1  ;;  %v6154_v53 = vpop.f32.mrb[96].mxu0 }
 0x32b   :  { %v4018_v37 = vadd.f32 %v3967_v58, %v3852_v62  ;;  %v4048_v18 = vld [vmem:[#allocation3 + $0x10] sm:$0xff]  ;;  %v6141_v23 = vpop.f32.mrb[86].mxu1  ;;  %v4137_v13 = vpop.f32.mrb[97].mxu0 }
 0x32c   :  { %4036 = vst.msk [vmem:[#allocation3 + $0x30] sm:$0xff] %vm441_vm5, %v4020_v56  ;;  %v4202_v1 = vadd.f32 %v6154_v53, %v4048_v18  ;;  %v4021_v0 = vadd.f32 %v6141_v23, %v3855_v28  ;;  %v4046_v4 = vld [vmem:[#allocation3] sm:$0xff]  ;;  %v3970_v11 = vpop.f32.mrb[87].mxu1  ;;  %v6155_v25 = vpop.f32.mrb[98].mxu0 }
 0x32d   :  { %4034 = vst.msk [vmem:[#allocation3 + $0x20] sm:$0xff] %vm441_vm5, %v4018_v37  ;;  %v4200_v35 = vadd.f32 %v4137_v13, %v4046_v4  ;;  %v4019_v34 = vadd.f32 %v3970_v11, %v3853_v57  ;;  %v4049_v31 = vld [vmem:[#allocation3 + $0x18] sm:$0xff]  ;;  %v4140_v32 = vpop.f32.mrb[99].mxu0  ;;  %v3862_v54 = vld [vmem:[#allocation3 + $0x70] sm:$0xff] }
 0x32e   :  { %4218 = vst.msk [vmem:[#allocation3 + $0x10] sm:$0xff] %vm441_vm5, %v4202_v1  ;;  %4037 = vst.msk [vmem:[#allocation3 + $0x38] sm:$0xff] %vm441_vm5, %v4021_v0  ;;  %v4203_v22 = vadd.f32 %v6155_v25, %v4049_v31  ;;  %v4047_v41 = vld [vmem:[#allocation3 + $0x8] sm:$0xff]  ;;  %v3860_v46 = vld [vmem:[#allocation3 + $0x60] sm:$0xff] }
 0x32f   :  { %4216 = vst.msk [vmem:[#allocation3] sm:$0xff] %vm441_vm5, %v4200_v35  ;;  %4035 = vst.msk [vmem:[#allocation3 + $0x28] sm:$0xff] %vm441_vm5, %v4019_v34  ;;  %v4201_v27 = vadd.f32 %v4140_v32, %v4047_v41  ;;  %v3863_v26 = vld [vmem:[#allocation3 + $0x78] sm:$0xff] }
 0x330   :  { %4219 = vst.msk [vmem:[#allocation3 + $0x18] sm:$0xff] %vm441_vm5, %v4203_v22  ;;  %v3861_v30 = vld [vmem:[#allocation3 + $0x68] sm:$0xff] }
 0x331   :  { %4217 = vst.msk [vmem:[#allocation3 + $0x8] sm:$0xff] %vm441_vm5, %v4201_v27  ;;  %v6144_v36 = vpop.f32.mrb[88].mxu1 }
 0x332   :  { %v4024_v5 = vadd.f32 %v6144_v36, %v3858_v38  ;;  %v3983_v60 = vpop.f32.mrb[89].mxu1 }
 0x333   :  { %v4022_v2 = vadd.f32 %v3983_v60, %v3856_v14  ;;  %v6145_v17 = vpop.f32.mrb[90].mxu1  ;;  %v4052_v52 = vld [vmem:[#allocation3 + $0x30] sm:$0xff] }
 0x334   :  { %4040 = vst.msk [vmem:[#allocation3 + $0x50] sm:$0xff] %vm441_vm5, %v4024_v5  ;;  %v4025_v59 = vadd.f32 %v6145_v17, %v3859_v24  ;;  %v3986_v6 = vpop.f32.mrb[91].mxu1  ;;  %v4050_v49 = vld [vmem:[#allocation3 + $0x20] sm:$0xff] }
 0x335   :  { %4038 = vst.msk [vmem:[#allocation3 + $0x40] sm:$0xff] %vm441_vm5, %v4022_v2  ;;  %v4023_v10 = vadd.f32 %v3986_v6, %v3857_v3  ;;  %v4053_v15 = vld [vmem:[#allocation3 + $0x38] sm:$0xff]  ;;  %v4262_v19 = vld [vmem:[#allocation3 + $0x10] sm:$0xff] }
 0x336   :  { %4041 = vst.msk [vmem:[#allocation3 + $0x58] sm:$0xff] %vm441_vm5, %v4025_v59  ;;  %v4051_v61 = vld [vmem:[#allocation3 + $0x28] sm:$0xff]  ;;  %v4260_v33 = vld [vmem:[#allocation3] sm:$0xff] }
 0x337   :  { %4039 = vst.msk [vmem:[#allocation3 + $0x48] sm:$0xff] %vm441_vm5, %v4023_v10  ;;  %v4263_v37 = vld [vmem:[#allocation3 + $0x18] sm:$0xff] }
 0x338   :  { %v4261_v0 = vld [vmem:[#allocation3 + $0x8] sm:$0xff] }
 0x339   :  { %v6148_v20 = vpop.f32.mrb[92].mxu1 }
 0x33a   :  { %v4028_v7 = vadd.f32 %v6148_v20, %v3862_v54  ;;  %v3999_v45 = vpop.f32.mrb[93].mxu1  ;;  %v6158_v16 = vpop.f32.mrb[100].mxu0 }
 0x33b   :  { %v4026_v48 = vadd.f32 %v3999_v45, %v3860_v46  ;;  %v6149_v51 = vpop.f32.mrb[94].mxu1  ;;  %v4206_v39 = vadd.f32 %v6158_v16, %v4052_v52  ;;  %v4153_v40 = vpop.f32.mrb[101].mxu0  ;;  %v4056_v8 = vld [vmem:[#allocation3 + $0x50] sm:$0xff] }
 0x33c   :  { %4044 = vst.msk [vmem:[#allocation3 + $0x70] sm:$0xff] %vm441_vm5, %v4028_v7  ;;  %v4029_v47 = vadd.f32 %v6149_v51, %v3863_v26  ;;  %v4002_v43 = vpop.f32.mrb[95].mxu1  ;;  %v4204_v42 = vadd.f32 %v4153_v40, %v4050_v49  ;;  %v6159_v9 = vpop.f32.mrb[102].mxu0  ;;  %v4054_v29 = vld [vmem:[#allocation3 + $0x40] sm:$0xff] }
 0x33d   :  { %4042 = vst.msk [vmem:[#allocation3 + $0x60] sm:$0xff] %vm441_vm5, %v4026_v48  ;;  %v4027_v50 = vadd.f32 %v4002_v43, %v3861_v30  ;;  %4222 = vst.msk [vmem:[#allocation3 + $0x30] sm:$0xff] %vm441_vm5, %v4206_v39  ;;  %v4207_v55 = vadd.f32 %v6159_v9, %v4053_v15  ;;  %v4156_v44 = vpop.f32.mrb[103].mxu0  ;;  %v4057_v58 = vld [vmem:[#allocation3 + $0x58] sm:$0xff] }
 0x33e   :  { %4045 = vst.msk [vmem:[#allocation3 + $0x78] sm:$0xff] %vm441_vm5, %v4029_v47  ;;  %4220 = vst.msk [vmem:[#allocation3 + $0x20] sm:$0xff] %vm441_vm5, %v4204_v42  ;;  %v4205_v63 = vadd.f32 %v4156_v44, %v4051_v61  ;;  %v4055_v13 = vld [vmem:[#allocation3 + $0x48] sm:$0xff] }
 0x33f   :  { %4043 = vst.msk [vmem:[#allocation3 + $0x68] sm:$0xff] %vm441_vm5, %v4027_v50  ;;  %4223 = vst.msk [vmem:[#allocation3 + $0x38] sm:$0xff] %vm441_vm5, %v4207_v55 }
 0x340   :  { %4221 = vst.msk [vmem:[#allocation3 + $0x28] sm:$0xff] %vm441_vm5, %v4205_v63 }
 0x341   :  { %v6172_v12 = vpop.f32.mrb[96].mxu1 }
 0x342   :  { %v4414_v21 = vadd.f32 %v6172_v12, %v4262_v19  ;;  %v4349_v56 = vpop.f32.mrb[97].mxu1 }
 0x343   :  { %v6162_v62 = vpop.f32.mrb[104].mxu0  ;;  %v4412_v53 = vadd.f32 %v4349_v56, %v4260_v33  ;;  %v6173_v18 = vpop.f32.mrb[98].mxu1  ;;  %v4060_v32 = vld [vmem:[#allocation3 + $0x70] sm:$0xff] }
 0x344   :  { %v4210_v28 = vadd.f32 %v6162_v62, %v4056_v8  ;;  %v4169_v23 = vpop.f32.mrb[105].mxu0  ;;  %4430 = vst.msk [vmem:[#allocation3 + $0x10] sm:$0xff] %vm441_vm5, %v4414_v21  ;;  %v4415_v1 = vadd.f32 %v6173_v18, %v4263_v37  ;;  %v4352_v4 = vpop.f32.mrb[99].mxu1  ;;  %v4266_v22 = vld [vmem:[#allocation3 + $0x30] sm:$0xff]  ;;  %v4058_v27 = vld [vmem:[#allocation3 + $0x60] sm:$0xff] }
 0x345   :  { %v4208_v57 = vadd.f32 %v4169_v23, %v4054_v29  ;;  %v6163_v11 = vpop.f32.mrb[106].mxu0  ;;  %4428 = vst.msk [vmem:[#allocation3] sm:$0xff] %vm441_vm5, %v4412_v53  ;;  %v4413_v25 = vadd.f32 %v4352_v4, %v4261_v0  ;;  %v4264_v36 = vld [vmem:[#allocation3 + $0x20] sm:$0xff]  ;;  %v4061_v60 = vld [vmem:[#allocation3 + $0x78] sm:$0xff] }
 0x346   :  { %4226 = vst.msk [vmem:[#allocation3 + $0x50] sm:$0xff] %vm441_vm5, %v4210_v28  ;;  %v4211_v35 = vadd.f32 %v6163_v11, %v4057_v58  ;;  %v4172_v34 = vpop.f32.mrb[107].mxu0  ;;  %4431 = vst.msk [vmem:[#allocation3 + $0x18] sm:$0xff] %vm441_vm5, %v4415_v1  ;;  %v4267_v24 = vld [vmem:[#allocation3 + $0x38] sm:$0xff]  ;;  %v4059_v6 = vld [vmem:[#allocation3 + $0x68] sm:$0xff] }
 0x347   :  { %4224 = vst.msk [vmem:[#allocation3 + $0x40] sm:$0xff] %vm441_vm5, %v4208_v57  ;;  %v4209_v31 = vadd.f32 %v4172_v34, %v4055_v13  ;;  %4429 = vst.msk [vmem:[#allocation3 + $0x8] sm:$0xff] %vm441_vm5, %v4413_v25  ;;  %v4265_v52 = vld [vmem:[#allocation3 + $0x28] sm:$0xff] }
 0x348   :  { %4227 = vst.msk [vmem:[#allocation3 + $0x58] sm:$0xff] %vm441_vm5, %v4211_v35 }
 0x349   :  { %4225 = vst.msk [vmem:[#allocation3 + $0x48] sm:$0xff] %vm441_vm5, %v4209_v31  ;;  %v6176_v41 = vpop.f32.mrb[100].mxu1 }
 0x34a   :  { %v4418_v38 = vadd.f32 %v6176_v41, %v4266_v22  ;;  %v4365_v5 = vpop.f32.mrb[101].mxu1 }
 0x34b   :  { %v6166_v14 = vpop.f32.mrb[108].mxu0  ;;  %v4416_v2 = vadd.f32 %v4365_v5, %v4264_v36  ;;  %v6177_v17 = vpop.f32.mrb[102].mxu1  ;;  %v4456_v15 = vld [vmem:[#allocation3 + $0x10] sm:$0xff] }
 0x34c   :  { %v4214_v59 = vadd.f32 %v6166_v14, %v4060_v32  ;;  %v4185_v3 = vpop.f32.mrb[109].mxu0  ;;  %4434 = vst.msk [vmem:[#allocation3 + $0x30] sm:$0xff] %vm441_vm5, %v4418_v38  ;;  %v4419_v10 = vadd.f32 %v6177_v17, %v4267_v24  ;;  %v4368_v54 = vpop.f32.mrb[103].mxu1  ;;  %v4454_v51 = vld [vmem:[#allocation3] sm:$0xff] }
 0x34d   :  { %v4212_v20 = vadd.f32 %v4185_v3, %v4058_v27  ;;  %v6167_v49 = vpop.f32.mrb[110].mxu0  ;;  %4432 = vst.msk [vmem:[#allocation3 + $0x20] sm:$0xff] %vm441_vm5, %v4416_v2  ;;  %v4417_v7 = vadd.f32 %v4368_v54, %v4265_v52  ;;  %v4270_v48 = vld [vmem:[#allocation3 + $0x50] sm:$0xff]  ;;  %v4457_v30 = vld [vmem:[#allocation3 + $0x18] sm:$0xff] }
 0x34e   :  { %4230 = vst.msk [vmem:[#allocation3 + $0x70] sm:$0xff] %vm441_vm5, %v4214_v59  ;;  %v4215_v46 = vadd.f32 %v6167_v49, %v4061_v60  ;;  %v4188_v45 = vpop.f32.mrb[111].mxu0  ;;  %4435 = vst.msk [vmem:[#allocation3 + $0x38] sm:$0xff] %vm441_vm5, %v4419_v10  ;;  %v4268_v40 = vld [vmem:[#allocation3 + $0x40] sm:$0xff]  ;;  %v4455_v44 = vld [vmem:[#allocation3 + $0x8] sm:$0xff] }
 0x34f   :  { %4228 = vst.msk [vmem:[#allocation3 + $0x60] sm:$0xff] %vm441_vm5, %v4212_v20  ;;  %v4213_v16 = vadd.f32 %v4188_v45, %v4059_v6  ;;  %4433 = vst.msk [vmem:[#allocation3 + $0x28] sm:$0xff] %vm441_vm5, %v4417_v7  ;;  %v4271_v42 = vld [vmem:[#allocation3 + $0x58] sm:$0xff] }
 0x350   :  { %4231 = vst.msk [vmem:[#allocation3 + $0x78] sm:$0xff] %vm441_vm5, %v4215_v46  ;;  %v4269_v8 = vld [vmem:[#allocation3 + $0x48] sm:$0xff] }
 0x351   :  { %4229 = vst.msk [vmem:[#allocation3 + $0x68] sm:$0xff] %vm441_vm5, %v4213_v16  ;;  %v6180_v26 = vpop.f32.mrb[104].mxu1 }
 0x352   :  { %v4422_v39 = vadd.f32 %v6180_v26, %v4270_v48  ;;  %v4381_v61 = vpop.f32.mrb[105].mxu1 }
 0x353   :  { %v6190_v47 = vpop.f32.mrb[112].mxu0  ;;  %v4420_v43 = vadd.f32 %v4381_v61, %v4268_v40  ;;  %v6181_v9 = vpop.f32.mrb[106].mxu1  ;;  %v4460_v58 = vld [vmem:[#allocation3 + $0x30] sm:$0xff] }
 0x354   :  { %v4608_v50 = vadd.f32 %v6190_v47, %v4456_v15  ;;  %v4543_v55 = vpop.f32.mrb[113].mxu0  ;;  %4438 = vst.msk [vmem:[#allocation3 + $0x50] sm:$0xff] %vm441_vm5, %v4422_v39  ;;  %v4423_v63 = vadd.f32 %v6181_v9, %v4271_v42  ;;  %v4384_v19 = vpop.f32.mrb[107].mxu1  ;;  %v4458_v18 = vld [vmem:[#allocation3 + $0x20] sm:$0xff] }
 0x355   :  { %v4606_v12 = vadd.f32 %v4543_v55, %v4454_v51  ;;  %v6191_v29 = vpop.f32.mrb[114].mxu0  ;;  %4436 = vst.msk [vmem:[#allocation3 + $0x40] sm:$0xff] %vm441_vm5, %v4420_v43  ;;  %v4421_v21 = vadd.f32 %v4384_v19, %v4269_v8  ;;  %v4274_v53 = vld [vmem:[#allocation3 + $0x70] sm:$0xff]  ;;  %v4461_v0 = vld [vmem:[#allocation3 + $0x38] sm:$0xff] }
 0x356   :  { %4624 = vst.msk [vmem:[#allocation3 + $0x10] sm:$0xff] %vm441_vm5, %v4608_v50  ;;  %v4609_v33 = vadd.f32 %v6191_v29, %v4457_v30  ;;  %v4546_v56 = vpop.f32.mrb[115].mxu0  ;;  %4439 = vst.msk [vmem:[#allocation3 + $0x58] sm:$0xff] %vm441_vm5, %v4423_v63  ;;  %v4272_v23 = vld [vmem:[#allocation3 + $0x60] sm:$0xff]  ;;  %v4459_v34 = vld [vmem:[#allocation3 + $0x28] sm:$0xff] }
 0x357   :  { %4622 = vst.msk [vmem:[#allocation3] sm:$0xff] %vm441_vm5, %v4606_v12  ;;  %v4607_v62 = vadd.f32 %v4546_v56, %v4455_v44  ;;  %4437 = vst.msk [vmem:[#allocation3 + $0x48] sm:$0xff] %vm441_vm5, %v4421_v21  ;;  %v4275_v57 = vld [vmem:[#allocation3 + $0x78] sm:$0xff] }
 0x358   :  { %4625 = vst.msk [vmem:[#allocation3 + $0x18] sm:$0xff] %vm441_vm5, %v4609_v33  ;;  %v4273_v32 = vld [vmem:[#allocation3 + $0x68] sm:$0xff] }
 0x359   :  { %4623 = vst.msk [vmem:[#allocation3 + $0x8] sm:$0xff] %vm441_vm5, %v4607_v62  ;;  %v6184_v37 = vpop.f32.mrb[108].mxu1 }
 0x35a   :  { %v4426_v28 = vadd.f32 %v6184_v37, %v4274_v53  ;;  %v4397_v13 = vpop.f32.mrb[109].mxu1 }
 0x35b   :  { %v6194_v1 = vpop.f32.mrb[116].mxu0  ;;  %v4424_v4 = vadd.f32 %v4397_v13, %v4272_v23  ;;  %v6185_v11 = vpop.f32.mrb[110].mxu1  ;;  %v4464_v60 = vld [vmem:[#allocation3 + $0x50] sm:$0xff] }
 0x35c   :  { %v4612_v25 = vadd.f32 %v6194_v1, %v4460_v58  ;;  %v4559_v35 = vpop.f32.mrb[117].mxu0  ;;  %4442 = vst.msk [vmem:[#allocation3 + $0x70] sm:$0xff] %vm441_vm5, %v4426_v28  ;;  %v4427_v31 = vadd.f32 %v6185_v11, %v4275_v57  ;;  %v4400_v22 = vpop.f32.mrb[111].mxu1  ;;  %v4462_v17 = vld [vmem:[#allocation3 + $0x40] sm:$0xff] }
 0x35d   :  { %v4610_v41 = vadd.f32 %v4559_v35, %v4458_v18  ;;  %v6195_v27 = vpop.f32.mrb[118].mxu0  ;;  %4440 = vst.msk [vmem:[#allocation3 + $0x60] sm:$0xff] %vm441_vm5, %v4424_v4  ;;  %v4425_v38 = vadd.f32 %v4400_v22, %v4273_v32  ;;  %v4640_v2 = vld [vmem:[#allocation3 + $0x10] sm:$0xff]  ;;  %v4465_v52 = vld [vmem:[#allocation3 + $0x58] sm:$0xff] }
 0x35e   :  { %4628 = vst.msk [vmem:[#allocation3 + $0x30] sm:$0xff] %vm441_vm5, %v4612_v25  ;;  %v4613_v36 = vadd.f32 %v6195_v27, %v4461_v0  ;;  %v4562_v5 = vpop.f32.mrb[119].mxu0  ;;  %4443 = vst.msk [vmem:[#allocation3 + $0x78] sm:$0xff] %vm441_vm5, %v4427_v31  ;;  %v4638_v3 = vld [vmem:[#allocation3] sm:$0xff]  ;;  %v4463_v45 = vld [vmem:[#allocation3 + $0x48] sm:$0xff] }
 0x35f   :  { %4626 = vst.msk [vmem:[#allocation3 + $0x20] sm:$0xff] %vm441_vm5, %v4610_v41  ;;  %v4611_v14 = vadd.f32 %v4562_v5, %v4459_v34  ;;  %4441 = vst.msk [vmem:[#allocation3 + $0x68] sm:$0xff] %vm441_vm5, %v4425_v38  ;;  %v4641_v20 = vld [vmem:[#allocation3 + $0x18] sm:$0xff] }
 0x360   :  { %4629 = vst.msk [vmem:[#allocation3 + $0x38] sm:$0xff] %vm441_vm5, %v4613_v36  ;;  %v4639_v15 = vld [vmem:[#allocation3 + $0x8] sm:$0xff] }
 0x361   :  { %4627 = vst.msk [vmem:[#allocation3 + $0x28] sm:$0xff] %vm441_vm5, %v4611_v14  ;;  %v6208_v24 = vpop.f32.mrb[112].mxu1 }
 0x362   :  { %v4770_v59 = vadd.f32 %v6208_v24, %v4640_v2  ;;  %v4705_v6 = vpop.f32.mrb[113].mxu1 }
 0x363   :  { %v6198_v10 = vpop.f32.mrb[120].mxu0  ;;  %v4768_v54 = vadd.f32 %v4705_v6, %v4638_v3  ;;  %v6209_v49 = vpop.f32.mrb[114].mxu1  ;;  %v4468_v30 = vld [vmem:[#allocation3 + $0x70] sm:$0xff] }
 0x364   :  { %v4616_v7 = vadd.f32 %v6198_v10, %v4464_v60  ;;  %v4575_v46 = vpop.f32.mrb[121].mxu0  ;;  %4786 = vst.msk [vmem:[#allocation3 + $0x10] sm:$0xff] %vm441_vm5, %v4770_v59  ;;  %v4771_v16 = vadd.f32 %v6209_v49, %v4641_v20  ;;  %v4708_v48 = vpop.f32.mrb[115].mxu1  ;;  %v4466_v9 = vld [vmem:[#allocation3 + $0x60] sm:$0xff] }
 0x365   :  { %v4614_v26 = vadd.f32 %v4575_v46, %v4462_v17  ;;  %v6199_v51 = vpop.f32.mrb[122].mxu0  ;;  %4784 = vst.msk [vmem:[#allocation3] sm:$0xff] %vm441_vm5, %v4768_v54  ;;  %v4769_v39 = vadd.f32 %v4708_v48, %v4639_v15  ;;  %v4644_v43 = vld [vmem:[#allocation3 + $0x30] sm:$0xff]  ;;  %v4469_v8 = vld [vmem:[#allocation3 + $0x78] sm:$0xff] }
 0x366   :  { %4632 = vst.msk [vmem:[#allocation3 + $0x50] sm:$0xff] %vm441_vm5, %v4616_v7  ;;  %v4617_v40 = vadd.f32 %v6199_v51, %v4465_v52  ;;  %v4578_v61 = vpop.f32.mrb[123].mxu0  ;;  %4787 = vst.msk [vmem:[#allocation3 + $0x18] sm:$0xff] %vm441_vm5, %v4771_v16  ;;  %v4642_v55 = vld [vmem:[#allocation3 + $0x20] sm:$0xff]  ;;  %v4467_v56 = vld [vmem:[#allocation3 + $0x68] sm:$0xff] }
 0x367   :  { %4630 = vst.msk [vmem:[#allocation3 + $0x40] sm:$0xff] %vm441_vm5, %v4614_v26  ;;  %v4615_v47 = vadd.f32 %v4578_v61, %v4463_v45  ;;  %4785 = vst.msk [vmem:[#allocation3 + $0x8] sm:$0xff] %vm441_vm5, %v4769_v39  ;;  %v4645_v12 = vld [vmem:[#allocation3 + $0x38] sm:$0xff] }
 0x368   :  { %4633 = vst.msk [vmem:[#allocation3 + $0x58] sm:$0xff] %vm441_vm5, %v4617_v40  ;;  %v4643_v58 = vld [vmem:[#allocation3 + $0x28] sm:$0xff] }
 0x369   :  { %4631 = vst.msk [vmem:[#allocation3 + $0x48] sm:$0xff] %vm441_vm5, %v4615_v47  ;;  %v6212_v42 = vpop.f32.mrb[116].mxu1 }
 0x36a   :  { %v4774_v50 = vadd.f32 %v6212_v42, %v4644_v43  ;;  %v4721_v44 = vpop.f32.mrb[117].mxu1 }
 0x36b   :  { %v6202_v63 = vpop.f32.mrb[124].mxu0  ;;  %v4772_v19 = vadd.f32 %v4721_v44, %v4642_v55  ;;  %v6213_v29 = vpop.f32.mrb[118].mxu1  ;;  %v4830_v0 = vld [vmem:[#allocation3 + $0x10] sm:$0xff] }
 0x36c   :  { %v4620_v21 = vadd.f32 %v6202_v63, %v4468_v30  ;;  %v4591_v33 = vpop.f32.mrb[125].mxu0  ;;  %4790 = vst.msk [vmem:[#allocation3 + $0x30] sm:$0xff] %vm441_vm5, %v4774_v50  ;;  %v4775_v62 = vadd.f32 %v6213_v29, %v4645_v12  ;;  %v4724_v53 = vpop.f32.mrb[119].mxu1  ;;  %v4828_v11 = vld [vmem:[#allocation3] sm:$0xff] }
 0x36d   :  { %v4618_v37 = vadd.f32 %v4591_v33, %v4466_v9  ;;  %v6203_v18 = vpop.f32.mrb[126].mxu0  ;;  %4788 = vst.msk [vmem:[#allocation3 + $0x20] sm:$0xff] %vm441_vm5, %v4772_v19  ;;  %v4773_v28 = vadd.f32 %v4724_v53, %v4643_v58  ;;  %v4648_v4 = vld [vmem:[#allocation3 + $0x50] sm:$0xff]  ;;  %v4831_v32 = vld [vmem:[#allocation3 + $0x18] sm:$0xff] }
 0x36e   :  { %4636 = vst.msk [vmem:[#allocation3 + $0x70] sm:$0xff] %vm441_vm5, %v4620_v21  ;;  %v4621_v23 = vadd.f32 %v6203_v18, %v4469_v8  ;;  %v4594_v13 = vpop.f32.mrb[127].mxu0  ;;  %4791 = vst.msk [vmem:[#allocation3 + $0x38] sm:$0xff] %vm441_vm5, %v4775_v62  ;;  %v4646_v35 = vld [vmem:[#allocation3 + $0x40] sm:$0xff]  ;;  %v4829_v5 = vld [vmem:[#allocation3 + $0x8] sm:$0xff] }
 0x36f   :  { %4634 = vst.msk [vmem:[#allocation3 + $0x60] sm:$0xff] %vm441_vm5, %v4618_v37  ;;  %v4619_v1 = vadd.f32 %v4594_v13, %v4467_v56  ;;  %4789 = vst.msk [vmem:[#allocation3 + $0x28] sm:$0xff] %vm441_vm5, %v4773_v28  ;;  %v4649_v41 = vld [vmem:[#allocation3 + $0x58] sm:$0xff] }
 0x370   :  { %4637 = vst.msk [vmem:[#allocation3 + $0x78] sm:$0xff] %vm441_vm5, %v4621_v23  ;;  %v4647_v60 = vld [vmem:[#allocation3 + $0x48] sm:$0xff] }
 0x371   :  { %4635 = vst.msk [vmem:[#allocation3 + $0x68] sm:$0xff] %vm441_vm5, %v4619_v1  ;;  %v6216_v57 = vpop.f32.mrb[120].mxu1 }
 0x372   :  { %v4778_v25 = vadd.f32 %v6216_v57, %v4648_v4  ;;  %v4737_v34 = vpop.f32.mrb[121].mxu1 }
 0x373   :  { %v6226_v31 = vpop.f32.mrb[128].mxu0  ;;  %v4776_v22 = vadd.f32 %v4737_v34, %v4646_v35  ;;  %v6217_v27 = vpop.f32.mrb[122].mxu1  ;;  %v4834_v52 = vld [vmem:[#allocation3 + $0x30] sm:$0xff] }
 0x374   :  { %v4958_v38 = vadd.f32 %v6226_v31, %v4830_v0  ;;  %v4893_v36 = vpop.f32.mrb[129].mxu0  ;;  %4794 = vst.msk [vmem:[#allocation3 + $0x50] sm:$0xff] %vm441_vm5, %v4778_v25  ;;  %v4779_v14 = vadd.f32 %v6217_v27, %v4649_v41  ;;  %v4740_v2 = vpop.f32.mrb[123].mxu1  ;;  %v4832_v49 = vld [vmem:[#allocation3 + $0x20] sm:$0xff] }
 0x375   :  { %v4956_v24 = vadd.f32 %v4893_v36, %v4828_v11  ;;  %v6227_v17 = vpop.f32.mrb[130].mxu0  ;;  %4792 = vst.msk [vmem:[#allocation3 + $0x40] sm:$0xff] %vm441_vm5, %v4776_v22  ;;  %v4777_v59 = vadd.f32 %v4740_v2, %v4647_v60  ;;  %v4652_v54 = vld [vmem:[#allocation3 + $0x70] sm:$0xff]  ;;  %v4835_v15 = vld [vmem:[#allocation3 + $0x38] sm:$0xff] }
 0x376   :  { %4974 = vst.msk [vmem:[#allocation3 + $0x10] sm:$0xff] %vm441_vm5, %v4958_v38  ;;  %v4959_v3 = vadd.f32 %v6227_v17, %v4831_v32  ;;  %v4896_v6 = vpop.f32.mrb[131].mxu0  ;;  %4795 = vst.msk [vmem:[#allocation3 + $0x58] sm:$0xff] %vm441_vm5, %v4779_v14  ;;  %v4650_v46 = vld [vmem:[#allocation3 + $0x60] sm:$0xff]  ;;  %v4833_v61 = vld [vmem:[#allocation3 + $0x28] sm:$0xff] }
 0x377   :  { %4972 = vst.msk [vmem:[#allocation3] sm:$0xff] %vm441_vm5, %v4956_v24  ;;  %v4957_v10 = vadd.f32 %v4896_v6, %v4829_v5  ;;  %4793 = vst.msk [vmem:[#allocation3 + $0x48] sm:$0xff] %vm441_vm5, %v4777_v59  ;;  %v4653_v26 = vld [vmem:[#allocation3 + $0x78] sm:$0xff] }
 0x378   :  { %4975 = vst.msk [vmem:[#allocation3 + $0x18] sm:$0xff] %vm441_vm5, %v4959_v3  ;;  %v4651_v30 = vld [vmem:[#allocation3 + $0x68] sm:$0xff] }
 0x379   :  { %4973 = vst.msk [vmem:[#allocation3 + $0x8] sm:$0xff] %vm441_vm5, %v4957_v10  ;;  %v6220_v20 = vpop.f32.mrb[124].mxu1 }
 0x37a   :  { %v4782_v7 = vadd.f32 %v6220_v20, %v4652_v54  ;;  %v4753_v45 = vpop.f32.mrb[125].mxu1 }
 0x37b   :  { %v6230_v16 = vpop.f32.mrb[132].mxu0  ;;  %v4780_v48 = vadd.f32 %v4753_v45, %v4650_v46  ;;  %v6221_v51 = vpop.f32.mrb[126].mxu1  ;;  %v4838_v8 = vld [vmem:[#allocation3 + $0x50] sm:$0xff] }
 0x37c   :  { %v4962_v39 = vadd.f32 %v6230_v16, %v4834_v52  ;;  %v4909_v40 = vpop.f32.mrb[133].mxu0  ;;  %4798 = vst.msk [vmem:[#allocation3 + $0x70] sm:$0xff] %vm441_vm5, %v4782_v7  ;;  %v4783_v47 = vadd.f32 %v6221_v51, %v4653_v26  ;;  %v4756_v43 = vpop.f32.mrb[127].mxu1  ;;  %v4836_v29 = vld [vmem:[#allocation3 + $0x40] sm:$0xff] }
 0x37d   :  { %v4960_v42 = vadd.f32 %v4909_v40, %v4832_v49  ;;  %v6231_v9 = vpop.f32.mrb[134].mxu0  ;;  %4796 = vst.msk [vmem:[#allocation3 + $0x60] sm:$0xff] %vm441_vm5, %v4780_v48  ;;  %v4781_v50 = vadd.f32 %v4756_v43, %v4651_v30  ;;  %v5000_v19 = vld [vmem:[#allocation3 + $0x10] sm:$0xff]  ;;  %v4839_v58 = vld [vmem:[#allocation3 + $0x58] sm:$0xff] }
 0x37e   :  { %4978 = vst.msk [vmem:[#allocation3 + $0x30] sm:$0xff] %vm441_vm5, %v4962_v39  ;;  %v4963_v55 = vadd.f32 %v6231_v9, %v4835_v15  ;;  %v4912_v44 = vpop.f32.mrb[135].mxu0  ;;  %4799 = vst.msk [vmem:[#allocation3 + $0x78] sm:$0xff] %vm441_vm5, %v4783_v47  ;;  %v4998_v33 = vld [vmem:[#allocation3] sm:$0xff]  ;;  %v4837_v13 = vld [vmem:[#allocation3 + $0x48] sm:$0xff] }
 0x37f   :  { %4976 = vst.msk [vmem:[#allocation3 + $0x20] sm:$0xff] %vm441_vm5, %v4960_v42  ;;  %v4961_v63 = vadd.f32 %v4912_v44, %v4833_v61  ;;  %4797 = vst.msk [vmem:[#allocation3 + $0x68] sm:$0xff] %vm441_vm5, %v4781_v50  ;;  %v5001_v37 = vld [vmem:[#allocation3 + $0x18] sm:$0xff] }
 0x380   :  { %4979 = vst.msk [vmem:[#allocation3 + $0x38] sm:$0xff] %vm441_vm5, %v4963_v55  ;;  %v4999_v0 = vld [vmem:[#allocation3 + $0x8] sm:$0xff] }
 0x381   :  { %4977 = vst.msk [vmem:[#allocation3 + $0x28] sm:$0xff] %vm441_vm5, %v4961_v63  ;;  %v6244_v12 = vpop.f32.mrb[128].mxu1 }
 0x382   :  { %v5128_v21 = vadd.f32 %v6244_v12, %v5000_v19  ;;  %v5063_v56 = vpop.f32.mrb[129].mxu1 }
 0x383   :  { %v6234_v62 = vpop.f32.mrb[136].mxu0  ;;  %v5126_v53 = vadd.f32 %v5063_v56, %v4998_v33  ;;  %v6245_v18 = vpop.f32.mrb[130].mxu1  ;;  %v4842_v32 = vld [vmem:[#allocation3 + $0x70] sm:$0xff] }
 0x384   :  { %v4966_v28 = vadd.f32 %v6234_v62, %v4838_v8  ;;  %v4925_v23 = vpop.f32.mrb[137].mxu0  ;;  %5144 = vst.msk [vmem:[#allocation3 + $0x10] sm:$0xff] %vm441_vm5, %v5128_v21  ;;  %v5129_v1 = vadd.f32 %v6245_v18, %v5001_v37  ;;  %v5066_v4 = vpop.f32.mrb[131].mxu1  ;;  %v4840_v27 = vld [vmem:[#allocation3 + $0x60] sm:$0xff] }
 0x385   :  { %v4964_v57 = vadd.f32 %v4925_v23, %v4836_v29  ;;  %v6235_v11 = vpop.f32.mrb[138].mxu0  ;;  %5142 = vst.msk [vmem:[#allocation3] sm:$0xff] %vm441_vm5, %v5126_v53  ;;  %v5127_v25 = vadd.f32 %v5066_v4, %v4999_v0  ;;  %v5004_v22 = vld [vmem:[#allocation3 + $0x30] sm:$0xff]  ;;  %v4843_v60 = vld [vmem:[#allocation3 + $0x78] sm:$0xff] }
 0x386   :  { %4982 = vst.msk [vmem:[#allocation3 + $0x50] sm:$0xff] %vm441_vm5, %v4966_v28  ;;  %v4967_v35 = vadd.f32 %v6235_v11, %v4839_v58  ;;  %v4928_v34 = vpop.f32.mrb[139].mxu0  ;;  %5145 = vst.msk [vmem:[#allocation3 + $0x18] sm:$0xff] %vm441_vm5, %v5129_v1  ;;  %v5002_v36 = vld [vmem:[#allocation3 + $0x20] sm:$0xff]  ;;  %v4841_v6 = vld [vmem:[#allocation3 + $0x68] sm:$0xff] }
 0x387   :  { %4980 = vst.msk [vmem:[#allocation3 + $0x40] sm:$0xff] %vm441_vm5, %v4964_v57  ;;  %v4965_v31 = vadd.f32 %v4928_v34, %v4837_v13  ;;  %5143 = vst.msk [vmem:[#allocation3 + $0x8] sm:$0xff] %vm441_vm5, %v5127_v25  ;;  %v5005_v24 = vld [vmem:[#allocation3 + $0x38] sm:$0xff] }
 0x388   :  { %4983 = vst.msk [vmem:[#allocation3 + $0x58] sm:$0xff] %vm441_vm5, %v4967_v35  ;;  %v5003_v52 = vld [vmem:[#allocation3 + $0x28] sm:$0xff] }
 0x389   :  { %4981 = vst.msk [vmem:[#allocation3 + $0x48] sm:$0xff] %vm441_vm5, %v4965_v31  ;;  %v6248_v41 = vpop.f32.mrb[132].mxu1 }
 0x38a   :  { %v5132_v38 = vadd.f32 %v6248_v41, %v5004_v22  ;;  %v5079_v5 = vpop.f32.mrb[133].mxu1 }
 0x38b   :  { %v6238_v14 = vpop.f32.mrb[140].mxu0  ;;  %v5130_v2 = vadd.f32 %v5079_v5, %v5002_v36  ;;  %v6249_v17 = vpop.f32.mrb[134].mxu1  ;;  %v8600_v45 = vld [vmem:[#allocation3 + $0x10] sm:$0xff] }
 0x38c   :  { %v4970_v59 = vadd.f32 %v6238_v14, %v4842_v32  ;;  %v4941_v3 = vpop.f32.mrb[141].mxu0  ;;  %5148 = vst.msk [vmem:[#allocation3 + $0x30] sm:$0xff] %vm441_vm5, %v5132_v38  ;;  %v5133_v10 = vadd.f32 %v6249_v17, %v5005_v24  ;;  %v5082_v54 = vpop.f32.mrb[135].mxu1  ;;  %v8597_v20 = vld [vmem:[#allocation3] sm:$0xff]  ;;  %v5215_v43 = vmul.f32 %v8600_v45, %v8600_v45  ;;  %v5179_v50 = vsel %vm441_vm5, %v8600_v45, 0.0 }
 0x38d   :  { %v4968_v49 = vadd.f32 %v4941_v3, %v4840_v27  ;;  %v6239_v7 = vpop.f32.mrb[142].mxu0  ;;  %5146 = vst.msk [vmem:[#allocation3 + $0x20] sm:$0xff] %vm441_vm5, %v5130_v2  ;;  %v5131_v46 = vadd.f32 %v5082_v54, %v5003_v52  ;;  %v5213_v16 = vmul.f32 %v8597_v20, %v8597_v20  ;;  %v8610_v39 = vld [vmem:[#allocation3 + $0x18] sm:$0xff]  ;;  %v5176_v40 = vsel %vm441_vm5, %v8597_v20, 0.0  ;;  %v5008_v42 = vld [vmem:[#allocation3 + $0x50] sm:$0xff] }
 0x38e   :  { %4986 = vst.msk [vmem:[#allocation3 + $0x70] sm:$0xff] %vm441_vm5, %v4970_v59  ;;  %v4971_v15 = vadd.f32 %v6239_v7, %v4843_v60  ;;  %v4944_v48 = vpop.f32.mrb[143].mxu0  ;;  %5149 = vst.msk [vmem:[#allocation3 + $0x38] sm:$0xff] %vm441_vm5, %v5133_v10  ;;  %v8606_v26 = vld [vmem:[#allocation3 + $0x8] sm:$0xff]  ;;  %v5006_v8 = vld [vmem:[#allocation3 + $0x40] sm:$0xff]  ;;  %v5216_v29 = vmul.f32 %v8610_v39, %v8610_v39  ;;  %v5181_v58 = vsel %vm441_vm5, %v8610_v39, 0.0 }
 0x38f   :  { %4984 = vst.msk [vmem:[#allocation3 + $0x60] sm:$0xff] %vm441_vm5, %v4968_v49  ;;  %v4969_v51 = vadd.f32 %v4944_v48, %v4841_v6  ;;  %5147 = vst.msk [vmem:[#allocation3 + $0x28] sm:$0xff] %vm441_vm5, %v5131_v46  ;;  %v5177_v61 = vsel %vm441_vm5, %v8606_v26, 0.0  ;;  %v5214_v47 = vmul.f32 %v8606_v26, %v8606_v26  ;;  %v5229_v55 = vsel %vm441_vm5, %v5213_v16, 0.0  ;;  %v5009_v56 = vld [vmem:[#allocation3 + $0x58] sm:$0xff] }
 0x390   :  { %4987 = vst.msk [vmem:[#allocation3 + $0x78] sm:$0xff] %vm441_vm5, %v4971_v15  ;;  %v5178_v30 = vadd.f32 %v5177_v61, %v5176_v40  ;;  %v5007_v37 = vld [vmem:[#allocation3 + $0x48] sm:$0xff]  ;;  %v5232_v13 = vsel %vm441_vm5, %v5215_v43, 0.0  ;;  %v5234_v34 = vsel %vm441_vm5, %v5216_v29, 0.0 }
 0x391   :  { %4985 = vst.msk [vmem:[#allocation3 + $0x68] sm:$0xff] %vm441_vm5, %v4969_v51  ;;  %v6252_v9 = vpop.f32.mrb[136].mxu1  ;;  %v5230_v44 = vsel %vm441_vm5, %v5214_v47, 0.0 }
 0x392   :  { %v5136_v63 = vadd.f32 %v6252_v9, %v5008_v42  ;;  %v5095_v19 = vpop.f32.mrb[137].mxu1  ;;  %v5180_v12 = vadd.f32 %v5179_v50, %v5178_v30  ;;  %v5231_v21 = vadd.f32 %v5230_v44, %v5229_v55 }
 0x393   :  { %v5134_v33 = vadd.f32 %v5095_v19, %v5006_v8  ;;  %v6253_v62 = vpop.f32.mrb[138].mxu1  ;;  %v8635_v0 = vld [vmem:[#allocation3 + $0x30] sm:$0xff] }
 0x394   :  { %5152 = vst.msk [vmem:[#allocation3 + $0x50] sm:$0xff] %vm441_vm5, %v5136_v63  ;;  %v5137_v53 = vadd.f32 %v6253_v62, %v5009_v56  ;;  %v5098_v18 = vpop.f32.mrb[139].mxu1  ;;  %v8631_v28 = vld [vmem:[#allocation3 + $0x20] sm:$0xff]  ;;  %v5182_v23 = vadd.f32 %v5181_v58, %v5180_v12  ;;  %v5233_v11 = vadd.f32 %v5232_v13, %v5231_v21  ;;  %v5219_v36 = vmul.f32 %v8635_v0, %v8635_v0 }
 0x395   :  { %5150 = vst.msk [vmem:[#allocation3 + $0x40] sm:$0xff] %vm441_vm5, %v5134_v33  ;;  %v5135_v1 = vadd.f32 %v5098_v18, %v5007_v37  ;;  %v5183_v4 = vsel %vm441_vm5, %v8631_v28, 0.0  ;;  %v5217_v57 = vmul.f32 %v8631_v28, %v8631_v28  ;;  %v8646_v31 = vld [vmem:[#allocation3 + $0x38] sm:$0xff]  ;;  %v5012_v5 = vld [vmem:[#allocation3 + $0x70] sm:$0xff]  ;;  %v5187_v60 = vsel %vm441_vm5, %v8635_v0, 0.0 }
 0x396   :  { %5153 = vst.msk [vmem:[#allocation3 + $0x58] sm:$0xff] %vm441_vm5, %v5137_v53  ;;  %v8642_v25 = vld [vmem:[#allocation3 + $0x28] sm:$0xff]  ;;  %v5184_v35 = vadd.f32 %v5183_v4, %v5182_v23  ;;  %v5235_v41 = vadd.f32 %v5234_v34, %v5233_v11  ;;  %v5010_v59 = vld [vmem:[#allocation3 + $0x60] sm:$0xff]  ;;  %v5220_v10 = vmul.f32 %v8646_v31, %v8646_v31  ;;  %v5189_v7 = vsel %vm441_vm5, %v8646_v31, 0.0 }
 0x397   :  { %5151 = vst.msk [vmem:[#allocation3 + $0x48] sm:$0xff] %vm441_vm5, %v5135_v1  ;;  %v5185_v32 = vsel %vm441_vm5, %v8642_v25, 0.0  ;;  %v5218_v22 = vmul.f32 %v8642_v25, %v8642_v25  ;;  %v5236_v27 = vsel %vm441_vm5, %v5217_v57, 0.0  ;;  %v5013_v54 = vld [vmem:[#allocation3 + $0x78] sm:$0xff]  ;;  %v5240_v61 = vsel %vm441_vm5, %v5219_v36, 0.0 }
 0x398   :  { %v5186_v38 = vadd.f32 %v5185_v32, %v5184_v35  ;;  %v5237_v2 = vadd.f32 %v5236_v27, %v5235_v41  ;;  %v5011_v15 = vld [vmem:[#allocation3 + $0x68] sm:$0xff]  ;;  %v5242_v44 = vsel %vm441_vm5, %v5220_v10, 0.0 }
 0x399   :  { %v6256_v14 = vpop.f32.mrb[140].mxu1  ;;  %v5238_v24 = vsel %vm441_vm5, %v5218_v22, 0.0 }
 0x39a   :  { %v5140_v17 = vadd.f32 %v6256_v14, %v5012_v5  ;;  %v5111_v3 = vpop.f32.mrb[141].mxu1  ;;  %v5188_v6 = vadd.f32 %v5187_v60, %v5186_v38  ;;  %v5239_v46 = vadd.f32 %v5238_v24, %v5237_v2 }
 0x39b   :  { %v5138_v52 = vadd.f32 %v5111_v3, %v5010_v59  ;;  %v6257_v49 = vpop.f32.mrb[142].mxu1  ;;  %v8667_v30 = vld [vmem:[#allocation3 + $0x50] sm:$0xff] }
 0x39c   :  { %5156 = vst.msk [vmem:[#allocation3 + $0x70] sm:$0xff] %vm441_vm5, %v5140_v17  ;;  %v5141_v16 = vadd.f32 %v6257_v49, %v5013_v54  ;;  %v5114_v48 = vpop.f32.mrb[143].mxu1  ;;  %v8663_v51 = vld [vmem:[#allocation3 + $0x40] sm:$0xff]  ;;  %v5190_v40 = vadd.f32 %v5189_v7, %v5188_v6  ;;  %v5241_v9 = vadd.f32 %v5240_v61, %v5239_v46  ;;  %v5223_v33 = vmul.f32 %v8667_v30, %v8667_v30 }
 0x39d   :  { %5154 = vst.msk [vmem:[#allocation3 + $0x60] sm:$0xff] %vm441_vm5, %v5138_v52  ;;  %v5139_v47 = vadd.f32 %v5114_v48, %v5011_v15  ;;  %v5191_v43 = vsel %vm441_vm5, %v8663_v51, 0.0  ;;  %v5221_v42 = vmul.f32 %v8663_v51, %v8663_v51  ;;  %v8678_v63 = vld [vmem:[#allocation3 + $0x58] sm:$0xff]  ;;  %v5195_v56 = vsel %vm441_vm5, %v8667_v30, 0.0 }
 0x39e   :  { %5157 = vst.msk [vmem:[#allocation3 + $0x78] sm:$0xff] %vm441_vm5, %v5141_v16  ;;  %v8674_v50 = vld [vmem:[#allocation3 + $0x48] sm:$0xff]  ;;  %v5192_v55 = vadd.f32 %v5191_v43, %v5190_v40  ;;  %v5243_v12 = vadd.f32 %v5242_v44, %v5241_v9  ;;  %v5224_v37 = vmul.f32 %v8678_v63, %v8678_v63  ;;  %v5197_v18 = vsel %vm441_vm5, %v8678_v63, 0.0 }
 0x39f   :  { %5155 = vst.msk [vmem:[#allocation3 + $0x68] sm:$0xff] %vm441_vm5, %v5139_v47  ;;  %v5193_v8 = vsel %vm441_vm5, %v8674_v50, 0.0  ;;  %v5222_v19 = vmul.f32 %v8674_v50, %v8674_v50  ;;  %v5244_v29 = vsel %vm441_vm5, %v5221_v42, 0.0  ;;  %v5248_v4 = vsel %vm441_vm5, %v5223_v33, 0.0 }
 0x3a0   :  { %v5194_v21 = vadd.f32 %v5193_v8, %v5192_v55  ;;  %v5245_v62 = vadd.f32 %v5244_v29, %v5243_v12  ;;  %v5250_v41 = vsel %vm441_vm5, %v5224_v37, 0.0 }
 0x3a1   :  { %v5246_v58 = vsel %vm441_vm5, %v5222_v19, 0.0 }
 0x3a2   :  { %v5196_v53 = vadd.f32 %v5195_v56, %v5194_v21  ;;  %v5247_v23 = vadd.f32 %v5246_v58, %v5245_v62 }
 0x3a3   :  { %v8697_v57 = vld [vmem:[#allocation3 + $0x70] sm:$0xff] }
 0x3a4   :  { %v8694_v13 = vld [vmem:[#allocation3 + $0x60] sm:$0xff]  ;;  %v5198_v1 = vadd.f32 %v5197_v18, %v5196_v53  ;;  %v5249_v34 = vadd.f32 %v5248_v4, %v5247_v23  ;;  %v5227_v60 = vmul.f32 %v8697_v57, %v8697_v57  ;;  %v5203_v24 = vsel %vm441_vm5, %v8697_v57, 0.0 }
 0x3a5   :  { %v5225_v11 = vmul.f32 %v8694_v13, %v8694_v13  ;;  %v5199_v35 = vsel %vm441_vm5, %v8694_v13, 0.0  ;;  %v8706_v27 = vld [vmem:[#allocation3 + $0x78] sm:$0xff] }
 0x3a6   :  { %v8703_v32 = vld [vmem:[#allocation3 + $0x68] sm:$0xff]  ;;  %v5200_v22 = vadd.f32 %v5199_v35, %v5198_v1  ;;  %v5251_v5 = vadd.f32 %v5250_v41, %v5249_v34  ;;  %v5228_v3 = vmul.f32 %v8706_v27, %v8706_v27  ;;  %v5205_v10 = vsel %vm441_vm5, %v8706_v27, 0.0 }
 0x3a7   :  { %v5226_v38 = vmul.f32 %v8703_v32, %v8703_v32  ;;  %v5201_v36 = vsel %vm441_vm5, %v8703_v32, 0.0  ;;  %v5252_v14 = vsel %vm441_vm5, %v5225_v11, 0.0  ;;  %v5256_v54 = vsel %vm441_vm5, %v5227_v60, 0.0 }
 0x3a8   :  { %v5202_v2 = vadd.f32 %v5201_v36, %v5200_v22  ;;  %v5253_v17 = vadd.f32 %v5252_v14, %v5251_v5  ;;  %v5258_v46 = vsel %vm441_vm5, %v5228_v3, 0.0 }
 0x3a9   :  { %v5254_v59 = vsel %vm441_vm5, %v5226_v38, 0.0 }
 0x3aa   :  { %v5204_v6 = vadd.f32 %v5203_v24, %v5202_v2  ;;  %v5255_v52 = vadd.f32 %v5254_v59, %v5253_v17 }
 0x3ac   :  { %v5206_v49 = vadd.f32 %v5205_v10, %v5204_v6  ;;  %v5257_v7 = vadd.f32 %v5256_v54, %v5255_v52 }
 0x3ae   :  { %v5207_v16 = vrot.slane %v5206_v49, 4  ;;  %v5259_v15 = vadd.f32 %v5258_v46, %v5257_v7 }
 0x3b0   :  { %v5208_v48 = vadd.f32 %v5207_v16, %v5206_v49  ;;  %v5260_v40 = vrot.slane %v5259_v15, 4 }
 0x3b2   :  { %v5209_v61 = vrot.slane %v5208_v48, 2  ;;  %v5261_v47 = vadd.f32 %v5260_v40, %v5259_v15 }
 0x3b4   :  { %v5210_v43 = vadd.f32 %v5209_v61, %v5208_v48  ;;  %v5262_v42 = vrot.slane %v5261_v47, 2 }
 0x3b6   :  { %v5211_v9 = vrot.slane %v5210_v43, 1  ;;  %v5263_v55 = vadd.f32 %v5262_v42, %v5261_v47 }
 0x3b8   :  { %v5212_v44 = vadd.f32 %v5211_v9, %v5210_v43  ;;  %v5264_v8 = vrot.slane %v5263_v55, 1 }
 0x3ba   :  { %v8724_v19 = vmul.f32 0.0078125, %v5212_v44  ;;  %v5265_v12 = vadd.f32 %v5264_v8, %v5263_v55 }
 0x3bc   :  { %v5268_v29 = vmul.f32 %v8724_v19, %v8724_v19  ;;  %v5267_v21 = vmul.f32 0.0078125, %v5265_v12  ;;  %v5283_v56 = vsub.f32 %v8694_v13, %v8724_v19  ;;  %v5284_v62 = vsub.f32 %v8703_v32, %v8724_v19 }
 0x3bd   :  { %v5285_v58 = vsub.f32 %v8697_v57, %v8724_v19  ;;  %v5286_v53 = vsub.f32 %v8706_v27, %v8724_v19  ;;  %v5271_v23 = vsub.f32 %v8597_v20, %v8724_v19  ;;  %v5272_v1 = vsub.f32 %v8606_v26, %v8724_v19  ;;  %v8747_v57 = vld [vmem:[%s8849_s5] ss:$0 sm:$0xff]  ;;  %s6325_s5 = smov [#allocation4]  }
 0x3be   :  { %v5269_v33 = vsub.f32 %v5267_v21, %v5268_v29  ;;  %v5273_v4 = vsub.f32 %v8600_v45, %v8724_v19  ;;  %v8755_v20 = vld [vmem:[%s8850_s6] ss:$0 sm:$0xff]  ;;  %v5274_v41 = vsub.f32 %v8610_v39, %v8724_v19  ;;  %v5275_v14 = vsub.f32 %v8631_v28, %v8724_v19  ;;  %s5420_s6 = sshll.u32 %s6325_s5, 4  ;;  %s5421_s6 = int_to_ptr.vmem [resolvable:$true] %s5420_s6 }
 0x3bf   :  { %v5276_v3 = vsub.f32 %v8642_v25, %v8724_v19  ;;  %v5277_v7 = vsub.f32 %v8635_v0, %v8724_v19  ;;  %v5278_v61 = vsub.f32 %v8646_v31, %v8724_v19  ;;  %v5279_v55 = vsub.f32 %v8663_v51, %v8724_v19  ;;  %s6299_s25 = scalar_lea.vmem %s5421_s6, 128  ;;  %p6304_p1 = scmp.lt.s32.totalorder %s5421_s6, %s5421_s6 }
 0x3c0   :  { %v5270_v37 = vmax.f32 %v5269_v33, 0.0  ;;  %v5280_v21 = vsub.f32 %v8674_v50, %v8724_v19  ;;  %p6300_p0 = scmp.ne.s32.totalorder %s5421_s6, %s6299_s25  ;;  %p6305_p2 = scmp.lt.s32.totalorder %s6299_s25, %s6299_s25 }
 0x3c2   :  { %v5287_v18 = vadd.f32 1e-05, %v5270_v37  ;;  %p6306_p3 = por %p6305_p2, %p6304_p1 }
 0x3c4   :  { %6297 = vrsqrt.f32 %v5287_v18  ;;  %v5281_v18 = vsub.f32 %v8667_v30, %v8724_v19  ;;  %p6307_p4 = pnand %p6306_p3, %p6300_p0 }
 0x3ce   :  { %v8742_v11 = vpop.eup %6297 }
 0x3cf   :  { %v5289_v35 = vmul.f32 %v8742_v11, %v5271_v23  ;;  %v5290_v34 = vmul.f32 %v8742_v11, %v5272_v1  ;;  %v5291_v22 = vmul.f32 %v8742_v11, %v5273_v4  ;;  %v5292_v5 = vmul.f32 %v8742_v11, %v5274_v41 }
 0x3d0   :  { %v5293_v2 = vmul.f32 %v8742_v11, %v5275_v14  ;;  %v5294_v10 = vmul.f32 %v8742_v11, %v5276_v3  ;;  %v8776_v49 = vmul.f32 %v8742_v11, %v5285_v58  ;;  %v8781_v46 = vmul.f32 %v8742_v11, %v5286_v53 }
 0x3d1   :  { %v5311_v45 = vmul.f32 %v8747_v57, %v5289_v35  ;;  %v5312_v26 = vmul.f32 %v8747_v57, %v5290_v34  ;;  %v5313_v36 = vmul.f32 %v8747_v57, %v5291_v22  ;;  %v5314_v39 = vmul.f32 %v8747_v57, %v5292_v5 }
 0x3d2   :  { %v5315_v6 = vmul.f32 %v8747_v57, %v5293_v2  ;;  %v5295_v25 = vmul.f32 %v8742_v11, %v5277_v7  ;;  %v5316_v40 = vmul.f32 %v8747_v57, %v5294_v10  ;;  %v5296_v47 = vmul.f32 %v8742_v11, %v5278_v61 }
 0x3d3   :  { %v5333_v27 = vadd.f32 %v8755_v20, %v5311_v45  ;;  %v5334_v38 = vadd.f32 %v8755_v20, %v5312_v26  ;;  %v5335_v59 = vadd.f32 %v8755_v20, %v5313_v36  ;;  %v5336_v28 = vadd.f32 %v8755_v20, %v5314_v39 }
 0x3d4   :  { %v5337_v48 = vadd.f32 %v8755_v20, %v5315_v6  ;;  %v5338_v42 = vadd.f32 %v8755_v20, %v5316_v40  ;;  %v5317_v9 = vmul.f32 %v8747_v57, %v5295_v25  ;;  %v5318_v44 = vmul.f32 %v8747_v57, %v5296_v47 }
 0x3d5   :  { %v5349_v60 = vmul.f32 0.01, %v5333_v27  ;;  %v5350_v17 = vmul.f32 0.01, %v5334_v38  ;;  %v5351_v54 = vmul.f32 0.01, %v5335_v59  ;;  %v5297_v31 = vmul.f32 %v8742_v11, %v5279_v55 }
 0x3d6   :  { %v5352_v15 = vmul.f32 0.01, %v5336_v28  ;;  %v5353_v0 = vmul.f32 0.01, %v5337_v48  ;;  %v5354_v12 = vmul.f32 0.01, %v5338_v42  ;;  %v5339_v29 = vadd.f32 %v8755_v20, %v5317_v9 }
 0x3d7   :  { %v5365_v24 = vmax.f32 %v5333_v27, %v5349_v60  ;;  %v5366_v52 = vmax.f32 %v5334_v38, %v5350_v17  ;;  %v5367_v16 = vmax.f32 %v5335_v59, %v5351_v54  ;;  %v5340_v33 = vadd.f32 %v8755_v20, %v5318_v44 }
 0x3d8   :  { %v5368_v43 = vmax.f32 %v5336_v28, %v5352_v15  ;;  %v5369_v8 = vmax.f32 %v5337_v48, %v5353_v0  ;;  %v5370_v58 = vmax.f32 %v5338_v42, %v5354_v12  ;;  %v5355_v53 = vmul.f32 0.01, %v5339_v29 }
 0x3d9   :  { %5381 = vxpose.xlu0.b32.start [1/16] (narrow) %v5365_v24, 8  ;;  %v5319_v37 = vmul.f32 %v8747_v57, %v5297_v31  ;;  %v5298_v51 = vmul.f32 %v8742_v11, %v5280_v21  ;;  %v5356_v23 = vmul.f32 0.01, %v5340_v33  ;;  %v5299_v50 = vmul.f32 %v8742_v11, %v5281_v18 }
 0x3da   :  { %v5371_v1 = vmax.f32 %v5339_v29, %v5355_v53  ;;  %v5282_v34 = vsub.f32 %v8678_v63, %v8724_v19  ;;  %v5301_v27 = vmul.f32 %v8742_v11, %v5283_v56  ;;  %v5302_v14 = vmul.f32 %v8742_v11, %v5284_v62 }
 0x3db   :  { %v5341_v4 = vadd.f32 %v8755_v20, %v5319_v37  ;;  %v5320_v35 = vmul.f32 %v8747_v57, %v5298_v51  ;;  %v5372_v22 = vmax.f32 %v5340_v33, %v5356_v23  ;;  %v5321_v41 = vmul.f32 %v8747_v57, %v5299_v50 }
 0x3dc   :  { %v5300_v30 = vmul.f32 %v8742_v11, %v5282_v34  ;;  %v5323_v13 = vmul.f32 %v8747_v57, %v5301_v27  ;;  %v5324_v39 = vmul.f32 %v8747_v57, %v5302_v14  ;;  %v5325_v19 = vmul.f32 %v8747_v57, %v8776_v49 }
 0x3dd   :  { %5382 = vxpose.xlu0.b32.cont [2/16] (narrow) %v5366_v52, 8  ;;  %v5357_v45 = vmul.f32 0.01, %v5341_v4  ;;  %v5342_v26 = vadd.f32 %v8755_v20, %v5320_v35  ;;  %v5343_v5 = vadd.f32 %v8755_v20, %v5321_v41  ;;  %v5326_v52 = vmul.f32 %v8747_v57, %v8781_v46 }
 0x3de   :  { %v5322_v63 = vmul.f32 %v8747_v57, %v5300_v30  ;;  %v5345_v59 = vadd.f32 %v8755_v20, %v5323_v13  ;;  %v5346_v32 = vadd.f32 %v8755_v20, %v5324_v39  ;;  %v5347_v10 = vadd.f32 %v8755_v20, %v5325_v19 }
 0x3df   :  { %v5373_v38 = vmax.f32 %v5341_v4, %v5357_v45  ;;  %v5358_v36 = vmul.f32 0.01, %v5342_v26  ;;  %v5359_v2 = vmul.f32 0.01, %v5343_v5  ;;  %v5348_v7 = vadd.f32 %v8755_v20, %v5326_v52 }
 0x3e0   :  { %v5344_v24 = vadd.f32 %v8755_v20, %v5322_v63  ;;  %v5361_v6 = vmul.f32 0.01, %v5345_v59  ;;  %v5362_v11 = vmul.f32 0.01, %v5346_v32  ;;  %v5363_v28 = vmul.f32 0.01, %v5347_v10 }
 0x3e1   :  { %5383 = vxpose.xlu0.b32.cont [3/16] (narrow) %v5367_v16, 8  ;;  %v5374_v60 = vmax.f32 %v5342_v26, %v5358_v36  ;;  %v5375_v56 = vmax.f32 %v5343_v5, %v5359_v2  ;;  %v5364_v16 = vmul.f32 0.01, %v5348_v7 }
 0x3e2   :  { %v5360_v17 = vmul.f32 0.01, %v5344_v24  ;;  %v5377_v62 = vmax.f32 %v5345_v59, %v5361_v6  ;;  %v5378_v54 = vmax.f32 %v5346_v32, %v5362_v11  ;;  %v5379_v25 = vmax.f32 %v5347_v10, %v5363_v28 }
 0x3e3   :  { %v5380_v15 = vmax.f32 %v5348_v7, %v5364_v16 }
 0x3e4   :  { %v5376_v3 = vmax.f32 %v5344_v24, %v5360_v17 }
 0x3e5   :  { %5384 = vxpose.xlu0.b32.cont [4/16] (narrow) %v5368_v43, 8 }
 0x3e9   :  { %5385 = vxpose.xlu0.b32.cont [5/16] (narrow) %v5369_v8, 8 }
 0x3ed   :  { %5386 = vxpose.xlu0.b32.cont [6/16] (narrow) %v5370_v58, 8 }
 0x3f1   :  { %5387 = vxpose.xlu0.b32.cont [7/16] (narrow) %v5371_v1, 8 }
 0x3f5   :  { %5388 = vxpose.xlu0.b32.cont [8/16] (narrow) %v5372_v22, 8 }
 0x3f9   :  { %5389 = vxpose.xlu0.b32.cont [9/16] (narrow) %v5373_v38, 8 }
 0x3fd   :  { %5390 = vxpose.xlu0.b32.cont [10/16] (narrow) %v5374_v60, 8 }
 0x401   :  { %5391 = vxpose.xlu0.b32.cont [11/16] (narrow) %v5375_v56, 8 }
 0x405   :  { %5392 = vxpose.xlu0.b32.cont [12/16] (narrow) %v5376_v3, 8 }
 0x409   :  { %5393 = vxpose.xlu0.b32.cont [13/16] (narrow) %v5377_v62, 8 }
 0x40d   :  { %5394 = vxpose.xlu0.b32.cont [14/16] (narrow) %v5378_v54, 8 }
 0x411   :  { %5395 = vxpose.xlu0.b32.cont [15/16] (narrow) %v5379_v25, 8 }
 0x415   :  { %5396 = vxpose.xlu0.b32.end [16/16] (narrow) %v5380_v15, 8 }
 0x459   :  { %v5397_v49 = vpop.trf.xlu0 }
 0x45a   :  { %5413 = vst [vmem:[#allocation4] sm:$0xff] %v5397_v49 }
 0x45b   :  { %6310 = shalt.err (!%p6307_p4)
}
 0x45c   :  { %s6311_s27 = scalar_lea.hbm %s8851_s7, 128 }
 0x45d   :  { %p6312_p5 = scmp.ne.s32.totalorder %s8851_s7, %s6311_s27  ;;  %p6315_p6 = scmp.lt.u32.totalorder %s6311_s27, %s8851_s7 }
 0x45f   :  { %p6317_p7 = pnand %p6315_p6, %p6312_p5 }
 0x461   :  { %6320 = shalt.err (!%p6317_p7)
}
 0x462   :  { %5423 = dma.vmem_to_hbm [thread:$0]  %s5421_s6, 128, %s8851_s7, [#allocation5]  }
 0x463   :  { %6321 = dma.done.wait [#allocation5], 128  }
 0x464   :  { %6322 = vsyncadd [#allocation5], 4294967168 }
 0x465   :  { %5427 = vsyncpa [#allocation5], 1 }

</bundles_post_ra>
